<compile_context>
chip_gen: v6e
topology: v6e:2x2x1
jax: 0.10.0
libtpu: 0.0.40
codegen_flags: <defaults>
</compile_context>

<pallas_src>
import functools

import jax
import jax.numpy as jnp
from jax.experimental import pallas as pl
from jax.experimental.pallas import tpu as pltpu


# ----------------------------------------------------------------------------
# Fused decoder-block kernel: [x | skip] -> conv3x3x3+ReLU -> conv3x3x3+ReLU.
# One batch element per grid step.  Activations live in (rows=D*H or D,H,
# lanes=W*C) layout; kw / W-padding are folded into banded weights so each of
# the 9 (kd, kh) taps is a single lane-dense MXU matmul.
# ----------------------------------------------------------------------------
def _decoder_block_kernel(*refs, D, H, has_skip):
    if has_skip:
        (x_ref, s_ref, b1x_ref, b1s_ref, b2_ref, bias1_ref, bias2_ref,
         o_ref, xpad, spad, mpad, acc) = refs
    else:
        (x_ref, b1x_ref, b2_ref, bias1_ref, bias2_ref,
         o_ref, xpad, mpad, acc) = refs
        s_ref = b1s_ref = spad = None

    # In-kernel zero padding along D/H (W/C padding is implicit in the banded
    # weights).  Interior written at offset 1; halo rows stay zero.
    xpad[...] = jnp.zeros(xpad.shape, xpad.dtype)
    xpad[1:D + 1, 1:H + 1, :] = x_ref[0].astype(xpad.dtype)
    if has_skip:
        spad[...] = jnp.zeros(spad.shape, spad.dtype)
        spad[1:D + 1, 1:H + 1, :] = s_ref[0].astype(spad.dtype)

    # conv1 (+ implicit channel concat via split weights): 9 lane-dense taps
    # accumulated into the VMEM scratch accumulator (f32).
    for t in range(9):
        kd, kh = divmod(t, 3)
        xs = xpad[kd:kd + D, kh:kh + H, :].reshape(D * H, -1)
        part = jnp.dot(xs, b1x_ref[t], preferred_element_type=jnp.float32)
        if has_skip:
            ss = spad[kd:kd + D, kh:kh + H, :].reshape(D * H, -1)
            part = part + jnp.dot(ss, b1s_ref[t],
                                  preferred_element_type=jnp.float32)
        if t == 0:
            acc[...] = part
        else:
            acc[...] += part
    mid = jnp.maximum(acc[...] + bias1_ref[...], 0.0)

    # conv2 input stays in VMEM -- no HBM round trip between the two convs.
    mpad[...] = jnp.zeros(mpad.shape, mpad.dtype)
    mpad[1:D + 1, 1:H + 1, :] = mid.reshape(D, H, -1).astype(mpad.dtype)

    for t in range(9):
        kd, kh = divmod(t, 3)
        ms = mpad[kd:kd + D, kh:kh + H, :].reshape(D * H, -1)
        part = jnp.dot(ms, b2_ref[t], preferred_element_type=jnp.float32)
        if t == 0:
            acc[...] = part
        else:
            acc[...] += part
    # Lane-dense store: (D*H, W*Cout) -- last dim is 64..256 lanes.
    o_ref[0] = jnp.maximum(acc[...] + bias2_ref[...], 0.0).astype(o_ref.dtype)


# ----------------------------------------------------------------------------
# Host-side weight preparation.
# ----------------------------------------------------------------------------
def _build_banded(w, W):
    """Fold the kw axis (and implicit zero padding along W) into banded mats.

    w: (3, 3, 3, Cin, Cout) -> (9, W*Cin, W*Cout), one matrix per (kd, kh)
    tap with B[t, r*Cin+ci, w*Cout+co] = w[kd, kh, r-w+1, ci, co] when
    0 <= r-w+1 < 3, else 0 (out-of-band rows == zero padding along W).
    """
    _, _, _, cin, cout = w.shape
    wk = w.reshape(9, 3, cin, cout)
    sel = jnp.stack(
        [jnp.eye(W, W, k=1 - kw, dtype=w.dtype) for kw in range(3)])  # (3,W,W)
    banded = jnp.einsum("tkio,krw->triwo", wk, sel)
    return banded.reshape(9, W * cin, W * cout)


def fused_decoder_conv(xup, skip, b1x, b1s, b2, bias1, bias2):
    """One pallas_call: [xup | skip] -> conv+ReLU -> conv+ReLU (channels-last)."""
    N, D, H, W, Cx = xup.shape
    Cm = bias1.shape[-1] // W
    has_skip = skip is not None
    Cs = skip.shape[-1] if has_skip else 0

    x2 = xup.reshape(N, D, H, W * Cx)            # free view, lane axis = W*Cx
    inputs = [x2]
    in_specs = [pl.BlockSpec((1, D, H, W * Cx), lambda n: (n, 0, 0, 0))]
    scratch = [pltpu.VMEM((D + 2, H + 2, W * Cx), jnp.bfloat16)]
    if has_skip:
        s2 = skip.reshape(N, D, H, W * Cs)
        inputs.append(s2)
        in_specs.append(pl.BlockSpec((1, D, H, W * Cs), lambda n: (n, 0, 0, 0)))
        scratch.append(pltpu.VMEM((D + 2, H + 2, W * Cs), jnp.bfloat16))
        weights = [b1x, b1s, b2]
    else:
        weights = [b1x, b2]
    inputs += weights + [bias1, bias2]
    in_specs += [pl.BlockSpec(wt.shape, lambda n: (0, 0, 0)) for wt in weights]
    in_specs += [pl.BlockSpec((1, W * Cm), lambda n: (0, 0))] * 2
    scratch += [pltpu.VMEM((D + 2, H + 2, W * Cm), jnp.bfloat16),  # conv1 out
                pltpu.VMEM((D * H, W * Cm), jnp.float32)]          # accumulator

    # Advisory cost hint for the XLA scheduler.
    flops = 2 * N * 9 * (D * H) * (W * Cm) * (W * Cx + W * Cs + W * Cm)
    bytes_accessed = int(
        sum(int(a.size) * a.dtype.itemsize for a in inputs)
        + 4 * N * D * H * W * Cm)

    # TODO(synk): for large volumes (>~64^3) add a D-tiled grid axis with a
    # 1-voxel halo so the working set stays inside v7x's 64 MiB VMEM.
    out = pl.pallas_call(
        functools.partial(_decoder_block_kernel, D=D, H=H, has_skip=has_skip),
        out_shape=jax.ShapeDtypeStruct((N, D * H, W * Cm), jnp.float32),
        grid=(N,),
        in_specs=in_specs,
        out_specs=pl.BlockSpec((1, D * H, W * Cm), lambda n: (n, 0, 0)),
        scratch_shapes=scratch,
        compiler_params=pltpu.CompilerParams(
            dimension_semantics=("parallel",),       # both TCs on v7x
            vmem_limit_bytes=32 * 1024 * 1024),
        cost_estimate=pl.CostEstimate(flops=flops, transcendentals=0,
                                      bytes_accessed=bytes_accessed),
    )(*inputs)
    return out.reshape(N, D, H, W, Cm)               # free view back to NDHWC


# ----------------------------------------------------------------------------
# Decoder block (Vnet-style): upsample x2 -> concat skip -> conv/relu x2.
# ----------------------------------------------------------------------------
def decoder_block_vnet(x, skip, params, cache):
    N, d, h, w, C = x.shape
    D, H, W = 2 * d, 2 * h, 2 * w
    # TODO(synk): fuse the x2 trilinear (align_corners=False) upsample into
    # the Pallas kernel as a fixed-weight 8-neighbour lerp to drop this extra
    # HBM round trip.
    xup = jax.image.resize(x, (N, D, H, W, C), method="trilinear")

    if W not in cache:     # banded weights depend only on W, fixed per block
        cm = params["b1"].shape[0]
        cs = skip.shape[-1] if skip is not None else 0
        b1x = _build_banded(params["w1"][:, :, :, :C, :], W)
        b1s = _build_banded(params["w1"][:, :, :, C:, :], W) if cs else None
        b2 = _build_banded(params["w2"], W)
        bias1 = jnp.tile(params["b1"], W).reshape(1, W * cm)
        bias2 = jnp.tile(params["b2"], W).reshape(1, W * cm)
        cache[W] = (b1x, b1s, b2, bias1, bias2)
    b1x, b1s, b2, bias1, bias2 = cache[W]
    return fused_decoder_conv(xup, skip, b1x, b1s, b2, bias1, bias2)


# ----------------------------------------------------------------------------
# UnetDecoder3D (JAX/Pallas version).
# ----------------------------------------------------------------------------
class UnetDecoder3D:

    def __init__(self, encoder_channels, decoder_channels, skip_levels=3,
                 aug_top_feat=False, key=None):
        assert not aug_top_feat, "center block not modeled (aug_top_feat=False)"
        self.nb_decoder = len(decoder_channels)
        self.skip_levels = skip_levels
        in_channels, skip_channels, out_channels = self.prepare_channels(
            encoder_channels, decoder_channels, skip_levels, aug_top_feat)
        self.skip_channels = skip_channels

        if key is None:
            key = jax.random.PRNGKey(0)
        self.params = []
        self._banded_cache = [dict() for _ in range(self.nb_decoder)]
        for in_ch, skip_ch, out_ch in zip(in_channels, skip_channels,
                                          out_channels):
            c1_in = in_ch + skip_ch
            key, k1, k2, k3, k4 = jax.random.split(key, 5)
            self.params.append(dict(
                # weights stored bf16 (bf16 MXU path, half the HBM/VMEM bytes)
                w1=(0.05 * jax.random.normal(
                    k1, (3, 3, 3, c1_in, out_ch), jnp.float32)
                    ).astype(jnp.bfloat16),
                b1=0.01 * jax.random.normal(k2, (out_ch,), jnp.float32),
                w2=(0.05 * jax.random.normal(
                    k3, (3, 3, 3, out_ch, out_ch), jnp.float32)
                    ).astype(jnp.bfloat16),
                b2=0.01 * jax.random.normal(k4, (out_ch,), jnp.float32),
            ))

    def prepare_channels(self, encoder_channels, decoder_channels,
                         skip_levels=3, aug_top_feat=False):
        self.head_channels = encoder_channels[-1]
        encoder_channels = (list(encoder_channels)[:-skip_levels - 2:-1]
                            + [0] * self.nb_decoder)
        skip_channels = [encoder_channels[1 + i] for i in range(self.nb_decoder)]
        in_channels = [self.head_channels] + list(decoder_channels[:-1])
        out_channels = list(decoder_channels)
        return in_channels, skip_channels, out_channels

    def __call__(self, *features):
        # features arrive NCDHW (PyTorch convention), shallow -> deep.
        feats_ncdhw = list(features)[::-1]
        feats = [jnp.transpose(f, (0, 2, 3, 4, 1)) for f in feats_ncdhw]  # NDHWC
        head = feats[0]
        skips = feats[1:]
        x = head                       # self.center == nn.Identity()
        outputs = [feats_ncdhw[0]]     # head passes through unchanged
        for i in range(self.nb_decoder):
            skip = skips[i] if self.skip_channels[i] else None
            x = decoder_block_vnet(x, skip, self.params[i],
                                   self._banded_cache[i])
            outputs.append(jnp.transpose(x, (0, 4, 1, 2, 3)))
        # TODO(synk): drop the NCDHW<->NDHWC boundary transposes entirely if
        # the surrounding pipeline can stay channels-last.
        return outputs[::-1]


if __name__ == "__main__":
    key = jax.random.PRNGKey(0)
    encoder_channels = (4, 8, 16, 32)
    decoder_channels = (16, 8, 4)

    # Encoder feature pyramid, shallow -> deep (NCDHW), batch=2.
    k0, k1, k2, k3, kp = jax.random.split(key, 5)
    f0 = jax.random.normal(k0, (2, 4, 16, 16, 16), jnp.float32)
    f1 = jax.random.normal(k1, (2, 8, 8, 8, 8), jnp.float32)
    f2 = jax.random.normal(k2, (2, 16, 4, 4, 4), jnp.float32)
    f3 = jax.random.normal(k3, (2, 32, 2, 2, 2), jnp.float32)

    decoder = UnetDecoder3D(encoder_channels, decoder_channels,
                            skip_levels=3, key=kp)
    outs = decoder(f0, f1, f2, f3)
    outs = [jax.block_until_ready(o) for o in outs]

    # sanity: shapes follow decoder_channels reversed ordering
    assert outs[0].shape == (2, 4, 16, 16, 16)
    assert outs[1].shape == (2, 8, 8, 8, 8)
    assert outs[2].shape == (2, 16, 4, 4, 4)
    assert outs[3].shape == (2, 32, 2, 2, 2)

    # Cross-check against a pure-JAX reference of the same modeled block
    # (trilinear x2 -> concat -> conv3x3x3+ReLU -> conv3x3x3+ReLU).
    def ref_block(x, skip, p):
        n, dd, hh, ww, cc = x.shape
        xu = jax.image.resize(x, (n, 2 * dd, 2 * hh, 2 * ww, cc),
                              method="trilinear")
        if skip is not None:
            xu = jnp.concatenate([xu, skip], axis=-1)

        def conv(v, wgt, b):
            y = jax.lax.conv_general_dilated(
                v, wgt.astype(jnp.float32), (1, 1, 1), "SAME",
                dimension_numbers=("NDHWC", "DHWIO", "NDHWC"))
            return jnp.maximum(y + b, 0.0)

        return conv(conv(xu, p["w1"], p["b1"]), p["w2"], p["b2"])

    to_ndhwc = lambda t: jnp.transpose(t, (0, 2, 3, 4, 1))
    feats = [to_ndhwc(f) for f in (f0, f1, f2, f3)][::-1]
    ref = feats[0]
    ref_outs = []
    for i in range(3):
        ref = ref_block(ref, feats[1 + i], decoder.params[i])
        ref_outs.append(ref)
    got = [to_ndhwc(outs[2]), to_ndhwc(outs[1]), to_ndhwc(outs[0])]
    for r, g in zip(ref_outs, got):
        err = float(jnp.max(jnp.abs(r - g)))
        assert err < 0.2, f"max abs err vs reference: {err}"

    print("KERNEL_OK")
</pallas_src>

<mosaic_0001>
module attributes {stable_mosaic.version = 11 : i64} {
  func.func @_decoder_block_kernel(%arg0: i32, %arg1: memref<1x4x4x128xf32, #tpu.memory_space<vmem>>, %arg2: memref<1x4x4x64xf32, #tpu.memory_space<vmem>>, %arg3: memref<9x128x64xbf16, #tpu.memory_space<vmem>>, %arg4: memref<9x64x64xbf16, #tpu.memory_space<vmem>>, %arg5: memref<9x64x64xbf16, #tpu.memory_space<vmem>>, %arg6: memref<1x64xf32, #tpu.memory_space<vmem>>, %arg7: memref<1x64xf32, #tpu.memory_space<vmem>>, %arg8: memref<1x16x64xf32, #tpu.memory_space<vmem>>, %arg9: memref<6x6x128xbf16, #tpu.memory_space<vmem>>, %arg10: memref<6x6x64xbf16, #tpu.memory_space<vmem>>, %arg11: memref<6x6x64xbf16, #tpu.memory_space<vmem>>, %arg12: memref<16x64xf32, #tpu.memory_space<vmem>>) attributes {dimension_semantics = [#tpu.dimension_semantics<parallel>], iteration_bounds = array<i64: 2>, scalar_prefetch = 0 : i64, scratch_operands = 4 : i64, tpu.core_type = #tpu.core_type<tc>, window_params = [{transform_indices = @transform_0, window_bounds = array<i64: 1, 4, 4, 128>}, {transform_indices = @transform_1, window_bounds = array<i64: 1, 4, 4, 64>}, {pipeline_mode = #tpu.pipeline_mode<synchronous>, transform_indices = @transform_2, window_bounds = array<i64: 9, 128, 64>}, {pipeline_mode = #tpu.pipeline_mode<synchronous>, transform_indices = @transform_3, window_bounds = array<i64: 9, 64, 64>}, {pipeline_mode = #tpu.pipeline_mode<synchronous>, transform_indices = @transform_4, window_bounds = array<i64: 9, 64, 64>}, {pipeline_mode = #tpu.pipeline_mode<synchronous>, transform_indices = @transform_5, window_bounds = array<i64: 1, 64>}, {pipeline_mode = #tpu.pipeline_mode<synchronous>, transform_indices = @transform_6, window_bounds = array<i64: 1, 64>}, {transform_indices = @transform_7, window_bounds = array<i64: 1, 16, 64>}]} {
    %cst = arith.constant 0.000000e+00 : bf16
    %0 = vector.broadcast %cst : bf16 to vector<6x6x128xbf16>
    %c0 = arith.constant 0 : index
    %c0_0 = arith.constant 0 : index
    %c0_1 = arith.constant 0 : index
    %1 = vector.load %arg9[%c0, %c0_0, %c0_1] : memref<6x6x128xbf16, #tpu.memory_space<vmem>>, vector<6x6x128xbf16>
    tpu.vector_store %arg9[%c0, %c0_0, %c0_1], %0 {strides = array<i32>} : memref<6x6x128xbf16, #tpu.memory_space<vmem>>, vector<6x6x128xbf16>,
    %c0_2 = arith.constant 0 : index
    %c0_3 = arith.constant 0 : index
    %c0_4 = arith.constant 0 : index
    %c0_5 = arith.constant 0 : index
    %2 = vector.load %arg1[%c0_2, %c0_3, %c0_4, %c0_5] : memref<1x4x4x128xf32, #tpu.memory_space<vmem>>, vector<1x4x4x128xf32>
    %3 = vector.shape_cast %2 : vector<1x4x4x128xf32> to vector<4x4x128xf32>
    %4 = arith.truncf %3 : vector<4x4x128xf32> to vector<4x4x128xbf16>
    %c1 = arith.constant 1 : index
    %c1_6 = arith.constant 1 : index
    %c0_7 = arith.constant 0 : index
    %5 = vector.load %arg9[%c1, %c1_6, %c0_7] : memref<6x6x128xbf16, #tpu.memory_space<vmem>>, vector<4x4x128xbf16>
    tpu.vector_store %arg9[%c1, %c1_6, %c0_7], %4 {strides = array<i32>} : memref<6x6x128xbf16, #tpu.memory_space<vmem>>, vector<4x4x128xbf16>,
    %cst_8 = arith.constant 0.000000e+00 : bf16
    %6 = vector.broadcast %cst_8 : bf16 to vector<6x6x64xbf16>
    %c0_9 = arith.constant 0 : index
    %c0_10 = arith.constant 0 : index
    %c0_11 = arith.constant 0 : index
    %7 = vector.load %arg10[%c0_9, %c0_10, %c0_11] : memref<6x6x64xbf16, #tpu.memory_space<vmem>>, vector<6x6x64xbf16>
    tpu.vector_store %arg10[%c0_9, %c0_10, %c0_11], %6 {strides = array<i32>} : memref<6x6x64xbf16, #tpu.memory_space<vmem>>, vector<6x6x64xbf16>,
    %c0_12 = arith.constant 0 : index
    %c0_13 = arith.constant 0 : index
    %c0_14 = arith.constant 0 : index
    %c0_15 = arith.constant 0 : index
    %8 = vector.load %arg2[%c0_12, %c0_13, %c0_14, %c0_15] : memref<1x4x4x64xf32, #tpu.memory_space<vmem>>, vector<1x4x4x64xf32>
    %9 = vector.shape_cast %8 : vector<1x4x4x64xf32> to vector<4x4x64xf32>
    %10 = arith.truncf %9 : vector<4x4x64xf32> to vector<4x4x64xbf16>
    %c1_16 = arith.constant 1 : index
    %c1_17 = arith.constant 1 : index
    %c0_18 = arith.constant 0 : index
    %11 = vector.load %arg10[%c1_16, %c1_17, %c0_18] : memref<6x6x64xbf16, #tpu.memory_space<vmem>>, vector<4x4x64xbf16>
    tpu.vector_store %arg10[%c1_16, %c1_17, %c0_18], %10 {strides = array<i32>} : memref<6x6x64xbf16, #tpu.memory_space<vmem>>, vector<4x4x64xbf16>,
    %c0_19 = arith.constant 0 : index
    %c0_20 = arith.constant 0 : index
    %c0_21 = arith.constant 0 : index
    %12 = vector.load %arg9[%c0_19, %c0_20, %c0_21] : memref<6x6x128xbf16, #tpu.memory_space<vmem>>, vector<4x4x128xbf16>
    %13 = vector.shape_cast %12 : vector<4x4x128xbf16> to vector<16x128xbf16>
    %c0_22 = arith.constant 0 : index
    %c0_23 = arith.constant 0 : index
    %c0_24 = arith.constant 0 : index
    %14 = vector.load %arg3[%c0_22, %c0_23, %c0_24] : memref<9x128x64xbf16, #tpu.memory_space<vmem>>, vector<1x128x64xbf16>
    %15 = vector.shape_cast %14 : vector<1x128x64xbf16> to vector<128x64xbf16>
    %cst_25 = arith.constant dense<0.000000e+00> : vector<16x64xf32>
    %16 = tpu.matmul %13, %15, %cst_25 {dimension_numbers = #tpu.dot_dimension_numbers<[1], [0], [0], [1], [0, 0, 1, 1], [], []>} : vector<16x128xbf16>, vector<128x64xbf16>, vector<16x64xf32> -> vector<16x64xf32>
    %c0_26 = arith.constant 0 : index
    %c0_27 = arith.constant 0 : index
    %c0_28 = arith.constant 0 : index
    %17 = vector.load %arg10[%c0_26, %c0_27, %c0_28] : memref<6x6x64xbf16, #tpu.memory_space<vmem>>, vector<4x4x64xbf16>
    %18 = vector.shape_cast %17 : vector<4x4x64xbf16> to vector<16x64xbf16>
    %c0_29 = arith.constant 0 : index
    %c0_30 = arith.constant 0 : index
    %c0_31 = arith.constant 0 : index
    %19 = vector.load %arg4[%c0_29, %c0_30, %c0_31] : memref<9x64x64xbf16, #tpu.memory_space<vmem>>, vector<1x64x64xbf16>
    %20 = vector.shape_cast %19 : vector<1x64x64xbf16> to vector<64x64xbf16>
    %cst_32 = arith.constant dense<0.000000e+00> : vector<16x64xf32>
    %21 = tpu.matmul %18, %20, %cst_32 {dimension_numbers = #tpu.dot_dimension_numbers<[1], [0], [0], [1], [0, 0, 1, 1], [], []>} : vector<16x64xbf16>, vector<64x64xbf16>, vector<16x64xf32> -> vector<16x64xf32>
    %22 = arith.addf %16, %21 : vector<16x64xf32>
    %c0_33 = arith.constant 0 : index
    %c0_34 = arith.constant 0 : index
    %23 = vector.load %arg12[%c0_33, %c0_34] : memref<16x64xf32, #tpu.memory_space<vmem>>, vector<16x64xf32>
    tpu.vector_store %arg12[%c0_33, %c0_34], %22 {strides = array<i32>} : memref<16x64xf32, #tpu.memory_space<vmem>>, vector<16x64xf32>,
    %c0_35 = arith.constant 0 : index
    %c1_36 = arith.constant 1 : index
    %c0_37 = arith.constant 0 : index
    %24 = vector.load %arg9[%c0_35, %c1_36, %c0_37] : memref<6x6x128xbf16, #tpu.memory_space<vmem>>, vector<4x4x128xbf16>
    %25 = vector.shape_cast %24 : vector<4x4x128xbf16> to vector<16x128xbf16>
    %c1_38 = arith.constant 1 : index
    %c0_39 = arith.constant 0 : index
    %c0_40 = arith.constant 0 : index
    %26 = vector.load %arg3[%c1_38, %c0_39, %c0_40] : memref<9x128x64xbf16, #tpu.memory_space<vmem>>, vector<1x128x64xbf16>
    %27 = vector.shape_cast %26 : vector<1x128x64xbf16> to vector<128x64xbf16>
    %cst_41 = arith.constant dense<0.000000e+00> : vector<16x64xf32>
    %28 = tpu.matmul %25, %27, %cst_41 {dimension_numbers = #tpu.dot_dimension_numbers<[1], [0], [0], [1], [0, 0, 1, 1], [], []>} : vector<16x128xbf16>, vector<128x64xbf16>, vector<16x64xf32> -> vector<16x64xf32>
    %c0_42 = arith.constant 0 : index
    %c1_43 = arith.constant 1 : index
    %c0_44 = arith.constant 0 : index
    %29 = vector.load %arg10[%c0_42, %c1_43, %c0_44] : memref<6x6x64xbf16, #tpu.memory_space<vmem>>, vector<4x4x64xbf16>
    %30 = vector.shape_cast %29 : vector<4x4x64xbf16> to vector<16x64xbf16>
    %c1_45 = arith.constant 1 : index
    %c0_46 = arith.constant 0 : index
    %c0_47 = arith.constant 0 : index
    %31 = vector.load %arg4[%c1_45, %c0_46, %c0_47] : memref<9x64x64xbf16, #tpu.memory_space<vmem>>, vector<1x64x64xbf16>
    %32 = vector.shape_cast %31 : vector<1x64x64xbf16> to vector<64x64xbf16>
    %cst_48 = arith.constant dense<0.000000e+00> : vector<16x64xf32>
    %33 = tpu.matmul %30, %32, %cst_48 {dimension_numbers = #tpu.dot_dimension_numbers<[1], [0], [0], [1], [0, 0, 1, 1], [], []>} : vector<16x64xbf16>, vector<64x64xbf16>, vector<16x64xf32> -> vector<16x64xf32>
    %34 = arith.addf %28, %33 : vector<16x64xf32>
    %c0_49 = arith.constant 0 : index
    %c0_50 = arith.constant 0 : index
    %35 = vector.load %arg12[%c0_49, %c0_50] : memref<16x64xf32, #tpu.memory_space<vmem>>, vector<16x64xf32>
    %36 = arith.addf %35, %34 : vector<16x64xf32>
    %c0_51 = arith.constant 0 : index
    %c0_52 = arith.constant 0 : index
    %37 = vector.load %arg12[%c0_51, %c0_52] : memref<16x64xf32, #tpu.memory_space<vmem>>, vector<16x64xf32>
    tpu.vector_store %arg12[%c0_51, %c0_52], %36 {strides = array<i32>} : memref<16x64xf32, #tpu.memory_space<vmem>>, vector<16x64xf32>,
    %c0_53 = arith.constant 0 : index
    %c2 = arith.constant 2 : index
    %c0_54 = arith.constant 0 : index
    %38 = vector.load %arg9[%c0_53, %c2, %c0_54] : memref<6x6x128xbf16, #tpu.memory_space<vmem>>, vector<4x4x128xbf16>
    %39 = vector.shape_cast %38 : vector<4x4x128xbf16> to vector<16x128xbf16>
    %c2_55 = arith.constant 2 : index
    %c0_56 = arith.constant 0 : index
    %c0_57 = arith.constant 0 : index
    %40 = vector.load %arg3[%c2_55, %c0_56, %c0_57] : memref<9x128x64xbf16, #tpu.memory_space<vmem>>, vector<1x128x64xbf16>
    %41 = vector.shape_cast %40 : vector<1x128x64xbf16> to vector<128x64xbf16>
    %cst_58 = arith.constant dense<0.000000e+00> : vector<16x64xf32>
    %42 = tpu.matmul %39, %41, %cst_58 {dimension_numbers = #tpu.dot_dimension_numbers<[1], [0], [0], [1], [0, 0, 1, 1], [], []>} : vector<16x128xbf16>, vector<128x64xbf16>, vector<16x64xf32> -> vector<16x64xf32>
    %c0_59 = arith.constant 0 : index
    %c2_60 = arith.constant 2 : index
    %c0_61 = arith.constant 0 : index
    %43 = vector.load %arg10[%c0_59, %c2_60, %c0_61] : memref<6x6x64xbf16, #tpu.memory_space<vmem>>, vector<4x4x64xbf16>
    %44 = vector.shape_cast %43 : vector<4x4x64xbf16> to vector<16x64xbf16>
    %c2_62 = arith.constant 2 : index
    %c0_63 = arith.constant 0 : index
    %c0_64 = arith.constant 0 : index
    %45 = vector.load %arg4[%c2_62, %c0_63, %c0_64] : memref<9x64x64xbf16, #tpu.memory_space<vmem>>, vector<1x64x64xbf16>
    %46 = vector.shape_cast %45 : vector<1x64x64xbf16> to vector<64x64xbf16>
    %cst_65 = arith.constant dense<0.000000e+00> : vector<16x64xf32>
    %47 = tpu.matmul %44, %46, %cst_65 {dimension_numbers = #tpu.dot_dimension_numbers<[1], [0], [0], [1], [0, 0, 1, 1], [], []>} : vector<16x64xbf16>, vector<64x64xbf16>, vector<16x64xf32> -> vector<16x64xf32>
    %48 = arith.addf %42, %47 : vector<16x64xf32>
    %c0_66 = arith.constant 0 : index
    %c0_67 = arith.constant 0 : index
    %49 = vector.load %arg12[%c0_66, %c0_67] : memref<16x64xf32, #tpu.memory_space<vmem>>, vector<16x64xf32>
    %50 = arith.addf %49, %48 : vector<16x64xf32>
    %c0_68 = arith.constant 0 : index
    %c0_69 = arith.constant 0 : index
    %51 = vector.load %arg12[%c0_68, %c0_69] : memref<16x64xf32, #tpu.memory_space<vmem>>, vector<16x64xf32>
    tpu.vector_store %arg12[%c0_68, %c0_69], %50 {strides = array<i32>} : memref<16x64xf32, #tpu.memory_space<vmem>>, vector<16x64xf32>,
    %c1_70 = arith.constant 1 : index
    %c0_71 = arith.constant 0 : index
    %c0_72 = arith.constant 0 : index
    %52 = vector.load %arg9[%c1_70, %c0_71, %c0_72] : memref<6x6x128xbf16, #tpu.memory_space<vmem>>, vector<4x4x128xbf16>
    %53 = vector.shape_cast %52 : vector<4x4x128xbf16> to vector<16x128xbf16>
    %c3 = arith.constant 3 : index
    %c0_73 = arith.constant 0 : index
    %c0_74 = arith.constant 0 : index
    %54 = vector.load %arg3[%c3, %c0_73, %c0_74] : memref<9x128x64xbf16, #tpu.memory_space<vmem>>, vector<1x128x64xbf16>
    %55 = vector.shape_cast %54 : vector<1x128x64xbf16> to vector<128x64xbf16>
    %cst_75 = arith.constant dense<0.000000e+00> : vector<16x64xf32>
    %56 = tpu.matmul %53, %55, %cst_75 {dimension_numbers = #tpu.dot_dimension_numbers<[1], [0], [0], [1], [0, 0, 1, 1], [], []>} : vector<16x128xbf16>, vector<128x64xbf16>, vector<16x64xf32> -> vector<16x64xf32>
    %c1_76 = arith.constant 1 : index
    %c0_77 = arith.constant 0 : index
    %c0_78 = arith.constant 0 : index
    %57 = vector.load %arg10[%c1_76, %c0_77, %c0_78] : memref<6x6x64xbf16, #tpu.memory_space<vmem>>, vector<4x4x64xbf16>
    %58 = vector.shape_cast %57 : vector<4x4x64xbf16> to vector<16x64xbf16>
    %c3_79 = arith.constant 3 : index
    %c0_80 = arith.constant 0 : index
    %c0_81 = arith.constant 0 : index
    %59 = vector.load %arg4[%c3_79, %c0_80, %c0_81] : memref<9x64x64xbf16, #tpu.memory_space<vmem>>, vector<1x64x64xbf16>
    %60 = vector.shape_cast %59 : vector<1x64x64xbf16> to vector<64x64xbf16>
    %cst_82 = arith.constant dense<0.000000e+00> : vector<16x64xf32>
    %61 = tpu.matmul %58, %60, %cst_82 {dimension_numbers = #tpu.dot_dimension_numbers<[1], [0], [0], [1], [0, 0, 1, 1], [], []>} : vector<16x64xbf16>, vector<64x64xbf16>, vector<16x64xf32> -> vector<16x64xf32>
    %62 = arith.addf %56, %61 : vector<16x64xf32>
    %c0_83 = arith.constant 0 : index
    %c0_84 = arith.constant 0 : index
    %63 = vector.load %arg12[%c0_83, %c0_84] : memref<16x64xf32, #tpu.memory_space<vmem>>, vector<16x64xf32>
    %64 = arith.addf %63, %62 : vector<16x64xf32>
    %c0_85 = arith.constant 0 : index
    %c0_86 = arith.constant 0 : index
    %65 = vector.load %arg12[%c0_85, %c0_86] : memref<16x64xf32, #tpu.memory_space<vmem>>, vector<16x64xf32>
    tpu.vector_store %arg12[%c0_85, %c0_86], %64 {strides = array<i32>} : memref<16x64xf32, #tpu.memory_space<vmem>>, vector<16x64xf32>,
    %c1_87 = arith.constant 1 : index
    %c1_88 = arith.constant 1 : index
    %c0_89 = arith.constant 0 : index
    %66 = vector.load %arg9[%c1_87, %c1_88, %c0_89] : memref<6x6x128xbf16, #tpu.memory_space<vmem>>, vector<4x4x128xbf16>
    %67 = vector.shape_cast %66 : vector<4x4x128xbf16> to vector<16x128xbf16>
    %c4 = arith.constant 4 : index
    %c0_90 = arith.constant 0 : index
    %c0_91 = arith.constant 0 : index
    %68 = vector.load %arg3[%c4, %c0_90, %c0_91] : memref<9x128x64xbf16, #tpu.memory_space<vmem>>, vector<1x128x64xbf16>
    %69 = vector.shape_cast %68 : vector<1x128x64xbf16> to vector<128x64xbf16>
    %cst_92 = arith.constant dense<0.000000e+00> : vector<16x64xf32>
    %70 = tpu.matmul %67, %69, %cst_92 {dimension_numbers = #tpu.dot_dimension_numbers<[1], [0], [0], [1], [0, 0, 1, 1], [], []>} : vector<16x128xbf16>, vector<128x64xbf16>, vector<16x64xf32> -> vector<16x64xf32>
    %c1_93 = arith.constant 1 : index
    %c1_94 = arith.constant 1 : index
    %c0_95 = arith.constant 0 : index
    %71 = vector.load %arg10[%c1_93, %c1_94, %c0_95] : memref<6x6x64xbf16, #tpu.memory_space<vmem>>, vector<4x4x64xbf16>
    %72 = vector.shape_cast %71 : vector<4x4x64xbf16> to vector<16x64xbf16>
    %c4_96 = arith.constant 4 : index
    %c0_97 = arith.constant 0 : index
    %c0_98 = arith.constant 0 : index
    %73 = vector.load %arg4[%c4_96, %c0_97, %c0_98] : memref<9x64x64xbf16, #tpu.memory_space<vmem>>, vector<1x64x64xbf16>
    %74 = vector.shape_cast %73 : vector<1x64x64xbf16> to vector<64x64xbf16>
    %cst_99 = arith.constant dense<0.000000e+00> : vector<16x64xf32>
    %75 = tpu.matmul %72, %74, %cst_99 {dimension_numbers = #tpu.dot_dimension_numbers<[1], [0], [0], [1], [0, 0, 1, 1], [], []>} : vector<16x64xbf16>, vector<64x64xbf16>, vector<16x64xf32> -> vector<16x64xf32>
    %76 = arith.addf %70, %75 : vector<16x64xf32>
    %c0_100 = arith.constant 0 : index
    %c0_101 = arith.constant 0 : index
    %77 = vector.load %arg12[%c0_100, %c0_101] : memref<16x64xf32, #tpu.memory_space<vmem>>, vector<16x64xf32>
    %78 = arith.addf %77, %76 : vector<16x64xf32>
    %c0_102 = arith.constant 0 : index
    %c0_103 = arith.constant 0 : index
    %79 = vector.load %arg12[%c0_102, %c0_103] : memref<16x64xf32, #tpu.memory_space<vmem>>, vector<16x64xf32>
    tpu.vector_store %arg12[%c0_102, %c0_103], %78 {strides = array<i32>} : memref<16x64xf32, #tpu.memory_space<vmem>>, vector<16x64xf32>,
    %c1_104 = arith.constant 1 : index
    %c2_105 = arith.constant 2 : index
    %c0_106 = arith.constant 0 : index
    %80 = vector.load %arg9[%c1_104, %c2_105, %c0_106] : memref<6x6x128xbf16, #tpu.memory_space<vmem>>, vector<4x4x128xbf16>
    %81 = vector.shape_cast %80 : vector<4x4x128xbf16> to vector<16x128xbf16>
    %c5 = arith.constant 5 : index
    %c0_107 = arith.constant 0 : index
    %c0_108 = arith.constant 0 : index
    %82 = vector.load %arg3[%c5, %c0_107, %c0_108] : memref<9x128x64xbf16, #tpu.memory_space<vmem>>, vector<1x128x64xbf16>
    %83 = vector.shape_cast %82 : vector<1x128x64xbf16> to vector<128x64xbf16>
    %cst_109 = arith.constant dense<0.000000e+00> : vector<16x64xf32>
    %84 = tpu.matmul %81, %83, %cst_109 {dimension_numbers = #tpu.dot_dimension_numbers<[1], [0], [0], [1], [0, 0, 1, 1], [], []>} : vector<16x128xbf16>, vector<128x64xbf16>, vector<16x64xf32> -> vector<16x64xf32>
    %c1_110 = arith.constant 1 : index
    %c2_111 = arith.constant 2 : index
    %c0_112 = arith.constant 0 : index
    %85 = vector.load %arg10[%c1_110, %c2_111, %c0_112] : memref<6x6x64xbf16, #tpu.memory_space<vmem>>, vector<4x4x64xbf16>
    %86 = vector.shape_cast %85 : vector<4x4x64xbf16> to vector<16x64xbf16>
    %c5_113 = arith.constant 5 : index
    %c0_114 = arith.constant 0 : index
    %c0_115 = arith.constant 0 : index
    %87 = vector.load %arg4[%c5_113, %c0_114, %c0_115] : memref<9x64x64xbf16, #tpu.memory_space<vmem>>, vector<1x64x64xbf16>
    %88 = vector.shape_cast %87 : vector<1x64x64xbf16> to vector<64x64xbf16>
    %cst_116 = arith.constant dense<0.000000e+00> : vector<16x64xf32>
    %89 = tpu.matmul %86, %88, %cst_116 {dimension_numbers = #tpu.dot_dimension_numbers<[1], [0], [0], [1], [0, 0, 1, 1], [], []>} : vector<16x64xbf16>, vector<64x64xbf16>, vector<16x64xf32> -> vector<16x64xf32>
    %90 = arith.addf %84, %89 : vector<16x64xf32>
    %c0_117 = arith.constant 0 : index
    %c0_118 = arith.constant 0 : index
    %91 = vector.load %arg12[%c0_117, %c0_118] : memref<16x64xf32, #tpu.memory_space<vmem>>, vector<16x64xf32>
    %92 = arith.addf %91, %90 : vector<16x64xf32>
    %c0_119 = arith.constant 0 : index
    %c0_120 = arith.constant 0 : index
    %93 = vector.load %arg12[%c0_119, %c0_120] : memref<16x64xf32, #tpu.memory_space<vmem>>, vector<16x64xf32>
    tpu.vector_store %arg12[%c0_119, %c0_120], %92 {strides = array<i32>} : memref<16x64xf32, #tpu.memory_space<vmem>>, vector<16x64xf32>,
    %c2_121 = arith.constant 2 : index
    %c0_122 = arith.constant 0 : index
    %c0_123 = arith.constant 0 : index
    %94 = vector.load %arg9[%c2_121, %c0_122, %c0_123] : memref<6x6x128xbf16, #tpu.memory_space<vmem>>, vector<4x4x128xbf16>
    %95 = vector.shape_cast %94 : vector<4x4x128xbf16> to vector<16x128xbf16>
    %c6 = arith.constant 6 : index
    %c0_124 = arith.constant 0 : index
    %c0_125 = arith.constant 0 : index
    %96 = vector.load %arg3[%c6, %c0_124, %c0_125] : memref<9x128x64xbf16, #tpu.memory_space<vmem>>, vector<1x128x64xbf16>
    %97 = vector.shape_cast %96 : vector<1x128x64xbf16> to vector<128x64xbf16>
    %cst_126 = arith.constant dense<0.000000e+00> : vector<16x64xf32>
    %98 = tpu.matmul %95, %97, %cst_126 {dimension_numbers = #tpu.dot_dimension_numbers<[1], [0], [0], [1], [0, 0, 1, 1], [], []>} : vector<16x128xbf16>, vector<128x64xbf16>, vector<16x64xf32> -> vector<16x64xf32>
    %c2_127 = arith.constant 2 : index
    %c0_128 = arith.constant 0 : index
    %c0_129 = arith.constant 0 : index
    %99 = vector.load %arg10[%c2_127, %c0_128, %c0_129] : memref<6x6x64xbf16, #tpu.memory_space<vmem>>, vector<4x4x64xbf16>
    %100 = vector.shape_cast %99 : vector<4x4x64xbf16> to vector<16x64xbf16>
    %c6_130 = arith.constant 6 : index
    %c0_131 = arith.constant 0 : index
    %c0_132 = arith.constant 0 : index
    %101 = vector.load %arg4[%c6_130, %c0_131, %c0_132] : memref<9x64x64xbf16, #tpu.memory_space<vmem>>, vector<1x64x64xbf16>
    %102 = vector.shape_cast %101 : vector<1x64x64xbf16> to vector<64x64xbf16>
    %cst_133 = arith.constant dense<0.000000e+00> : vector<16x64xf32>
    %103 = tpu.matmul %100, %102, %cst_133 {dimension_numbers = #tpu.dot_dimension_numbers<[1], [0], [0], [1], [0, 0, 1, 1], [], []>} : vector<16x64xbf16>, vector<64x64xbf16>, vector<16x64xf32> -> vector<16x64xf32>
    %104 = arith.addf %98, %103 : vector<16x64xf32>
    %c0_134 = arith.constant 0 : index
    %c0_135 = arith.constant 0 : index
    %105 = vector.load %arg12[%c0_134, %c0_135] : memref<16x64xf32, #tpu.memory_space<vmem>>, vector<16x64xf32>
    %106 = arith.addf %105, %104 : vector<16x64xf32>
    %c0_136 = arith.constant 0 : index
    %c0_137 = arith.constant 0 : index
    %107 = vector.load %arg12[%c0_136, %c0_137] : memref<16x64xf32, #tpu.memory_space<vmem>>, vector<16x64xf32>
    tpu.vector_store %arg12[%c0_136, %c0_137], %106 {strides = array<i32>} : memref<16x64xf32, #tpu.memory_space<vmem>>, vector<16x64xf32>,
    %c2_138 = arith.constant 2 : index
    %c1_139 = arith.constant 1 : index
    %c0_140 = arith.constant 0 : index
    %108 = vector.load %arg9[%c2_138, %c1_139, %c0_140] : memref<6x6x128xbf16, #tpu.memory_space<vmem>>, vector<4x4x128xbf16>
    %109 = vector.shape_cast %108 : vector<4x4x128xbf16> to vector<16x128xbf16>
    %c7 = arith.constant 7 : index
    %c0_141 = arith.constant 0 : index
    %c0_142 = arith.constant 0 : index
    %110 = vector.load %arg3[%c7, %c0_141, %c0_142] : memref<9x128x64xbf16, #tpu.memory_space<vmem>>, vector<1x128x64xbf16>
    %111 = vector.shape_cast %110 : vector<1x128x64xbf16> to vector<128x64xbf16>
    %cst_143 = arith.constant dense<0.000000e+00> : vector<16x64xf32>
    %112 = tpu.matmul %109, %111, %cst_143 {dimension_numbers = #tpu.dot_dimension_numbers<[1], [0], [0], [1], [0, 0, 1, 1], [], []>} : vector<16x128xbf16>, vector<128x64xbf16>, vector<16x64xf32> -> vector<16x64xf32>
    %c2_144 = arith.constant 2 : index
    %c1_145 = arith.constant 1 : index
    %c0_146 = arith.constant 0 : index
    %113 = vector.load %arg10[%c2_144, %c1_145, %c0_146] : memref<6x6x64xbf16, #tpu.memory_space<vmem>>, vector<4x4x64xbf16>
    %114 = vector.shape_cast %113 : vector<4x4x64xbf16> to vector<16x64xbf16>
    %c7_147 = arith.constant 7 : index
    %c0_148 = arith.constant 0 : index
    %c0_149 = arith.constant 0 : index
    %115 = vector.load %arg4[%c7_147, %c0_148, %c0_149] : memref<9x64x64xbf16, #tpu.memory_space<vmem>>, vector<1x64x64xbf16>
    %116 = vector.shape_cast %115 : vector<1x64x64xbf16> to vector<64x64xbf16>
    %cst_150 = arith.constant dense<0.000000e+00> : vector<16x64xf32>
    %117 = tpu.matmul %114, %116, %cst_150 {dimension_numbers = #tpu.dot_dimension_numbers<[1], [0], [0], [1], [0, 0, 1, 1], [], []>} : vector<16x64xbf16>, vector<64x64xbf16>, vector<16x64xf32> -> vector<16x64xf32>
    %118 = arith.addf %112, %117 : vector<16x64xf32>
    %c0_151 = arith.constant 0 : index
    %c0_152 = arith.constant 0 : index
    %119 = vector.load %arg12[%c0_151, %c0_152] : memref<16x64xf32, #tpu.memory_space<vmem>>, vector<16x64xf32>
    %120 = arith.addf %119, %118 : vector<16x64xf32>
    %c0_153 = arith.constant 0 : index
    %c0_154 = arith.constant 0 : index
    %121 = vector.load %arg12[%c0_153, %c0_154] : memref<16x64xf32, #tpu.memory_space<vmem>>, vector<16x64xf32>
    tpu.vector_store %arg12[%c0_153, %c0_154], %120 {strides = array<i32>} : memref<16x64xf32, #tpu.memory_space<vmem>>, vector<16x64xf32>,
    %c2_155 = arith.constant 2 : index
    %c2_156 = arith.constant 2 : index
    %c0_157 = arith.constant 0 : index
    %122 = vector.load %arg9[%c2_155, %c2_156, %c0_157] : memref<6x6x128xbf16, #tpu.memory_space<vmem>>, vector<4x4x128xbf16>
    %123 = vector.shape_cast %122 : vector<4x4x128xbf16> to vector<16x128xbf16>
    %c8 = arith.constant 8 : index
    %c0_158 = arith.constant 0 : index
    %c0_159 = arith.constant 0 : index
    %124 = vector.load %arg3[%c8, %c0_158, %c0_159] : memref<9x128x64xbf16, #tpu.memory_space<vmem>>, vector<1x128x64xbf16>
    %125 = vector.shape_cast %124 : vector<1x128x64xbf16> to vector<128x64xbf16>
    %cst_160 = arith.constant dense<0.000000e+00> : vector<16x64xf32>
    %126 = tpu.matmul %123, %125, %cst_160 {dimension_numbers = #tpu.dot_dimension_numbers<[1], [0], [0], [1], [0, 0, 1, 1], [], []>} : vector<16x128xbf16>, vector<128x64xbf16>, vector<16x64xf32> -> vector<16x64xf32>
    %c2_161 = arith.constant 2 : index
    %c2_162 = arith.constant 2 : index
    %c0_163 = arith.constant 0 : index
    %127 = vector.load %arg10[%c2_161, %c2_162, %c0_163] : memref<6x6x64xbf16, #tpu.memory_space<vmem>>, vector<4x4x64xbf16>
    %128 = vector.shape_cast %127 : vector<4x4x64xbf16> to vector<16x64xbf16>
    %c8_164 = arith.constant 8 : index
    %c0_165 = arith.constant 0 : index
    %c0_166 = arith.constant 0 : index
    %129 = vector.load %arg4[%c8_164, %c0_165, %c0_166] : memref<9x64x64xbf16, #tpu.memory_space<vmem>>, vector<1x64x64xbf16>
    %130 = vector.shape_cast %129 : vector<1x64x64xbf16> to vector<64x64xbf16>
    %cst_167 = arith.constant dense<0.000000e+00> : vector<16x64xf32>
    %131 = tpu.matmul %128, %130, %cst_167 {dimension_numbers = #tpu.dot_dimension_numbers<[1], [0], [0], [1], [0, 0, 1, 1], [], []>} : vector<16x64xbf16>, vector<64x64xbf16>, vector<16x64xf32> -> vector<16x64xf32>
    %132 = arith.addf %126, %131 : vector<16x64xf32>
    %c0_168 = arith.constant 0 : index
    %c0_169 = arith.constant 0 : index
    %133 = vector.load %arg12[%c0_168, %c0_169] : memref<16x64xf32, #tpu.memory_space<vmem>>, vector<16x64xf32>
    %134 = arith.addf %133, %132 : vector<16x64xf32>
    %c0_170 = arith.constant 0 : index
    %c0_171 = arith.constant 0 : index
    %135 = vector.load %arg12[%c0_170, %c0_171] : memref<16x64xf32, #tpu.memory_space<vmem>>, vector<16x64xf32>
    tpu.vector_store %arg12[%c0_170, %c0_171], %134 {strides = array<i32>} : memref<16x64xf32, #tpu.memory_space<vmem>>, vector<16x64xf32>,
    %c0_172 = arith.constant 0 : index
    %c0_173 = arith.constant 0 : index
    %136 = vector.load %arg12[%c0_172, %c0_173] : memref<16x64xf32, #tpu.memory_space<vmem>>, vector<16x64xf32>
    %c0_174 = arith.constant 0 : index
    %c0_175 = arith.constant 0 : index
    %137 = vector.load %arg6[%c0_174, %c0_175] : memref<1x64xf32, #tpu.memory_space<vmem>>, vector<1x64xf32>
    %138 = vector.broadcast %137 : vector<1x64xf32> to vector<16x64xf32>
    %139 = arith.addf %136, %138 : vector<16x64xf32>
    %cst_176 = arith.constant 0.000000e+00 : f32
    %140 = vector.broadcast %cst_176 : f32 to vector<16x64xf32>
    %141 = arith.maximumf %139, %140 : vector<16x64xf32>
    %cst_177 = arith.constant 0.000000e+00 : bf16
    %142 = vector.broadcast %cst_177 : bf16 to vector<6x6x64xbf16>
    %c0_178 = arith.constant 0 : index
    %c0_179 = arith.constant 0 : index
    %c0_180 = arith.constant 0 : index
    %143 = vector.load %arg11[%c0_178, %c0_179, %c0_180] : memref<6x6x64xbf16, #tpu.memory_space<vmem>>, vector<6x6x64xbf16>
    tpu.vector_store %arg11[%c0_178, %c0_179, %c0_180], %142 {strides = array<i32>} : memref<6x6x64xbf16, #tpu.memory_space<vmem>>, vector<6x6x64xbf16>,
    %144 = vector.shape_cast %141 : vector<16x64xf32> to vector<4x4x64xf32>
    %145 = arith.truncf %144 : vector<4x4x64xf32> to vector<4x4x64xbf16>
    %c1_181 = arith.constant 1 : index
    %c1_182 = arith.constant 1 : index
    %c0_183 = arith.constant 0 : index
    %146 = vector.load %arg11[%c1_181, %c1_182, %c0_183] : memref<6x6x64xbf16, #tpu.memory_space<vmem>>, vector<4x4x64xbf16>
    tpu.vector_store %arg11[%c1_181, %c1_182, %c0_183], %145 {strides = array<i32>} : memref<6x6x64xbf16, #tpu.memory_space<vmem>>, vector<4x4x64xbf16>,
    %c0_184 = arith.constant 0 : index
    %c0_185 = arith.constant 0 : index
    %c0_186 = arith.constant 0 : index
    %147 = vector.load %arg11[%c0_184, %c0_185, %c0_186] : memref<6x6x64xbf16, #tpu.memory_space<vmem>>, vector<4x4x64xbf16>
    %148 = vector.shape_cast %147 : vector<4x4x64xbf16> to vector<16x64xbf16>
    %c0_187 = arith.constant 0 : index
    %c0_188 = arith.constant 0 : index
    %c0_189 = arith.constant 0 : index
    %149 = vector.load %arg5[%c0_187, %c0_188, %c0_189] : memref<9x64x64xbf16, #tpu.memory_space<vmem>>, vector<1x64x64xbf16>
    %150 = vector.shape_cast %149 : vector<1x64x64xbf16> to vector<64x64xbf16>
    %cst_190 = arith.constant dense<0.000000e+00> : vector<16x64xf32>
    %151 = tpu.matmul %148, %150, %cst_190 {dimension_numbers = #tpu.dot_dimension_numbers<[1], [0], [0], [1], [0, 0, 1, 1], [], []>} : vector<16x64xbf16>, vector<64x64xbf16>, vector<16x64xf32> -> vector<16x64xf32>
    %c0_191 = arith.constant 0 : index
    %c0_192 = arith.constant 0 : index
    %152 = vector.load %arg12[%c0_191, %c0_192] : memref<16x64xf32, #tpu.memory_space<vmem>>, vector<16x64xf32>
    tpu.vector_store %arg12[%c0_191, %c0_192], %151 {strides = array<i32>} : memref<16x64xf32, #tpu.memory_space<vmem>>, vector<16x64xf32>,
    %c0_193 = arith.constant 0 : index
    %c1_194 = arith.constant 1 : index
    %c0_195 = arith.constant 0 : index
    %153 = vector.load %arg11[%c0_193, %c1_194, %c0_195] : memref<6x6x64xbf16, #tpu.memory_space<vmem>>, vector<4x4x64xbf16>
    %154 = vector.shape_cast %153 : vector<4x4x64xbf16> to vector<16x64xbf16>
    %c1_196 = arith.constant 1 : index
    %c0_197 = arith.constant 0 : index
    %c0_198 = arith.constant 0 : index
    %155 = vector.load %arg5[%c1_196, %c0_197, %c0_198] : memref<9x64x64xbf16, #tpu.memory_space<vmem>>, vector<1x64x64xbf16>
    %156 = vector.shape_cast %155 : vector<1x64x64xbf16> to vector<64x64xbf16>
    %cst_199 = arith.constant dense<0.000000e+00> : vector<16x64xf32>
    %157 = tpu.matmul %154, %156, %cst_199 {dimension_numbers = #tpu.dot_dimension_numbers<[1], [0], [0], [1], [0, 0, 1, 1], [], []>} : vector<16x64xbf16>, vector<64x64xbf16>, vector<16x64xf32> -> vector<16x64xf32>
    %c0_200 = arith.constant 0 : index
    %c0_201 = arith.constant 0 : index
    %158 = vector.load %arg12[%c0_200, %c0_201] : memref<16x64xf32, #tpu.memory_space<vmem>>, vector<16x64xf32>
    %159 = arith.addf %158, %157 : vector<16x64xf32>
    %c0_202 = arith.constant 0 : index
    %c0_203 = arith.constant 0 : index
    %160 = vector.load %arg12[%c0_202, %c0_203] : memref<16x64xf32, #tpu.memory_space<vmem>>, vector<16x64xf32>
    tpu.vector_store %arg12[%c0_202, %c0_203], %159 {strides = array<i32>} : memref<16x64xf32, #tpu.memory_space<vmem>>, vector<16x64xf32>,
    %c0_204 = arith.constant 0 : index
    %c2_205 = arith.constant 2 : index
    %c0_206 = arith.constant 0 : index
    %161 = vector.load %arg11[%c0_204, %c2_205, %c0_206] : memref<6x6x64xbf16, #tpu.memory_space<vmem>>, vector<4x4x64xbf16>
    %162 = vector.shape_cast %161 : vector<4x4x64xbf16> to vector<16x64xbf16>
    %c2_207 = arith.constant 2 : index
    %c0_208 = arith.constant 0 : index
    %c0_209 = arith.constant 0 : index
    %163 = vector.load %arg5[%c2_207, %c0_208, %c0_209] : memref<9x64x64xbf16, #tpu.memory_space<vmem>>, vector<1x64x64xbf16>
    %164 = vector.shape_cast %163 : vector<1x64x64xbf16> to vector<64x64xbf16>
    %cst_210 = arith.constant dense<0.000000e+00> : vector<16x64xf32>
    %165 = tpu.matmul %162, %164, %cst_210 {dimension_numbers = #tpu.dot_dimension_numbers<[1], [0], [0], [1], [0, 0, 1, 1], [], []>} : vector<16x64xbf16>, vector<64x64xbf16>, vector<16x64xf32> -> vector<16x64xf32>
    %c0_211 = arith.constant 0 : index
    %c0_212 = arith.constant 0 : index
    %166 = vector.load %arg12[%c0_211, %c0_212] : memref<16x64xf32, #tpu.memory_space<vmem>>, vector<16x64xf32>
    %167 = arith.addf %166, %165 : vector<16x64xf32>
    %c0_213 = arith.constant 0 : index
    %c0_214 = arith.constant 0 : index
    %168 = vector.load %arg12[%c0_213, %c0_214] : memref<16x64xf32, #tpu.memory_space<vmem>>, vector<16x64xf32>
    tpu.vector_store %arg12[%c0_213, %c0_214], %167 {strides = array<i32>} : memref<16x64xf32, #tpu.memory_space<vmem>>, vector<16x64xf32>,
    %c1_215 = arith.constant 1 : index
    %c0_216 = arith.constant 0 : index
    %c0_217 = arith.constant 0 : index
    %169 = vector.load %arg11[%c1_215, %c0_216, %c0_217] : memref<6x6x64xbf16, #tpu.memory_space<vmem>>, vector<4x4x64xbf16>
    %170 = vector.shape_cast %169 : vector<4x4x64xbf16> to vector<16x64xbf16>
    %c3_218 = arith.constant 3 : index
    %c0_219 = arith.constant 0 : index
    %c0_220 = arith.constant 0 : index
    %171 = vector.load %arg5[%c3_218, %c0_219, %c0_220] : memref<9x64x64xbf16, #tpu.memory_space<vmem>>, vector<1x64x64xbf16>
    %172 = vector.shape_cast %171 : vector<1x64x64xbf16> to vector<64x64xbf16>
    %cst_221 = arith.constant dense<0.000000e+00> : vector<16x64xf32>
    %173 = tpu.matmul %170, %172, %cst_221 {dimension_numbers = #tpu.dot_dimension_numbers<[1], [0], [0], [1], [0, 0, 1, 1], [], []>} : vector<16x64xbf16>, vector<64x64xbf16>, vector<16x64xf32> -> vector<16x64xf32>
    %c0_222 = arith.constant 0 : index
    %c0_223 = arith.constant 0 : index
    %174 = vector.load %arg12[%c0_222, %c0_223] : memref<16x64xf32, #tpu.memory_space<vmem>>, vector<16x64xf32>
    %175 = arith.addf %174, %173 : vector<16x64xf32>
    %c0_224 = arith.constant 0 : index
    %c0_225 = arith.constant 0 : index
    %176 = vector.load %arg12[%c0_224, %c0_225] : memref<16x64xf32, #tpu.memory_space<vmem>>, vector<16x64xf32>
    tpu.vector_store %arg12[%c0_224, %c0_225], %175 {strides = array<i32>} : memref<16x64xf32, #tpu.memory_space<vmem>>, vector<16x64xf32>,
    %c1_226 = arith.constant 1 : index
    %c1_227 = arith.constant 1 : index
    %c0_228 = arith.constant 0 : index
    %177 = vector.load %arg11[%c1_226, %c1_227, %c0_228] : memref<6x6x64xbf16, #tpu.memory_space<vmem>>, vector<4x4x64xbf16>
    %178 = vector.shape_cast %177 : vector<4x4x64xbf16> to vector<16x64xbf16>
    %c4_229 = arith.constant 4 : index
    %c0_230 = arith.constant 0 : index
    %c0_231 = arith.constant 0 : index
    %179 = vector.load %arg5[%c4_229, %c0_230, %c0_231] : memref<9x64x64xbf16, #tpu.memory_space<vmem>>, vector<1x64x64xbf16>
    %180 = vector.shape_cast %179 : vector<1x64x64xbf16> to vector<64x64xbf16>
    %cst_232 = arith.constant dense<0.000000e+00> : vector<16x64xf32>
    %181 = tpu.matmul %178, %180, %cst_232 {dimension_numbers = #tpu.dot_dimension_numbers<[1], [0], [0], [1], [0, 0, 1, 1], [], []>} : vector<16x64xbf16>, vector<64x64xbf16>, vector<16x64xf32> -> vector<16x64xf32>
    %c0_233 = arith.constant 0 : index
    %c0_234 = arith.constant 0 : index
    %182 = vector.load %arg12[%c0_233, %c0_234] : memref<16x64xf32, #tpu.memory_space<vmem>>, vector<16x64xf32>
    %183 = arith.addf %182, %181 : vector<16x64xf32>
    %c0_235 = arith.constant 0 : index
    %c0_236 = arith.constant 0 : index
    %184 = vector.load %arg12[%c0_235, %c0_236] : memref<16x64xf32, #tpu.memory_space<vmem>>, vector<16x64xf32>
    tpu.vector_store %arg12[%c0_235, %c0_236], %183 {strides = array<i32>} : memref<16x64xf32, #tpu.memory_space<vmem>>, vector<16x64xf32>,
    %c1_237 = arith.constant 1 : index
    %c2_238 = arith.constant 2 : index
    %c0_239 = arith.constant 0 : index
    %185 = vector.load %arg11[%c1_237, %c2_238, %c0_239] : memref<6x6x64xbf16, #tpu.memory_space<vmem>>, vector<4x4x64xbf16>
    %186 = vector.shape_cast %185 : vector<4x4x64xbf16> to vector<16x64xbf16>
    %c5_240 = arith.constant 5 : index
    %c0_241 = arith.constant 0 : index
    %c0_242 = arith.constant 0 : index
    %187 = vector.load %arg5[%c5_240, %c0_241, %c0_242] : memref<9x64x64xbf16, #tpu.memory_space<vmem>>, vector<1x64x64xbf16>
    %188 = vector.shape_cast %187 : vector<1x64x64xbf16> to vector<64x64xbf16>
    %cst_243 = arith.constant dense<0.000000e+00> : vector<16x64xf32>
    %189 = tpu.matmul %186, %188, %cst_243 {dimension_numbers = #tpu.dot_dimension_numbers<[1], [0], [0], [1], [0, 0, 1, 1], [], []>} : vector<16x64xbf16>, vector<64x64xbf16>, vector<16x64xf32> -> vector<16x64xf32>
    %c0_244 = arith.constant 0 : index
    %c0_245 = arith.constant 0 : index
    %190 = vector.load %arg12[%c0_244, %c0_245] : memref<16x64xf32, #tpu.memory_space<vmem>>, vector<16x64xf32>
    %191 = arith.addf %190, %189 : vector<16x64xf32>
    %c0_246 = arith.constant 0 : index
    %c0_247 = arith.constant 0 : index
    %192 = vector.load %arg12[%c0_246, %c0_247] : memref<16x64xf32, #tpu.memory_space<vmem>>, vector<16x64xf32>
    tpu.vector_store %arg12[%c0_246, %c0_247], %191 {strides = array<i32>} : memref<16x64xf32, #tpu.memory_space<vmem>>, vector<16x64xf32>,
    %c2_248 = arith.constant 2 : index
    %c0_249 = arith.constant 0 : index
    %c0_250 = arith.constant 0 : index
    %193 = vector.load %arg11[%c2_248, %c0_249, %c0_250] : memref<6x6x64xbf16, #tpu.memory_space<vmem>>, vector<4x4x64xbf16>
    %194 = vector.shape_cast %193 : vector<4x4x64xbf16> to vector<16x64xbf16>
    %c6_251 = arith.constant 6 : index
    %c0_252 = arith.constant 0 : index
    %c0_253 = arith.constant 0 : index
    %195 = vector.load %arg5[%c6_251, %c0_252, %c0_253] : memref<9x64x64xbf16, #tpu.memory_space<vmem>>, vector<1x64x64xbf16>
    %196 = vector.shape_cast %195 : vector<1x64x64xbf16> to vector<64x64xbf16>
    %cst_254 = arith.constant dense<0.000000e+00> : vector<16x64xf32>
    %197 = tpu.matmul %194, %196, %cst_254 {dimension_numbers = #tpu.dot_dimension_numbers<[1], [0], [0], [1], [0, 0, 1, 1], [], []>} : vector<16x64xbf16>, vector<64x64xbf16>, vector<16x64xf32> -> vector<16x64xf32>
    %c0_255 = arith.constant 0 : index
    %c0_256 = arith.constant 0 : index
    %198 = vector.load %arg12[%c0_255, %c0_256] : memref<16x64xf32, #tpu.memory_space<vmem>>, vector<16x64xf32>
    %199 = arith.addf %198, %197 : vector<16x64xf32>
    %c0_257 = arith.constant 0 : index
    %c0_258 = arith.constant 0 : index
    %200 = vector.load %arg12[%c0_257, %c0_258] : memref<16x64xf32, #tpu.memory_space<vmem>>, vector<16x64xf32>
    tpu.vector_store %arg12[%c0_257, %c0_258], %199 {strides = array<i32>} : memref<16x64xf32, #tpu.memory_space<vmem>>, vector<16x64xf32>,
    %c2_259 = arith.constant 2 : index
    %c1_260 = arith.constant 1 : index
    %c0_261 = arith.constant 0 : index
    %201 = vector.load %arg11[%c2_259, %c1_260, %c0_261] : memref<6x6x64xbf16, #tpu.memory_space<vmem>>, vector<4x4x64xbf16>
    %202 = vector.shape_cast %201 : vector<4x4x64xbf16> to vector<16x64xbf16>
    %c7_262 = arith.constant 7 : index
    %c0_263 = arith.constant 0 : index
    %c0_264 = arith.constant 0 : index
    %203 = vector.load %arg5[%c7_262, %c0_263, %c0_264] : memref<9x64x64xbf16, #tpu.memory_space<vmem>>, vector<1x64x64xbf16>
    %204 = vector.shape_cast %203 : vector<1x64x64xbf16> to vector<64x64xbf16>
    %cst_265 = arith.constant dense<0.000000e+00> : vector<16x64xf32>
    %205 = tpu.matmul %202, %204, %cst_265 {dimension_numbers = #tpu.dot_dimension_numbers<[1], [0], [0], [1], [0, 0, 1, 1], [], []>} : vector<16x64xbf16>, vector<64x64xbf16>, vector<16x64xf32> -> vector<16x64xf32>
    %c0_266 = arith.constant 0 : index
    %c0_267 = arith.constant 0 : index
    %206 = vector.load %arg12[%c0_266, %c0_267] : memref<16x64xf32, #tpu.memory_space<vmem>>, vector<16x64xf32>
    %207 = arith.addf %206, %205 : vector<16x64xf32>
    %c0_268 = arith.constant 0 : index
    %c0_269 = arith.constant 0 : index
    %208 = vector.load %arg12[%c0_268, %c0_269] : memref<16x64xf32, #tpu.memory_space<vmem>>, vector<16x64xf32>
    tpu.vector_store %arg12[%c0_268, %c0_269], %207 {strides = array<i32>} : memref<16x64xf32, #tpu.memory_space<vmem>>, vector<16x64xf32>,
    %c2_270 = arith.constant 2 : index
    %c2_271 = arith.constant 2 : index
    %c0_272 = arith.constant 0 : index
    %209 = vector.load %arg11[%c2_270, %c2_271, %c0_272] : memref<6x6x64xbf16, #tpu.memory_space<vmem>>, vector<4x4x64xbf16>
    %210 = vector.shape_cast %209 : vector<4x4x64xbf16> to vector<16x64xbf16>
    %c8_273 = arith.constant 8 : index
    %c0_274 = arith.constant 0 : index
    %c0_275 = arith.constant 0 : index
    %211 = vector.load %arg5[%c8_273, %c0_274, %c0_275] : memref<9x64x64xbf16, #tpu.memory_space<vmem>>, vector<1x64x64xbf16>
    %212 = vector.shape_cast %211 : vector<1x64x64xbf16> to vector<64x64xbf16>
    %cst_276 = arith.constant dense<0.000000e+00> : vector<16x64xf32>
    %213 = tpu.matmul %210, %212, %cst_276 {dimension_numbers = #tpu.dot_dimension_numbers<[1], [0], [0], [1], [0, 0, 1, 1], [], []>} : vector<16x64xbf16>, vector<64x64xbf16>, vector<16x64xf32> -> vector<16x64xf32>
    %c0_277 = arith.constant 0 : index
    %c0_278 = arith.constant 0 : index
    %214 = vector.load %arg12[%c0_277, %c0_278] : memref<16x64xf32, #tpu.memory_space<vmem>>, vector<16x64xf32>
    %215 = arith.addf %214, %213 : vector<16x64xf32>
    %c0_279 = arith.constant 0 : index
    %c0_280 = arith.constant 0 : index
    %216 = vector.load %arg12[%c0_279, %c0_280] : memref<16x64xf32, #tpu.memory_space<vmem>>, vector<16x64xf32>
    tpu.vector_store %arg12[%c0_279, %c0_280], %215 {strides = array<i32>} : memref<16x64xf32, #tpu.memory_space<vmem>>, vector<16x64xf32>,
    %c0_281 = arith.constant 0 : index
    %c0_282 = arith.constant 0 : index
    %217 = vector.load %arg12[%c0_281, %c0_282] : memref<16x64xf32, #tpu.memory_space<vmem>>, vector<16x64xf32>
    %c0_283 = arith.constant 0 : index
    %c0_284 = arith.constant 0 : index
    %218 = vector.load %arg7[%c0_283, %c0_284] : memref<1x64xf32, #tpu.memory_space<vmem>>, vector<1x64xf32>
    %219 = vector.broadcast %218 : vector<1x64xf32> to vector<16x64xf32>
    %220 = arith.addf %217, %219 : vector<16x64xf32>
    %cst_285 = arith.constant 0.000000e+00 : f32
    %221 = vector.broadcast %cst_285 : f32 to vector<16x64xf32>
    %222 = arith.maximumf %220, %221 : vector<16x64xf32>
    %c0_286 = arith.constant 0 : index
    %c0_287 = arith.constant 0 : index
    %c0_288 = arith.constant 0 : index
    %223 = vector.load %arg8[%c0_286, %c0_287, %c0_288] : memref<1x16x64xf32, #tpu.memory_space<vmem>>, vector<1x16x64xf32>
    %224 = vector.shape_cast %223 : vector<1x16x64xf32> to vector<16x64xf32>
    %225 = vector.shape_cast %222 : vector<16x64xf32> to vector<1x16x64xf32>
    tpu.vector_store %arg8[%c0_286, %c0_287, %c0_288], %225 {strides = array<i32>} : memref<1x16x64xf32, #tpu.memory_space<vmem>>, vector<1x16x64xf32>,
    return
  }
  func.func @transform_0(%arg0: i32) -> (i32, i32, i32, i32) {
    %c0_i32 = arith.constant 0 : i32
    %c0_i32_0 = arith.constant 0 : i32
    %c0_i32_1 = arith.constant 0 : i32
    %c0_i32_2 = arith.constant 0 : i32
    return %arg0, %c0_i32, %c0_i32_0, %c0_i32_1 : i32, i32, i32, i32
  }
  func.func @transform_1(%arg0: i32) -> (i32, i32, i32, i32) {
    %c0_i32 = arith.constant 0 : i32
    %c0_i32_0 = arith.constant 0 : i32
    %c0_i32_1 = arith.constant 0 : i32
    %c0_i32_2 = arith.constant 0 : i32
    return %arg0, %c0_i32, %c0_i32_0, %c0_i32_1 : i32, i32, i32, i32
  }
  func.func @transform_2(%arg0: i32) -> (i32, i32, i32) {
    %c0_i32 = arith.constant 0 : i32
    %c0_i32_0 = arith.constant 0 : i32
    %c0_i32_1 = arith.constant 0 : i32
    %c0_i32_2 = arith.constant 0 : i32
    return %c0_i32, %c0_i32_0, %c0_i32_1 : i32, i32, i32
  }
  func.func @transform_3(%arg0: i32) -> (i32, i32, i32) {
    %c0_i32 = arith.constant 0 : i32
    %c0_i32_0 = arith.constant 0 : i32
    %c0_i32_1 = arith.constant 0 : i32
    %c0_i32_2 = arith.constant 0 : i32
    return %c0_i32, %c0_i32_0, %c0_i32_1 : i32, i32, i32
  }
  func.func @transform_4(%arg0: i32) -> (i32, i32, i32) {
    %c0_i32 = arith.constant 0 : i32
    %c0_i32_0 = arith.constant 0 : i32
    %c0_i32_1 = arith.constant 0 : i32
    %c0_i32_2 = arith.constant 0 : i32
    return %c0_i32, %c0_i32_0, %c0_i32_1 : i32, i32, i32
  }
  func.func @transform_5(%arg0: i32) -> (i32, i32) {
    %c0_i32 = arith.constant 0 : i32
    %c0_i32_0 = arith.constant 0 : i32
    %c0_i32_1 = arith.constant 0 : i32
    return %c0_i32, %c0_i32_0 : i32, i32
  }
  func.func @transform_6(%arg0: i32) -> (i32, i32) {
    %c0_i32 = arith.constant 0 : i32
    %c0_i32_0 = arith.constant 0 : i32
    %c0_i32_1 = arith.constant 0 : i32
    return %c0_i32, %c0_i32_0 : i32, i32
  }
  func.func @transform_7(%arg0: i32) -> (i32, i32, i32) {
    %c0_i32 = arith.constant 0 : i32
    %c0_i32_0 = arith.constant 0 : i32
    %c0_i32_1 = arith.constant 0 : i32
    return %arg0, %c0_i32, %c0_i32_0 : i32, i32, i32
  }
}

</mosaic_0001>

<bundles_post_ra>
// kernel: tpu_custom_call.1
= control target key start
LH: loop header
LB: loop body
LE: loop exit
PB: predicated region body
PF: predicated region fallthrough
CT: control target
= control target key end

     0   :  { %12 = vsyncpa [#allocation7], 0  ;;  %s7629_s0 = inlined_call_operand.vmem [shape: f32[2,4,4,128], index: 0, kind: input, shape index: {}]   ;;  %s7630_s1 = inlined_call_operand.vmem [shape: f32[2,4,4,64], index: 1, kind: input, shape index: {}]   ;;  %s7631_s2 = inlined_call_operand.vmem [shape: bf16[9,128,64], index: 2, kind: input, shape index: {}]   ;;  %s7632_s3 = inlined_call_operand.vmem [shape: bf16[9,64,64], index: 3, kind: input, shape index: {}]   ;;  %s7633_s4 = inlined_call_operand.vmem [shape: bf16[9,64,64], index: 4, kind: input, shape index: {}]   ;;  %s7634_s5 = inlined_call_operand.vmem [shape: f32[1,64], index: 5, kind: input, shape index: {}]   ;;  %s7635_s6 = inlined_call_operand.vmem [shape: f32[1,64], index: 6, kind: input, shape index: {}]   ;;  %s7636_s7 = inlined_call_operand.hbm [shape: f32[2,16,64], index: 7, kind: output, shape index: {}]  }
   0x1   :  { %14 = vsyncpa [#allocation7 + $0x1], 0  ;;  %s6468_s24 = smov 0   ;;  %s6470_s25 = smov 0  }
   0x2   :  { %s6472_s26 = smov 0   ;;  %s6474_s27 = smov 0  }
   0x3 LB: > { %s6489_s28 = sadd.s32 4294967295, %s6419_s27   ;;  %s4998_s29 = sadd.s32 4294967294, %s6419_s27   ;;  %s6419_s27 = sphi %s6474_s27, %s7656_s27   ;;  %s6415_s26 = sphi %s6472_s26, %s7655_s26   ;;  %s6411_s25 = sphi %s6470_s25, %s7654_s25   ;;  %s6407_s24 = sphi %s6468_s24, %s7653_s24  }
   0x4   : > { %s6493_s30 = sadd.s32 1, %s6419_s27   ;;  %s184_s8 = sadd.s32 1, %s6415_s26 }
   0x5   : > { %s181_s9 = ssub.s32 %s6419_s27, %s6493_s30  ;;  %p194_p0 = scmp.ne.s32.totalorder %s6415_s26, %s6411_s25 }
   0x6   : > { %p182_p1 = scmp.eq.s32.totalorder %s181_s9, 0  ;;  %p195_p2 = scmp.eq.s32.totalorder %s6489_s28, 1 }
   0x7   : > { %p200_p3 = scmp.ne.s32.totalorder %s6411_s25, %s6407_s24  ;;  %p201_p4 = scmp.eq.s32.totalorder %s4998_s29, 1 }
   0x8   : > { %s6504_s10 = scalar_select %p182_p1, %s6415_s26, %s184_s8  }
   0x9   : > { %p6506_p5 = por %p195_p2, %p194_p0  ;;  %p6510_p6 = por %p201_p4, %p200_p3 }
   0xa   : > { %p5001_p7 = scmp.ge.s32.totalorder %s6419_s27, 1  ;;  %p250_p8 = scmp.lt.s32.totalorder %s6419_s27, 3 }
   0xc   : > { %p251_p9 = pnand %p5001_p7, %p250_p8 }
   0xd   : > { %p287_p10 = scmp.lt.s32.totalorder (!%p251_p9), %s6489_s28, 1  ;;  %s5566_s16 = sshll.u32 (!%p251_p9), %s6489_s28, 8 }
   0xe   : > { %254 = sbr.rel (%p251_p9) target bundleno = 797 (0x31d), region = 48  ;;  %s7584_s21 = scalar_lea.hbm (!%p251_p9), %s7636_s7, %s5566_s16 }
   0xf   : > { %s6425_s23 = smov (!%p251_p9), [#allocation6]  }
  0x10   : > { %s6363_s8 = sshll.u32 (!%p251_p9), %s6425_s23, 4  ;;  %s6364_s8 = int_to_ptr.vmem [resolvable:$false] %s6363_s8 }
  0x13   : > { %v6179_v0 = vld [vmem:[%s7631_s2 + $0x38] sm:$0xff]   ;;  %v6421_v1 = vmov 0.0   ;;  %v6180_v2 = vld [vmem:[%s7631_s2 + $0x30] sm:$0xff]   ;;  %vm6422_vm0 = vmmov 0   ;;  %s6534_s19 = scalar_select %p287_p10, %s6489_s28, 1  ;;  %v6423_v4 = vmov 0   ;;  %v487_v17 = vlaneseq }
  0x14   : > { %5750 = vmatprep.subr.bf16.mxu1 %v6421_v1  ;;  %5738 = vmatprep.subr.bf16.mxu0 %v6421_v1  ;;  %v6182_v3 = vld [vmem:[%s7632_s3 + $0x18] sm:$0xff]   ;;  %298 = vst [vmem:[#allocation2] sm:$0x7] %v6423_v4  ;;  %299 = vst [vmem:[#allocation2 + $0x4] sm:$0x7] %v6423_v4  ;;  %v6184_v5 = vld [vmem:[%s7632_s3 + $0x10] sm:$0xff]  }
  0x15   : > { %5751 = vmatpush3.bf16.msra.mxu1 %v6179_v0  ;;  %5746 = vmatprep.mubr.msk.bf16.mxu0 %vm6422_vm0, %v6421_v1  ;;  %300 = vst [vmem:[#allocation2 + $0x8] sm:$0x7] %v6423_v4  ;;  %301 = vst [vmem:[#allocation2 + $0xc] sm:$0x7] %v6423_v4  ;;  %vm372_vm1 = vcmask 518144   ;;  %v6181_v6 = vld [vmem:[%s7631_s2 + $0x28] sm:$0xff]  }
  0x16   : > { %5752 = vmatprep.subr.bf16.mxu1 %v6421_v1  ;;  %5766 = vmatprep.mubr.msk.bf16.mxu1 %vm6422_vm0, %v6421_v1  ;;  %302 = vst [vmem:[#allocation2 + $0x10] sm:$0x7] %v6423_v4  ;;  %303 = vst [vmem:[#allocation2 + $0x14] sm:$0x7] %v6423_v4  ;;  %s5552_s29 = sshll.u32 %s6534_s19, 4  ;;  %v6186_v7 = vld [vmem:[%s7632_s3 + $0x8] sm:$0xff]  }
  0x17   : > { %5739 = vmatpush3.bf16.msra.mxu0 %v6182_v3  ;;  %373 = vst.msk [vmem:[#allocation3] sm:$0x7] %vm372_vm1, %v6423_v4  ;;  %374 = vst.msk [vmem:[#allocation3 + $0x4] sm:$0x7] %vm372_vm1, %v6423_v4  ;;  %s6562_s13 = scalar_lea.vmem %s7630_s1, %s5552_s29  ;;  %v6183_v8 = vld [vmem:[%s7631_s2 + $0x20] sm:$0xff]   ;;  %v6185_v14 = vld [vmem:[%s7631_s2 + $0x18] sm:$0xff]   ;;  %s6587_s9 = scalar_lea.vmem %s7629_s0, %s5552_s29 }
  0x18   : > { %5740 = vmatprep.subr.bf16.mxu0 %v6421_v1  ;;  %375 = vst.msk [vmem:[#allocation3 + $0x8] sm:$0x7] %vm372_vm1, %v6423_v4  ;;  %376 = vst.msk [vmem:[#allocation3 + $0xc] sm:$0x7] %vm372_vm1, %v6423_v4  ;;  %v379_v9 = vld [vmem:[%s6562_s13] sm:$0xf] }
  0x19   : > { %5753 = vmatpush3.bf16.msra.mxu1 %v6180_v2  ;;  %377 = vst.msk [vmem:[#allocation3 + $0x10] sm:$0x7] %vm372_vm1, %v6423_v4  ;;  %378 = vst.msk [vmem:[#allocation3 + $0x14] sm:$0x7] %vm372_vm1, %v6423_v4  ;;  %v380_v10 = vld [vmem:[%s6562_s13 + $0x4] sm:$0xf]  ;;  %v5558_v12 = vpack.c.bf16 %v379_v9, %v379_v9 }
  0x1a   : > { %3446 = vst.msk [vmem:[#allocation4] sm:$0x7] %vm372_vm1, %v6423_v4  ;;  %3447 = vst.msk [vmem:[#allocation4 + $0x4] sm:$0x7] %vm372_vm1, %v6423_v4  ;;  %5754 = vmatprep.subr.bf16.mxu1 %v6421_v1  ;;  %v381_v11 = vld [vmem:[%s6562_s13 + $0x8] sm:$0xf]  ;;  %v5559_v13 = vpack.c.bf16 %v380_v10, %v380_v10 }
  0x1b   : > { %3448 = vst.msk [vmem:[#allocation4 + $0x8] sm:$0x7] %vm372_vm1, %v6423_v4  ;;  %3449 = vst.msk [vmem:[#allocation4 + $0xc] sm:$0x7] %vm372_vm1, %v6423_v4  ;;  %5741 = vmatpush3.bf16.msra.mxu0 %v6184_v5  ;;  %v6188_v15 = vld [vmem:[%s7632_s3] sm:$0xff]   ;;  %v5560_v16 = vpack.c.bf16 %v381_v11, %v381_v11  ;;  %v400_v18 = vshrl.u32 %v5558_v12, 16 }
  0x1c   : > { %3450 = vst.msk [vmem:[#allocation4 + $0x10] sm:$0x7] %vm372_vm1, %v6423_v4  ;;  %3451 = vst.msk [vmem:[#allocation4 + $0x14] sm:$0x7] %vm372_vm1, %v6423_v4  ;;  %5742 = vmatprep.subr.bf16.mxu0 %v6421_v1  ;;  %vm358_vm2 = vsmask.f32 2306 }
  0x1d   : > { %5755 = vmatpush3.bf16.msra.mxu1 %v6181_v6  ;;  %v403_v19 = vshll.u32 %v5558_v12, 16  ;;  %v407_v20 = vshrl.u32 %v5559_v13, 16  ;;  %v410_v21 = vshll.u32 %v5559_v13, 16  ;;  %v414_v22 = vshrl.u32 %v5560_v16, 16  ;;  %vm6592_vm3 = vmand %vm372_vm1, %vm358_vm2  ;;  %v304_v31 = vld [vmem:[%s6587_s9] sm:$0xf] }
  0x1e   : > { %5756 = vmatprep.subr.bf16.mxu1 %v6421_v1  ;;  %v417_v23 = vshll.u32 %v5560_v16, 16  ;;  %v434_v24 = vld [vmem:[#allocation3 + $0x4] sm:$0x7]  ;;  %v402_v26 = vrot.slane %v400_v18, 7  ;;  %v488_v30 = vshrl.u32 %v487_v17, 7  ;;  %v6187_v33 = vld [vmem:[%s7631_s2 + $0x10] sm:$0xff]   ;;  %v5554_v40 = vpack.c.bf16 %v304_v31, %v304_v31 }
  0x1f   : > { %5743 = vmatpush3.bf16.msra.mxu0 %v6186_v7  ;;  %v437_v25 = vld [vmem:[#allocation3 + $0x8] sm:$0x7]  ;;  %v409_v27 = vrot.slane %v407_v20, 7  ;;  %v416_v28 = vrot.slane %v414_v22, 7  ;;  %v305_v32 = vld [vmem:[%s6587_s9 + $0x4] sm:$0xf] }
  0x20   : > { %5744 = vmatprep.subr.bf16.mxu0 %v6421_v1  ;;  %v405_v34 = vor.u32 %v403_v19, %v402_v26  ;;  %v440_v36 = vld [vmem:[#allocation3 + $0xc] sm:$0x7]  ;;  %v6424_v37 = vmov 1983009808   ;;  %v306_v39 = vld [vmem:[%s6587_s9 + $0x8] sm:$0xf]  ;;  %v5555_v42 = vpack.c.bf16 %v305_v32, %v305_v32 }
  0x21   : > { %5757 = vmatpush3.bf16.msra.mxu1 %v6183_v8  ;;  %v412_v35 = vor.u32 %v410_v21, %v409_v27  ;;  %v485_v38 = vunpack.c.l.s4 %v6424_v37  ;;  %v419_v41 = vor.u32 %v417_v23, %v416_v28  ;;  %v5556_v43 = vpack.c.bf16 %v306_v39, %v306_v39  ;;  %v6189_v48 = vld [vmem:[%s7631_s2 + $0x8] sm:$0xff]   ;;  %v360_v53 = vld [vmem:[#allocation2 + $0x4] sm:$0x7]  ;;  %v6192_v9 = vld [vmem:[%s7632_s3 + $0x38] sm:$0xff]   ;;  %s284_s29 = sand.u32 1, %s6411_s25   ;;  %s6365_s19 = scalar_lea.vmem %s6364_s8, 512 }
  0x22   : > { %5758 = vmatprep.subr.bf16.mxu1 %v6421_v1  ;;  %vm357_vm4 = vcmask 1042432   ;;  %v435_v44 = vsel %vm6592_vm3, %v405_v34, %v434_v24  ;;  %v325_v46 = vshrl.u32 %v5554_v40, 16  ;;  %v328_v47 = vshll.u32 %v5554_v40, 16  ;;  %v363_v57 = vld [vmem:[#allocation2 + $0x8] sm:$0x7]  ;;  %v6193_v3 = vld [vmem:[%s7631_s2] sm:$0xff]  }
  0x23   : > { %5745 = vmatpush3.bf16.msra.mxu0 %v6188_v15  ;;  %v438_v45 = vsel %vm6592_vm3, %v412_v35, %v437_v25  ;;  %436 = vst [vmem:[#allocation3 + $0x4] sm:$0x7] %v435_v44  ;;  %v441_v49 = vsel %vm6592_vm3, %v419_v41, %v440_v36  ;;  %v332_v50 = vshrl.u32 %v5555_v42, 16  ;;  %v335_v51 = vshll.u32 %v5555_v42, 16  ;;  %vm6616_vm5 = vmand %vm357_vm4, %vm358_vm2  ;;  %v366_v61 = vld [vmem:[#allocation2 + $0xc] sm:$0x7] }
  0x24   : > { %5770 = vmatprep.subr.bf16.mxu0 %v6421_v1  ;;  %439 = vst [vmem:[#allocation3 + $0x8] sm:$0x7] %v438_v45  ;;  %v339_v52 = vshrl.u32 %v5556_v43, 16  ;;  %442 = vst [vmem:[#allocation3 + $0xc] sm:$0x7] %v441_v49  ;;  %v486_v54 = vunpack.c.0.s8 %v485_v38  ;;  %v327_v55 = vrot.slane %v325_v46, 7 }
  0x25   : > { %5759 = vmatpush3.bf16.msra.mxu1 %v6185_v14  ;;  %v342_v56 = vshll.u32 %v5556_v43, 16  ;;  %v334_v58 = vrot.slane %v332_v50, 7  ;;  %vm523_vm6 = vcmask 523264   ;;  %vm721_vm7 = vsmask.f32 1280  ;;  %v6196_v32 = vld [vmem:[%s7632_s3 + $0x30] sm:$0xff]  }
  0x26   : > { %5760 = vmatprep.subr.bf16.mxu1 %v6421_v1  ;;  %v341_v59 = vrot.slane %v339_v52, 7  ;;  %v330_v62 = vor.u32 %v328_v47, %v327_v55  ;;  %v6620_v2 = vsub.s32 %v486_v54, %v488_v30  ;;  %vm722_vm8 = vsmask.f32 3336  ;;  %v6197_v36 = vld [vmem:[%s7632_s3 + $0x58] sm:$0xff]   ;;  %v6198_v41 = vld [vmem:[%s7632_s3 + $0x28] sm:$0xff]   ;;  %v6199_v50 = vld [vmem:[%s7632_s3 + $0x50] sm:$0xff]  }
  0x27   : > { %v337_v63 = vor.u32 %v335_v51, %v334_v58  ;;  %vm1144_vm9 = vcmask 1040384   ;;  %vm724_vm10 = vsmask.f32 5392  ;;  %vm726_vm11 = vsmask.f32 7448  ;;  %vm723_vm14 = vmor %vm721_vm7, %vm722_vm8  ;;  %v6233_v60 = vld [vmem:[%s7631_s2 + $0x130] sm:$0xff]  }
  0x28   : > { %v344_v0 = vor.u32 %v342_v56, %v341_v59  ;;  %v361_v4 = vsel %vm6616_vm5, %v330_v62, %v360_v53  ;;  %vm1145_vm12 = vcmask 1042434   ;;  %vm1147_vm13 = vcmask 1044484   ;;  %v5048_v10 = vld.sshfl [vmem:[#allocation3] sm:$0x13 pattern:$0x76325410]  ;;  %vm6639_vm15 = vmor %vm723_vm14, %vm724_vm10 }
  0x29   : > { %5761 = vmatpush3.bf16.msra.mxu1 %v6187_v33  ;;  %362 = vst [vmem:[#allocation2 + $0x4] sm:$0x7] %v361_v4  ;;  %v364_v5 = vsel %vm6616_vm5, %v337_v63, %v363_v57  ;;  %v816_v12 = vcombine.high %v5048_v10, %v5048_v10  ;;  %v842_v13 = vshrl.u32 %v5048_v10, 16  ;;  %v845_v14 = vshll.u32 %v5048_v10, 16  ;;  %vm6655_vm1 = vmor %vm1144_vm9, %vm1145_vm12  ;;  %v6340_v42 = vld [vmem:[%s7633_s4 + $0xe0] sm:$0xff]   ;;  %s5002_s15 = sshll.u32 %s284_s29, 4 }
  0x2a   : > { %5762 = vmatprep.subr.bf16.mxu1 %v6421_v1  ;;  %v367_v6 = vsel %vm6616_vm5, %v344_v0, %v366_v61  ;;  %v6341_v7 = vld.sshfl [vmem:[#allocation3] sm:$0xf pattern:$0x76325410]  ;;  %365 = vst [vmem:[#allocation2 + $0x8] sm:$0x7] %v364_v5  ;;  %vm6665_vm2 = vmor %vm6639_vm15, %vm726_vm11 }
  0x2b   : > { %368 = vst [vmem:[#allocation2 + $0xc] sm:$0x7] %v367_v6  ;;  %v6342_v8 = vld.sshfl [vmem:[#allocation3 + $0x8] sm:$0xf pattern:$0x76325410]  ;;  %vm6675_vm4 = vmor %vm6655_vm1, %vm1147_vm13 }
  0x2c   : > { %v5049_v11 = vld.sshfl [vmem:[#allocation3 + $0x4] sm:$0x13 pattern:$0x76325410]  ;;  %v498_v19 = vcombine.low %v6341_v7, %v6342_v8  ;;  %v844_v21 = vrot.slane %v842_v13, 6  ;;  %v847_v22 = vrot.slane %v845_v14, 7 }
  0x2d   : > { %5763 = vmatpush3.bf16.msra.mxu1 %v6189_v48  ;;  %v5050_v15 = vld.sshfl [vmem:[#allocation3 + $0x8] sm:$0x13 pattern:$0x76325410]  ;;  %v824_v16 = vcombine.high %v5049_v11, %v5049_v11  ;;  %v856_v17 = vshrl.u32 %v5049_v11, 16  ;;  %v859_v18 = vshll.u32 %v5049_v11, 16 }
  0x2e   : > { %5764 = vmatprep.subr.bf16.mxu1 %v6421_v1  ;;  %v5051_v20 = vld.sshfl [vmem:[#allocation3 + $0xc] sm:$0x13 pattern:$0x76325410]  ;;  %v832_v25 = vcombine.high %v5050_v15, %v5050_v15  ;;  %v851_v26 = vshll.u32 %v816_v12, 16  ;;  %5747 = vmatmul.mubr.msk.bf16.vlgmr.msra.gmra.mxu0 %vm523_vm6, %v498_v19  ;;  %v848_v31 = vor.u32 %v847_v22, %v844_v21  ;;  %v870_v38 = vshrl.u32 %v5050_v15, 16 }
  0x2f   : > { %v858_v27 = vrot.slane %v856_v17, 6  ;;  %v840_v30 = vcombine.high %v5051_v20, %v5051_v20  ;;  %5771 = vmatpush3.bf16.msra.mxu0 %v6192_v9  ;;  %5778 = vmatprep.mubr.msk.bf16.mxu0 %vm6422_vm0, %v6421_v1  ;;  %v861_v34 = vrot.slane %v859_v18, 7  ;;  %v865_v35 = vshll.u32 %v824_v16, 16  ;;  %v6200_v61 = vld [vmem:[%s7632_s3 + $0x20] sm:$0xff]   ;;  %v6201_v19 = vld [vmem:[%s7632_s3 + $0x48] sm:$0xff]   ;;  %s286_s17 = scalar_lea.vmem [#allocation6], %s5002_s15 }
  0x30   : > { %v6343_v23 = vld.sshfl [vmem:[#allocation2] sm:$0xf pattern:$0x76325410]  ;;  %v853_v33 = vrot.slane %v851_v26, 7  ;;  %5772 = vmatprep.subr.bf16.mxu0 %v6421_v1  ;;  %v849_v37 = vrot.slane %v848_v31, 2 }
  0x31   : > { %5765 = vmatpush3.bf16.msra.mxu1 %v6193_v3  ;;  %v873_v39 = vshll.u32 %v5050_v15, 16  ;;  %v862_v43 = vor.u32 %v861_v34, %v858_v27  ;;  %v867_v44 = vrot.slane %v865_v35, 7  ;;  %v879_v45 = vshll.u32 %v832_v25, 16  ;;  %v6203_v35 = vld [vmem:[%s7632_s3 + $0x40] sm:$0xff]   ;;  %s4924_s18 = sshll.u32 %s286_s17, 4  ;;  %s7589_s28 = scalar_lea.sflag [#allocation7], %s284_s29  ;;  %s7586_s18 = int_to_ptr.vmem [resolvable:$true] %s4924_s18 }
  0x32   : > { %5802 = vmatprep.subr.bf16.mxu1 %v6421_v1  ;;  %v6344_v28 = vld.sshfl [vmem:[#allocation2 + $0x8] sm:$0xf pattern:$0x76325410]  ;;  %v884_v46 = vshrl.u32 %v5051_v20, 16  ;;  %v872_v48 = vrot.slane %v870_v38, 6  ;;  %v854_v55 = vsel %vm6665_vm2, %v849_v37, %v853_v33  ;;  %p6366_p0 = scmp.lt.s32.totalorder %s7586_s18, %s6364_s8 }
  0x33   : > { %v588_v47 = vcombine.low %v6343_v23, %v6344_v28  ;;  %v875_v49 = vrot.slane %v873_v39, 7  ;;  %5773 = vmatpush3.bf16.msra.mxu0 %v6196_v32  ;;  %v863_v51 = vrot.slane %v862_v43, 2  ;;  %v887_v53 = vshll.u32 %v5051_v20, 16  ;;  %v6202_v39 = vld [vmem:[%s7631_s2 + $0x78] sm:$0xff]   ;;  %s6359_s22 = scalar_lea.vmem %s7586_s18, 256 }
  0x34   : > { %v886_v52 = vrot.slane %v884_v46, 6  ;;  %vm1149_vm7 = vcmask 1046534   ;;  %5774 = vmatprep.subr.bf16.mxu0 %v6421_v1  ;;  %v881_v57 = vrot.slane %v879_v45, 7  ;;  %v893_v58 = vshll.u32 %v840_v30, 16  ;;  %v6204_v45 = vld [vmem:[%s7631_s2 + $0x70] sm:$0xff]   ;;  %p6360_p11 = scmp.ne.s32.totalorder %s7586_s18, %s6359_s22  ;;  %p6367_p1 = scmp.lt.s32.totalorder %s6365_s19, %s6359_s22 }
  0x35   : > { %5767 = vmatmul.mubr.bf16.vlgmr.msra.gmra.mxu1 %v588_v47  ;;  %v876_v56 = vor.u32 %v875_v49, %v872_v48  ;;  %v5097_v59 = vld.sshfl [vmem:[#allocation3] sm:$0x12 pattern:$0x76325410]  ;;  %v6687_v62 = vsel %vm6665_vm2, %v863_v51, %v867_v44  ;;  %v889_v63 = vrot.slane %v887_v53, 7  ;;  %vm6695_vm8 = vmor %vm6675_vm4, %vm1149_vm7  ;;  %v6207_v46 = vld [vmem:[%s7631_s2 + $0xb0] sm:$0xff]  }
  0x36   : > { %5803 = vmatpush3.bf16.msra.mxu1 %v6197_v36  ;;  %5810 = vmatprep.mubr.msk.bf16.mxu1 %vm6422_vm0, %v6421_v1  ;;  %v5098_v0 = vld.sshfl [vmem:[#allocation3 + $0x4] sm:$0x12 pattern:$0x76325410]  ;;  %v1199_v3 = vcombine.high %v5097_v59, %v5097_v59  ;;  %v5101_v4 = vrot.slane %v5097_v59, 9  ;;  %v895_v6 = vrot.slane %v893_v58, 7  ;;  %v906_v16 = vcombine.low %v854_v55, %v6687_v62  ;;  %p6361_p12 = pnand %p6360_p11, %p6506_p5  ;;  %p6368_p2 = por %p6367_p1, %p6366_p0 }
  0x37   : > { %5804 = vmatprep.subr.bf16.mxu1 %v6421_v1  ;;  %v877_v5 = vrot.slane %v876_v56, 2  ;;  %v5099_v8 = vld.sshfl [vmem:[#allocation3 + $0x8] sm:$0x12 pattern:$0x76325410]  ;;  %v1207_v9 = vcombine.high %v5098_v0, %v5098_v0  ;;  %5775 = vmatpush3.bf16.msra.mxu0 %v6198_v41  ;;  %v890_v10 = vor.u32 %v889_v63, %v886_v52  ;;  %v5102_v14 = vrot.slane %v5098_v0, 9 }
  0x38   : > { %v5100_v11 = vld.sshfl [vmem:[#allocation3 + $0xc] sm:$0x12 pattern:$0x76325410]  ;;  %v1215_v12 = vcombine.high %v5099_v8, %v5099_v8  ;;  %v1226_v13 = vrot.slane %v1199_v3, 7  ;;  %5776 = vmatprep.subr.bf16.mxu0 %v6421_v1  ;;  %v5103_v22 = vrot.slane %v5099_v8, 9  ;;  %v914_v32 = vrot.slane %v906_v16, %v6620_v2  ;;  %p6362_p13 = pneg %p6361_p12 }
  0x39   : > { %v6702_v15 = vsel %vm6665_vm2, %v877_v5, %v881_v57  ;;  %v1223_v17 = vcombine.high %v5100_v11, %v5100_v11  ;;  %v1230_v18 = vrot.slane %v1207_v9, 7  ;;  %v891_v20 = vrot.slane %v890_v10, 2  ;;  %v6205_v44 = vld [vmem:[%s7631_s2 + $0xb8] sm:$0xff]   ;;  %v6206_v48 = vld [vmem:[%s7631_s2 + $0x68] sm:$0xff]   ;;  %v6211_v16 = vld [vmem:[%s7631_s2 + $0xa0] sm:$0xff]  }
  0x3a   : > { %5805 = vmatpush3.bf16.msra.mxu1 %v6199_v50  ;;  %v1227_v21 = vsel %vm6695_vm8, %v5101_v4, %v1226_v13  ;;  %v1234_v23 = vrot.slane %v1215_v12, 7  ;;  %v5104_v25 = vrot.slane %v5100_v11, 9  ;;  %v5028_v47 = vld.sshfl [vmem:[#allocation2] sm:$0x13 pattern:$0x76325410]  ;;  %p6369_p3 = pnand %p6368_p2, %p6362_p13 }
  0x3b   : > { %5806 = vmatprep.subr.bf16.mxu1 %v6421_v1  ;;  %v6713_v24 = vsel %vm6695_vm8, %v5102_v14, %v1230_v18  ;;  %v1238_v26 = vrot.slane %v1223_v17, 7  ;;  %5777 = vmatpush3.bf16.msra.mxu0 %v6200_v61  ;;  %v6717_v27 = vsel %vm6665_vm2, %v891_v20, %v895_v6  ;;  %v5029_v49 = vld.sshfl [vmem:[#allocation2 + $0x4] sm:$0x13 pattern:$0x76325410]  ;;  %v696_v50 = vcombine.high %v5028_v47, %v5028_v47  ;;  %v6209_v5 = vld [vmem:[%s7631_s2 + $0xa8] sm:$0xff]  }
  0x3c   : > { %v6721_v28 = vsel %vm6695_vm8, %v5103_v22, %v1234_v23  ;;  %v1249_v30 = vcombine.low %v1227_v21, %v6713_v24  ;;  %v907_v31 = vcombine.low %v6702_v15, %v6717_v27  ;;  %5782 = vmatprep.subr.bf16.mxu0 %v6421_v1  ;;  %v729_v51 = vshrl.u32 %v5028_v47, 16  ;;  %v5030_v53 = vld.sshfl [vmem:[#allocation2 + $0x8] sm:$0x13 pattern:$0x76325410]  ;;  %v6208_v11 = vld [vmem:[%s7631_s2 + $0x60] sm:$0xff]  }
  0x3d   : > { %v6730_v33 = vsel %vm6695_vm8, %v5104_v25, %v1238_v26  ;;  %v2241_v34 = vcombine.low %v6713_v24, %v6721_v28  ;;  %v732_v52 = vshll.u32 %v5028_v47, 16  ;;  %v704_v54 = vcombine.high %v5029_v49, %v5029_v49  ;;  %v5031_v57 = vld.sshfl [vmem:[#allocation2 + $0xc] sm:$0x13 pattern:$0x76325410]  ;;  %v6210_v25 = vld [vmem:[%s7631_s2 + $0x58] sm:$0xff]  }
  0x3e   : > { %5807 = vmatpush3.bf16.msra.mxu1 %v6201_v19  ;;  %v1250_v36 = vcombine.low %v6721_v28, %v6730_v33  ;;  %v1257_v37 = vrot.slane %v1249_v30, %v6620_v2  ;;  %v921_v38 = vrot.slane %v907_v31, %v6620_v2  ;;  %v743_v55 = vshrl.u32 %v5029_v49, 16  ;;  %v5076_v47 = vld.sshfl [vmem:[#allocation2 + $0xc] sm:$0x12 pattern:$0x76325410]  ;;  %v6236_v24 = vld [vmem:[%s7631_s2 + $0xd8] sm:$0xff]  }
  0x3f   : > { %5808 = vmatprep.subr.bf16.mxu1 %v6421_v1  ;;  %v746_v56 = vshll.u32 %v5029_v49, 16  ;;  %v712_v58 = vcombine.high %v5030_v53, %v5030_v53  ;;  %v731_v59 = vrot.slane %v729_v51, 6  ;;  %v734_v61 = vrot.slane %v732_v52, 7 }
  0x40   : > { %v1264_v40 = vrot.slane %v1250_v36, %v6620_v2  ;;  %v922_v41 = vcombine.low %v914_v32, %v921_v38  ;;  %v720_v63 = vcombine.high %v5031_v57, %v5031_v57  ;;  %v738_v0 = vshll.u32 %v696_v50, 16  ;;  %v5073_v32 = vld.sshfl [vmem:[#allocation2] sm:$0x12 pattern:$0x76325410] }
  0x41   : > { %v745_v3 = vrot.slane %v743_v55, 6  ;;  %v748_v4 = vrot.slane %v746_v56, 7  ;;  %v735_v6 = vor.u32 %v734_v61, %v731_v59  ;;  %v752_v8 = vshll.u32 %v704_v54, 16 }
  0x42   : > { %5809 = vmatpush3.bf16.msra.mxu1 %v6203_v35  ;;  %v1265_v43 = vcombine.low %v1257_v37, %v1264_v40  ;;  %5779 = vmatmul.mubr.msk.bf16.vlgmr.msra.gmra.mxu0 %vm523_vm6, %v922_v41  ;;  %v757_v9 = vshrl.u32 %v5030_v53, 16  ;;  %v760_v10 = vshll.u32 %v5030_v53, 16  ;;  %v766_v13 = vshll.u32 %v712_v58, 16  ;;  %v6212_v53 = vld [vmem:[%s7631_s2 + $0x50] sm:$0xff]  }
  0x43   : > { %5814 = vmatprep.subr.bf16.mxu1 %v6421_v1  ;;  %5783 = vmatpush3.bf16.msra.mxu0 %v6202_v39  ;;  %v749_v12 = vor.u32 %v748_v4, %v745_v3  ;;  %v771_v14 = vshrl.u32 %v5031_v57, 16  ;;  %v740_v17 = vrot.slane %v738_v0, 7  ;;  %v736_v20 = vrot.slane %v735_v6, 2  ;;  %v6213_v39 = vld [vmem:[%s7631_s2 + $0x98] sm:$0xff]   ;;  %v6215_v58 = vld [vmem:[%s7631_s2 + $0x90] sm:$0xff]  }
  0x44   : > { %5798 = vmatprep.mubr.msk.bf16.mxu0 %vm6422_vm0, %v6421_v1  ;;  %5784 = vmatprep.subr.bf16.mxu0 %v6421_v1  ;;  %v759_v18 = vrot.slane %v757_v9, 6  ;;  %v762_v19 = vrot.slane %v760_v10, 7  ;;  %v754_v21 = vrot.slane %v752_v8, 7  ;;  %v774_v23 = vshll.u32 %v5031_v57, 16  ;;  %v6214_v10 = vld [vmem:[%s7631_s2 + $0x48] sm:$0xff]  }
  0x45   : > { %5811 = vmatmul.mubr.msk.bf16.vlgmr.msra.gmra.mxu1 %vm523_vm6, %v1265_v43  ;;  %v773_v22 = vrot.slane %v771_v14, 6  ;;  %v750_v26 = vrot.slane %v749_v12, 2  ;;  %v780_v31 = vshll.u32 %v720_v63, 16  ;;  %v768_v35 = vrot.slane %v766_v13, 7  ;;  %v382_v13 = vld [vmem:[%s6562_s13 + $0xc] sm:$0xf] }
  0x46   : > { %5815 = vmatpush3.bf16.msra.mxu1 %v6205_v44  ;;  %5830 = vmatprep.mubr.msk.bf16.mxu1 %vm6422_vm0, %v6421_v1  ;;  %v763_v30 = vor.u32 %v762_v19, %v759_v18  ;;  %v776_v36 = vrot.slane %v774_v23, 7  ;;  %v5074_v37 = vld.sshfl [vmem:[#allocation2 + $0x4] sm:$0x12 pattern:$0x76325410]  ;;  %v1119_v38 = vcombine.high %v5073_v32, %v5073_v32  ;;  %v5077_v44 = vrot.slane %v5073_v32, 9 }
  0x47   : > { %5816 = vmatprep.subr.bf16.mxu1 %v6421_v1  ;;  %5785 = vmatpush3.bf16.msra.mxu0 %v6204_v45  ;;  %v5075_v41 = vld.sshfl [vmem:[#allocation2 + $0x8] sm:$0x12 pattern:$0x76325410]  ;;  %v1127_v43 = vcombine.high %v5074_v37, %v5074_v37  ;;  %v5078_v49 = vrot.slane %v5074_v37, 9  ;;  %v1143_v50 = vcombine.high %v5076_v47, %v5076_v47  ;;  %v741_v54 = vsel %vm6665_vm2, %v736_v20, %v740_v17  ;;  %v6216_v23 = vld [vmem:[%s7631_s2 + $0x40] sm:$0xff]  }
  0x48   : > { %5786 = vmatprep.subr.bf16.mxu0 %v6421_v1  ;;  %v764_v40 = vrot.slane %v763_v30, 2  ;;  %v777_v45 = vor.u32 %v776_v36, %v773_v22  ;;  %v1153_v51 = vrot.slane %v1119_v38, 7  ;;  %v5079_v56 = vrot.slane %v5075_v41, 9  ;;  %v6217_v18 = vld [vmem:[%s7631_s2 + $0x88] sm:$0xff]   ;;  %v6219_v32 = vld [vmem:[%s7631_s2 + $0x80] sm:$0xff]   ;;  %v6218_v37 = vld [vmem:[%s7632_s3 + $0x78] sm:$0xff]  }
  0x49   : > { %v1157_v52 = vrot.slane %v1127_v43, 7  ;;  %v6798_v59 = vsel %vm6665_vm2, %v750_v26, %v754_v21  ;;  %v5080_v63 = vrot.slane %v5076_v47, 9  ;;  %v1165_v0 = vrot.slane %v1143_v50, 7  ;;  %v6223_v43 = vld [vmem:[%s7632_s3 + $0x90] sm:$0xff]  }
  0x4a   : > { %5817 = vmatpush3.bf16.msra.mxu1 %v6207_v46  ;;  %v782_v46 = vrot.slane %v780_v31, 7  ;;  %v778_v55 = vrot.slane %v777_v45, 2  ;;  %v6802_v61 = vsel %vm6665_vm2, %v764_v40, %v768_v35  ;;  %v1154_v6 = vsel %vm6695_vm8, %v5077_v44, %v1153_v51  ;;  %v443_v31 = vld [vmem:[#allocation3 + $0x10] sm:$0x7]  ;;  %v6221_v40 = vld [vmem:[%s7632_s3 + $0x98] sm:$0xff]  }
  0x4b   : > { %5818 = vmatprep.subr.bf16.mxu1 %v6421_v1  ;;  %5787 = vmatpush3.bf16.msra.mxu0 %v6206_v48  ;;  %v1135_v48 = vcombine.high %v5075_v41, %v5075_v41  ;;  %v6811_v4 = vsel %vm6695_vm8, %v5078_v49, %v1157_v52  ;;  %v6821_v8 = vsel %vm6695_vm8, %v5080_v63, %v1165_v0  ;;  %v6220_v41 = vld [vmem:[%s7632_s3 + $0x70] sm:$0xff]   ;;  %v6345_v44 = vld.sshfl [vmem:[#allocation3 + $0x4] sm:$0xf pattern:$0x76325410]  ;;  %v6222_v45 = vld [vmem:[%s7632_s3 + $0x68] sm:$0xff]  }
  0x4c   : > { %5788 = vmatprep.subr.bf16.mxu0 %v6421_v1  ;;  %v6807_v3 = vsel %vm6665_vm2, %v778_v55, %v782_v46  ;;  %v5561_v14 = vpack.c.bf16 %v382_v13, %v382_v13  ;;  %v307_v52 = vld [vmem:[%s6587_s9 + $0xc] sm:$0xf]  ;;  %v6228_v13 = vld [vmem:[%s7631_s2 + $0xf8] sm:$0xff]  }
  0x4d   : > { %v1161_v57 = vrot.slane %v1135_v48, 7  ;;  %v992_v12 = vcombine.low %v6802_v61, %v6807_v3  ;;  %v6225_v48 = vld [vmem:[%s7632_s3 + $0x88] sm:$0xff]  }
  0x4e   : > { %5819 = vmatpush3.bf16.msra.mxu1 %v6209_v5  ;;  %v421_v19 = vshrl.u32 %v5561_v14, 16  ;;  %v424_v20 = vshll.u32 %v5561_v14, 16 }
  0x4f   : > { %5820 = vmatprep.subr.bf16.mxu1 %v6421_v1  ;;  %5789 = vmatpush3.bf16.msra.mxu0 %v6208_v11  ;;  %v6815_v5 = vsel %vm6695_vm8, %v5079_v56, %v1161_v57  ;;  %v991_v11 = vcombine.low %v741_v54, %v6798_v59  ;;  %v1006_v22 = vrot.slane %v992_v12, %v6620_v2 }
  0x50   : > { %5790 = vmatprep.subr.bf16.mxu0 %v6421_v1  ;;  %v2326_v9 = vcombine.low %v6811_v4, %v6815_v5  ;;  %v1335_v17 = vcombine.low %v6815_v5, %v6821_v8  ;;  %v5557_v57 = vpack.c.bf16 %v307_v52, %v307_v52 }
  0x51   : > { %v999_v21 = vrot.slane %v991_v11, %v6620_v2 }
  0x52   : > { %5821 = vmatpush3.bf16.msra.mxu1 %v6211_v16  ;;  %v1334_v16 = vcombine.low %v1154_v6, %v6811_v4  ;;  %v1349_v30 = vrot.slane %v1335_v17, %v6620_v2  ;;  %v346_v11 = vshrl.u32 %v5557_v57, 16  ;;  %v349_v12 = vshll.u32 %v5557_v57, 16  ;;  %v6241_v57 = vld [vmem:[%s7631_s2 + $0x110] sm:$0xff]   ;;  %v6247_v4 = vld [vmem:[%s7631_s2 + $0x100] sm:$0xff]  }
  0x53   : > { %5822 = vmatprep.subr.bf16.mxu1 %v6421_v1  ;;  %5791 = vmatpush3.bf16.msra.mxu0 %v6210_v25  ;;  %v423_v25 = vrot.slane %v421_v19, 7  ;;  %v1007_v36 = vcombine.low %v999_v21, %v1006_v22 }
  0x54   : > { %5792 = vmatprep.subr.bf16.mxu0 %v6421_v1  ;;  %v1342_v26 = vrot.slane %v1334_v16, %v6620_v2  ;;  %v369_v16 = vld [vmem:[#allocation2 + $0x10] sm:$0x7]  ;;  %v348_v17 = vrot.slane %v346_v11, 7  ;;  %v6243_v11 = vld [vmem:[%s7631_s2 + $0x108] sm:$0xff]  }
  0x55   : > { %v426_v35 = vor.u32 %v424_v20, %v423_v25  ;;  %v6230_v20 = vld [vmem:[%s7631_s2 + $0xf0] sm:$0xff]  }
  0x56   : > { %5823 = vmatpush3.bf16.msra.mxu1 %v6213_v39  ;;  %v1350_v39 = vcombine.low %v1342_v26, %v1349_v30  ;;  %v351_v19 = vor.u32 %v349_v12, %v348_v17  ;;  %v1990_v12 = vcombine.low %v6798_v59, %v6802_v61  ;;  %v6246_v59 = vld [vmem:[%s7632_s3 + $0xb8] sm:$0xff]  }
  0x57   : > { %5824 = vmatprep.subr.bf16.mxu1 %v6421_v1  ;;  %5793 = vmatpush3.bf16.msra.mxu0 %v6212_v53  ;;  %v444_v38 = vsel %vm6592_vm3, %v426_v35, %v443_v31  ;;  %v6224_v53 = vld [vmem:[%s7632_s3 + $0x60] sm:$0xff]   ;;  %v6232_v31 = vld [vmem:[%s7631_s2 + $0xe8] sm:$0xff]  }
  0x58   : > { %5794 = vmatprep.subr.bf16.mxu0 %v6421_v1  ;;  %445 = vst [vmem:[#allocation3 + $0x10] sm:$0x7] %v444_v38  ;;  %v6943_v38 = vrot.slane %v2241_v34, %v6620_v2  ;;  %v6237_v34 = vld [vmem:[%s7631_s2 + $0x120] sm:$0xff]   ;;  %v1998_v61 = vrot.slane %v1990_v12, %v6620_v2 }
  0x59   : > { %v7104_v12 = vld.sshfl [vmem:[#allocation3 + $0x14] sm:$0x12 pattern:$0x76325410] }
  0x5a   : > { %5825 = vmatpush3.bf16.msra.mxu1 %v6215_v58  ;;  %v6229_v58 = vld [vmem:[%s7632_s3 + $0x80] sm:$0xff]  }
  0x5b   : > { %5826 = vmatprep.subr.bf16.mxu1 %v6421_v1  ;;  %5795 = vmatpush3.bf16.msra.mxu0 %v6214_v10  ;;  %v1905_v10 = vcombine.low %v6687_v62, %v6702_v15 }
  0x5c   : > { %5796 = vmatprep.subr.bf16.mxu0 %v6421_v1 }
  0x5d   : > { %v1913_v15 = vrot.slane %v1905_v10, %v6620_v2 }
  0x5e   : > { %5827 = vmatpush3.bf16.msra.mxu1 %v6217_v18 }
  0x5f   : > { %5828 = vmatprep.subr.bf16.mxu1 %v6421_v1  ;;  %5797 = vmatpush3.bf16.msra.mxu0 %v6216_v23  ;;  %v6346_v46 = vld.sshfl [vmem:[#allocation3 + $0xc] sm:$0xf pattern:$0x76325410]  ;;  %v6231_v23 = vld [vmem:[%s7631_s2 + $0x138] sm:$0xff]  }
  0x60   : > { %5834 = vmatprep.subr.bf16.mxu0 %v6421_v1  ;;  %v5186_v47 = vld.sshfl [vmem:[#allocation3 + $0x10] sm:$0x13 pattern:$0x76325410]  ;;  %v1501_v6 = vcombine.low %v6345_v44, %v6346_v46 }
  0x61   : > { %v1839_v49 = vcombine.high %v5186_v47, %v5186_v47  ;;  %v1883_v50 = vshrl.u32 %v5186_v47, 16  ;;  %v1886_v51 = vshll.u32 %v5186_v47, 16  ;;  %v5235_v22 = vld.sshfl [vmem:[#allocation3 + $0x10] sm:$0x12 pattern:$0x76325410] }
  0x62   : > { %5829 = vmatpush3.bf16.msra.mxu1 %v6219_v32  ;;  %5799 = vmatmul.mubr.bf16.vlgmr.msra.gmra.mxu0 %v1007_v36  ;;  %v2215_v25 = vcombine.high %v5235_v22, %v5235_v22  ;;  %v5239_v26 = vrot.slane %v5235_v22, 9  ;;  %v6349_v22 = vld.sshfl [vmem:[#allocation3 + $0x8] sm:$0xf pattern:$0x76325410] }
  0x63   : > { %5866 = vmatprep.subr.bf16.mxu1 %v6421_v1  ;;  %5835 = vmatpush3.bf16.msra.mxu0 %v6218_v37  ;;  %v1885_v54 = vrot.slane %v1883_v50, 6  ;;  %v1888_v55 = vrot.slane %v1886_v51, 7  ;;  %v1892_v56 = vshll.u32 %v1839_v49, 16  ;;  %v6234_v37 = vld [vmem:[%s7631_s2 + $0xe0] sm:$0xff]   ;;  %v6239_v50 = vld [vmem:[%s7631_s2 + $0x118] sm:$0xff]  }
  0x64   : > { %5842 = vmatprep.mubr.msk.bf16.mxu0 %vm6422_vm0, %v6421_v1  ;;  %5836 = vmatprep.subr.bf16.mxu0 %v6421_v1  ;;  %v2230_v32 = vrot.slane %v2215_v25, 7  ;;  %v6347_v51 = vld.sshfl [vmem:[#allocation2 + $0x4] sm:$0xf pattern:$0x76325410] }
  0x65   : > { %5831 = vmatmul.mubr.bf16.vlgmr.msra.gmra.mxu1 %v1350_v39  ;;  %v1889_v63 = vor.u32 %v1888_v55, %v1885_v54  ;;  %v1894_v0 = vrot.slane %v1892_v56, 7  ;;  %v6240_v55 = vld [vmem:[%s7631_s2 + $0xc8] sm:$0xff]  }
  0x66   : > { %5867 = vmatpush3.bf16.msra.mxu1 %v6221_v40  ;;  %5874 = vmatprep.mubr.msk.bf16.mxu1 %vm6422_vm0, %v6421_v1  ;;  %v6931_v35 = vsel %vm6695_vm8, %v5239_v26, %v2230_v32  ;;  %v6253_v25 = vld [vmem:[%s7632_s3 + $0xc8] sm:$0xff]   ;;  %v6254_v26 = vld [vmem:[%s7631_s2 + $0x178] sm:$0xff]   ;;  %v5319_v32 = vld.sshfl [vmem:[#allocation3 + $0xc] sm:$0x13 pattern:$0x76325410] }
  0x67   : > { %5868 = vmatprep.subr.bf16.mxu1 %v6421_v1  ;;  %5837 = vmatpush3.bf16.msra.mxu0 %v6220_v41  ;;  %v1890_v14 = vrot.slane %v1889_v63, 2  ;;  %v2242_v36 = vcombine.low %v6730_v33, %v6931_v35  ;;  %v6235_v33 = vld [vmem:[%s7631_s2 + $0x128] sm:$0xff]  }
  0x68   : > { %5838 = vmatprep.subr.bf16.mxu0 %v6421_v1 }
  0x69   : > { %v6900_v18 = vsel %vm6665_vm2, %v1890_v14, %v1894_v0  ;;  %v6947_v39 = vrot.slane %v2242_v36, %v6620_v2  ;;  %v5321_v36 = vld.sshfl [vmem:[#allocation3 + $0x14] sm:$0x13 pattern:$0x76325410] }
  0x6a   : > { %5869 = vmatpush3.bf16.msra.mxu1 %v6223_v43  ;;  %v1906_v62 = vcombine.low %v6717_v27, %v6900_v18  ;;  %v370_v27 = vsel %vm6616_vm5, %v351_v19, %v369_v16  ;;  %v6249_v19 = vld [vmem:[%s7632_s3 + $0xd8] sm:$0xff]  }
  0x6b   : > { %5870 = vmatprep.subr.bf16.mxu1 %v6421_v1  ;;  %5839 = vmatpush3.bf16.msra.mxu0 %v6222_v45  ;;  %371 = vst [vmem:[#allocation2 + $0x10] sm:$0x7] %v370_v27  ;;  %v2257_v28 = vcombine.low %v6943_v38, %v6947_v39  ;;  %v6252_v27 = vld [vmem:[%s7632_s3 + $0xa0] sm:$0xff]   ;;  %v6259_v38 = vld [vmem:[%s7631_s2 + $0x1b8] sm:$0xff]   ;;  %v6260_v39 = vld [vmem:[%s7631_s2 + $0x168] sm:$0xff]  }
  0x6c   : > { %5840 = vmatprep.subr.bf16.mxu0 %v6421_v1  ;;  %v1920_v21 = vrot.slane %v1906_v62, %v6620_v2  ;;  %v7005_v62 = vrot.slane %v2326_v9, %v6620_v2 }
  0x6e   : > { %5871 = vmatpush3.bf16.msra.mxu1 %v6225_v48  ;;  %v1921_v30 = vcombine.low %v1913_v15, %v1920_v21  ;;  %v6238_v48 = vld [vmem:[%s7631_s2 + $0xd0] sm:$0xff]  }
  0x6f   : > { %5872 = vmatprep.subr.bf16.mxu1 %v6421_v1  ;;  %5841 = vmatpush3.bf16.msra.mxu0 %v6224_v53  ;;  %v6251_v21 = vld [vmem:[%s7632_s3 + $0xd0] sm:$0xff]  }
  0x70   : > { %5846 = vmatprep.subr.bf16.mxu0 %v6421_v1 }
  0x72   : > { %5873 = vmatpush3.bf16.msra.mxu1 %v6229_v58  ;;  %5843 = vmatmul.mubr.msk.bf16.vlgmr.msra.gmra.mxu0 %vm523_vm6, %v1501_v6  ;;  %v5166_v40 = vld.sshfl [vmem:[#allocation2 + $0x10] sm:$0x13 pattern:$0x76325410]  ;;  %v6242_v6 = vld [vmem:[%s7631_s2 + $0xc0] sm:$0xff]  }
  0x73   : > { %5878 = vmatprep.subr.bf16.mxu1 %v6421_v1  ;;  %5847 = vmatpush3.bf16.msra.mxu0 %v6228_v13  ;;  %v1726_v41 = vcombine.high %v5166_v40, %v5166_v40  ;;  %v1770_v43 = vshrl.u32 %v5166_v40, 16  ;;  %v1773_v44 = vshll.u32 %v5166_v40, 16  ;;  %v6348_v54 = vld.sshfl [vmem:[#allocation2 + $0xc] sm:$0xf pattern:$0x76325410] }
  0x74   : > { %5862 = vmatprep.mubr.msk.bf16.mxu0 %vm6422_vm0, %v6421_v1  ;;  %5848 = vmatprep.subr.bf16.mxu0 %v6421_v1  ;;  %v5211_v56 = vld.sshfl [vmem:[#allocation2 + $0x10] sm:$0x12 pattern:$0x76325410]  ;;  %v1590_v16 = vcombine.low %v6347_v51, %v6348_v54 }
  0x75   : > { %5875 = vmatmul.mubr.msk.bf16.vlgmr.msra.gmra.mxu1 %vm523_vm6, %v1921_v30  ;;  %v1772_v45 = vrot.slane %v1770_v43, 6  ;;  %v1775_v46 = vrot.slane %v1773_v44, 7  ;;  %v1779_v47 = vshll.u32 %v1726_v41, 16  ;;  %v2142_v63 = vcombine.high %v5211_v56, %v5211_v56  ;;  %v6255_v30 = vld [vmem:[%s7632_s3 + $0xc0] sm:$0xff]  }
  0x76   : > { %5879 = vmatpush3.bf16.msra.mxu1 %v6231_v23  ;;  %5894 = vmatprep.mubr.msk.bf16.mxu1 %vm6422_vm0, %v6421_v1  ;;  %v5215_v0 = vrot.slane %v5211_v56, 9  ;;  %v6350_v23 = vld.sshfl [vmem:[#allocation3 + $0x10] sm:$0xf pattern:$0x76325410]  ;;  %v2849_v43 = vshrl.u32 %v5319_v32, 16 }
  0x77   : > { %5849 = vmatpush3.bf16.msra.mxu0 %v6230_v20  ;;  %5880 = vmatprep.subr.bf16.mxu1 %v6421_v1  ;;  %v1776_v49 = vor.u32 %v1775_v46, %v1772_v45  ;;  %v1781_v53 = vrot.slane %v1779_v47, 7  ;;  %v2157_v10 = vrot.slane %v2142_v63, 7  ;;  %v6250_v20 = vld [vmem:[%s7632_s3 + $0xa8] sm:$0xff]   ;;  %v2852_v44 = vshll.u32 %v5319_v32, 16  ;;  %v6261_v46 = vld [vmem:[%s7631_s2 + $0x1b0] sm:$0xff]   ;;  %v6264_v63 = vld [vmem:[%s7631_s2 + $0x158] sm:$0xff]  }
  0x78   : > { %5850 = vmatprep.subr.bf16.mxu0 %v6421_v1  ;;  %v2880_v45 = vshll.u32 %v5321_v36, 16  ;;  %v2851_v51 = vrot.slane %v2849_v43, 6  ;;  %v6277_v43 = vld [vmem:[%s7632_s3 + $0x118] sm:$0xff]  }
  0x79   : > { %v1777_v52 = vrot.slane %v1776_v49, 2  ;;  %v6996_v14 = vsel %vm6695_vm8, %v5215_v0, %v2157_v10  ;;  %v7099_v0 = vld.sshfl [vmem:[#allocation3 + $0x8] sm:$0x12 pattern:$0x76325410] }
  0x7a   : > { %5881 = vmatpush3.bf16.msra.mxu1 %v6233_v60  ;;  %v2327_v17 = vcombine.low %v6821_v8, %v6996_v14  ;;  %v6248_v8 = vld [vmem:[%s7632_s3 + $0xb0] sm:$0xff]   ;;  %v2882_v56 = vrot.slane %v2880_v45, 7 }
  0x7b   : > { %5851 = vmatpush3.bf16.msra.mxu0 %v6232_v31  ;;  %5882 = vmatprep.subr.bf16.mxu1 %v6421_v1  ;;  %v6980_v58 = vsel %vm6665_vm2, %v1777_v52, %v1781_v53  ;;  %v5318_v31 = vld.sshfl [vmem:[#allocation3 + $0x8] sm:$0x13 pattern:$0x76325410]  ;;  %v6256_v60 = vld [vmem:[%s7631_s2 + $0x170] sm:$0xff]   ;;  %v2854_v52 = vrot.slane %v2852_v44, 7 }
  0x7c   : > { %5852 = vmatprep.subr.bf16.mxu0 %v6421_v1  ;;  %v1991_v13 = vcombine.low %v6807_v3, %v6980_v58  ;;  %v7014_v15 = vrot.slane %v2327_v17, %v6620_v2  ;;  %v2838_v40 = vshll.u32 %v5318_v31, 16  ;;  %v2809_v41 = vcombine.high %v5318_v31, %v5318_v31  ;;  %v6263_v53 = vld [vmem:[%s7631_s2 + $0x1a8] sm:$0xff]   ;;  %v6279_v45 = vld [vmem:[%s7632_s3 + $0x110] sm:$0xff]  }
  0x7d   : > { %v3185_v17 = vcombine.high %v7099_v0, %v7099_v0 }
  0x7e   : > { %5883 = vmatpush3.bf16.msra.mxu1 %v6235_v33  ;;  %v2005_v3 = vrot.slane %v1991_v13, %v6620_v2  ;;  %v2342_v5 = vcombine.low %v7005_v62, %v7014_v15  ;;  %v2835_v33 = vshrl.u32 %v5318_v31, 16  ;;  %v2840_v49 = vrot.slane %v2838_v40, 7  ;;  %v6273_v40 = vld [vmem:[%s7631_s2 + $0x180] sm:$0xff]  }
  0x7f   : > { %5853 = vmatpush3.bf16.msra.mxu0 %v6234_v37  ;;  %5884 = vmatprep.subr.bf16.mxu1 %v6421_v1  ;;  %v2495_v37 = vcombine.low %v6349_v22, %v6350_v23  ;;  %v5374_v31 = vrot.slane %v7104_v12, 9 }
  0x80   : > { %5854 = vmatprep.subr.bf16.mxu0 %v6421_v1  ;;  %v2006_v9 = vcombine.low %v1998_v61, %v2005_v3  ;;  %v2837_v47 = vrot.slane %v2835_v33, 6  ;;  %v6272_v33 = vld [vmem:[%s7632_s3 + $0xf8] sm:$0xff]  }
  0x82   : > { %5885 = vmatpush3.bf16.msra.mxu1 %v6237_v34  ;;  %v2877_v34 = vshrl.u32 %v5321_v36, 16  ;;  %v2841_v10 = vor.u32 %v2840_v49, %v2837_v47 }
  0x83   : > { %5855 = vmatpush3.bf16.msra.mxu0 %v6236_v24  ;;  %5886 = vmatprep.subr.bf16.mxu1 %v6421_v1  ;;  %v2817_v24 = vcombine.high %v5319_v32, %v5319_v32 }
  0x84   : > { %5856 = vmatprep.subr.bf16.mxu0 %v6421_v1 }
  0x85   : > { %v7092_v54 = vshll.u32 %v2817_v24, 16 }
  0x86   : > { %5887 = vmatpush3.bf16.msra.mxu1 %v6239_v50  ;;  %v7086_v50 = vshll.u32 %v2809_v41, 16  ;;  %v6276_v41 = vld [vmem:[%s7632_s3 + $0xf0] sm:$0xff]  }
  0x87   : > { %5857 = vmatpush3.bf16.msra.mxu0 %v6238_v48  ;;  %5888 = vmatprep.subr.bf16.mxu1 %v6421_v1  ;;  %v6262_v48 = vld [vmem:[%s7631_s2 + $0x160] sm:$0xff]   ;;  %v2860_v3 = vrot.slane %v7092_v54, 7 }
  0x88   : > { %5858 = vmatprep.subr.bf16.mxu0 %v6421_v1  ;;  %v2846_v61 = vrot.slane %v7086_v50, 7 }
  0x8a   : > { %5889 = vmatpush3.bf16.msra.mxu1 %v6241_v57 }
  0x8b   : > { %5859 = vmatpush3.bf16.msra.mxu0 %v6240_v55  ;;  %5890 = vmatprep.subr.bf16.mxu1 %v6421_v1  ;;  %v2879_v55 = vrot.slane %v2877_v34, 6 }
  0x8c   : > { %5860 = vmatprep.subr.bf16.mxu0 %v6421_v1 }
  0x8d   : > { %v2883_v13 = vor.u32 %v2882_v56, %v2879_v55  ;;  %v5298_v55 = vld.sshfl [vmem:[#allocation2 + $0x8] sm:$0x13 pattern:$0x76325410]  ;;  %v6282_v56 = vld [vmem:[%s7631_s2 + $0x1f8] sm:$0xff]  }
  0x8e   : > { %5891 = vmatpush3.bf16.msra.mxu1 %v6243_v11  ;;  %v2855_v11 = vor.u32 %v2854_v52, %v2851_v51 }
  0x8f   : > { %5861 = vmatpush3.bf16.msra.mxu0 %v6242_v6  ;;  %5892 = vmatprep.subr.bf16.mxu1 %v6421_v1  ;;  %v7102_v6 = vld.sshfl [vmem:[#allocation3 + $0xc] sm:$0x12 pattern:$0x76325410]  ;;  %v2884_v22 = vrot.slane %v2883_v13, 2 }
  0x90   : > { %5898 = vmatprep.subr.bf16.mxu0 %v6421_v1  ;;  %v5372_v23 = vrot.slane %v7102_v6, 9 }
  0x92   : > { %5863 = vmatmul.mubr.bf16.vlgmr.msra.gmra.mxu0 %v1590_v16  ;;  %5893 = vmatpush3.bf16.msra.mxu1 %v6247_v4  ;;  %v6265_v16 = vld [vmem:[%s7631_s2 + $0x1a0] sm:$0xff]   ;;  %v3209_v4 = vcombine.high %v7104_v12, %v7104_v12  ;;  %v6284_v12 = vld [vmem:[%s7631_s2 + $0x1f0] sm:$0xff]  }
  0x93   : > { %5899 = vmatpush3.bf16.msra.mxu0 %v6246_v59  ;;  %5906 = vmatprep.mubr.msk.bf16.mxu0 %vm6422_vm0, %v6421_v1  ;;  %v3193_v59 = vcombine.high %v7102_v6, %v7102_v6  ;;  %v6283_v6 = vld [vmem:[%s7632_s3 + $0x100] sm:$0xff]  }
  0x94   : > { %5900 = vmatprep.subr.bf16.mxu0 %v6421_v1  ;;  %5930 = vmatprep.subr.bf16.mxu1 %v6421_v1  ;;  %v3224_v32 = vrot.slane %v3209_v4, 7  ;;  %v2696_v4 = vcombine.high %v5298_v55, %v5298_v55 }
  0x95   : > { %5895 = vmatmul.mubr.bf16.vlgmr.msra.gmra.mxu1 %v2006_v9  ;;  %v6267_v9 = vld [vmem:[%s7631_s2 + $0x198] sm:$0xff]  }
  0x96   : > { %5931 = vmatpush3.bf16.msra.mxu1 %v6249_v19  ;;  %5938 = vmatprep.mubr.msk.bf16.mxu1 %vm6422_vm0, %v6421_v1  ;;  %v2842_v19 = vrot.slane %v2841_v10, 2  ;;  %v2722_v10 = vshrl.u32 %v5298_v55, 16 }
  0x97   : > { %5901 = vmatpush3.bf16.msra.mxu0 %v6248_v8  ;;  %5932 = vmatprep.subr.bf16.mxu1 %v6421_v1  ;;  %v6266_v8 = vld [vmem:[%s7631_s2 + $0x150] sm:$0xff]  }
  0x98   : > { %5902 = vmatprep.subr.bf16.mxu0 %v6421_v1  ;;  %v2847_v44 = vsel %vm6665_vm2, %v2842_v19, %v2846_v61  ;;  %v2724_v19 = vrot.slane %v2722_v10, 6 }
  0x9a   : > { %5933 = vmatpush3.bf16.msra.mxu1 %v6251_v21 }
  0x9b   : > { %5903 = vmatpush3.bf16.msra.mxu0 %v6250_v20  ;;  %5934 = vmatprep.subr.bf16.mxu1 %v6421_v1  ;;  %v2856_v20 = vrot.slane %v2855_v11, 2  ;;  %v2725_v11 = vshll.u32 %v5298_v55, 16 }
  0x9c   : > { %5904 = vmatprep.subr.bf16.mxu0 %v6421_v1 }
  0x9d   : > { %v2861_v24 = vsel %vm6665_vm2, %v2856_v20, %v2860_v3  ;;  %v6285_v3 = vld [vmem:[%s7631_s2 + $0x238] sm:$0xff]   ;;  %v2727_v20 = vrot.slane %v2725_v11, 7 }
  0x9e   : > { %5935 = vmatpush3.bf16.msra.mxu1 %v6253_v25  ;;  %v6268_v25 = vld [vmem:[%s7631_s2 + $0x148] sm:$0xff]  }
  0x9f   : > { %5905 = vmatpush3.bf16.msra.mxu0 %v6252_v27  ;;  %5936 = vmatprep.subr.bf16.mxu1 %v6421_v1  ;;  %v5371_v27 = vrot.slane %v7099_v0, 9  ;;  %v5301_v0 = vld.sshfl [vmem:[#allocation2 + $0x14] sm:$0x13 pattern:$0x76325410] }
  0xa0   : > { %5910 = vmatprep.subr.bf16.mxu0 %v6421_v1 }
  0xa2   : > { %5907 = vmatmul.mubr.msk.bf16.vlgmr.msra.gmra.mxu0 %vm523_vm6, %v2257_v28  ;;  %5937 = vmatpush3.bf16.msra.mxu1 %v6255_v30  ;;  %v2833_v28 = vcombine.high %v5321_v36, %v5321_v36  ;;  %v3216_v30 = vrot.slane %v3193_v59, 7  ;;  %v6270_v36 = vld [vmem:[%s7631_s2 + $0x140] sm:$0xff]   ;;  %v2767_v59 = vshll.u32 %v5301_v0, 16 }
  0xa3   : > { %5911 = vmatpush3.bf16.msra.mxu0 %v6254_v26  ;;  %5926 = vmatprep.mubr.msk.bf16.mxu0 %vm6422_vm0, %v6421_v1  ;;  %v3212_v26 = vrot.slane %v3185_v17, 7  ;;  %v2764_v17 = vshrl.u32 %v5301_v0, 16 }
  0xa4   : > { %5912 = vmatprep.subr.bf16.mxu0 %v6421_v1  ;;  %5942 = vmatprep.subr.bf16.mxu1 %v6421_v1  ;;  %v7094_v57 = vshll.u32 %v2833_v28, 16  ;;  %v2899_v28 = vcombine.low %v2847_v44, %v2861_v24  ;;  %v5346_v44 = vld.sshfl [vmem:[#allocation2 + $0x14] sm:$0x12 pattern:$0x76325410]  ;;  %v6290_v24 = vld [vmem:[%s7631_s2 + $0x1d8] sm:$0xff]  }
  0xa5   : > { %5939 = vmatmul.mubr.msk.bf16.vlgmr.msra.gmra.mxu1 %vm523_vm6, %v2495_v37  ;;  %v6351_v37 = vld.sshfl [vmem:[#allocation2 + $0x8] sm:$0xf pattern:$0x76325410]  ;;  %v3213_v47 = vsel %vm6695_vm8, %v5371_v27, %v3212_v26  ;;  %v6287_v26 = vld [vmem:[%s7631_s2 + $0x230] sm:$0xff]  }
  0xa6   : > { %5943 = vmatpush3.bf16.msra.mxu1 %v6259_v38  ;;  %5958 = vmatprep.mubr.msk.bf16.mxu1 %vm6422_vm0, %v6421_v1  ;;  %v2888_v21 = vrot.slane %v7094_v57, 7  ;;  %v6352_v38 = vld.sshfl [vmem:[#allocation2 + $0x10] sm:$0xf pattern:$0x76325410]  ;;  %v2907_v49 = vrot.slane %v2899_v28, %v6620_v2 }
  0xa7   : > { %5913 = vmatpush3.bf16.msra.mxu0 %v6256_v60  ;;  %5944 = vmatprep.subr.bf16.mxu1 %v6421_v1  ;;  %v6269_v60 = vld [vmem:[%s7631_s2 + $0x190] sm:$0xff]   ;;  %v2584_v15 = vcombine.low %v6351_v37, %v6352_v38  ;;  %v5299_v57 = vld.sshfl [vmem:[#allocation2 + $0xc] sm:$0x13 pattern:$0x76325410] }
  0xa8   : > { %5914 = vmatprep.subr.bf16.mxu0 %v6421_v1  ;;  %v2889_v62 = vsel %vm6665_vm2, %v2884_v22, %v2888_v21  ;;  %v2736_v13 = vshrl.u32 %v5299_v57, 16  ;;  %v6286_v21 = vld [vmem:[%s7631_s2 + $0x1e8] sm:$0xff]  }
  0xa9   : > { %v2900_v34 = vcombine.low %v6900_v18, %v2889_v62  ;;  %v3217_v18 = vsel %vm6695_vm8, %v5372_v23, %v3216_v30  ;;  %v2766_v23 = vrot.slane %v2764_v17, 6  ;;  %v2731_v30 = vshll.u32 %v2696_v4, 16 }
  0xaa   : > { %5945 = vmatpush3.bf16.msra.mxu1 %v6261_v46  ;;  %v6280_v46 = vld [vmem:[%s7632_s3 + $0xe0] sm:$0xff]   ;;  %v3235_v51 = vcombine.low %v3213_v47, %v3217_v18  ;;  %v2738_v27 = vrot.slane %v2736_v13, 6  ;;  %v3136_v47 = vcombine.high %v5346_v44, %v5346_v44  ;;  %v6292_v18 = vld [vmem:[%s7631_s2 + $0x1d0] sm:$0xff]  }
  0xab   : > { %5915 = vmatpush3.bf16.msra.mxu0 %v6260_v39  ;;  %5946 = vmatprep.subr.bf16.mxu1 %v6421_v1  ;;  %v6271_v39 = vld [vmem:[%s7631_s2 + $0x188] sm:$0xff]   ;;  %v2914_v50 = vrot.slane %v2900_v34, %v6620_v2 }
  0xac   : > { %5916 = vmatprep.subr.bf16.mxu0 %v6421_v1 }
  0xad   : > { %v2915_v54 = vcombine.low %v2907_v49, %v2914_v50 }
  0xae   : > { %5947 = vmatpush3.bf16.msra.mxu1 %v6263_v53  ;;  %v6281_v53 = vld [vmem:[%s7632_s3 + $0x108] sm:$0xff]  }
  0xaf   : > { %5917 = vmatpush3.bf16.msra.mxu0 %v6262_v48  ;;  %5948 = vmatprep.subr.bf16.mxu1 %v6421_v1  ;;  %v3225_v48 = vsel %vm6695_vm8, %v5374_v31, %v3224_v32  ;;  %v6288_v32 = vld [vmem:[%s7631_s2 + $0x1e0] sm:$0xff]  }
  0xb0   : > { %5918 = vmatprep.subr.bf16.mxu0 %v6421_v1  ;;  %v3236_v52 = vcombine.low %v6931_v35, %v3225_v48 }
  0xb2   : > { %5949 = vmatpush3.bf16.msra.mxu1 %v6265_v16  ;;  %v3250_v35 = vrot.slane %v3236_v52, %v6620_v2  ;;  %v2739_v16 = vshll.u32 %v5299_v57, 16 }
  0xb3   : > { %5919 = vmatpush3.bf16.msra.mxu0 %v6264_v63  ;;  %5950 = vmatprep.subr.bf16.mxu1 %v6421_v1  ;;  %v3243_v63 = vrot.slane %v3235_v51, %v6620_v2 }
  0xb4   : > { %5920 = vmatprep.subr.bf16.mxu0 %v6421_v1  ;;  %v2741_v22 = vrot.slane %v2739_v16, 7  ;;  %v6296_v16 = vld [vmem:[%s7631_s2 + $0x1c0] sm:$0xff]  }
  0xb5   : > { %v3251_v61 = vcombine.low %v3243_v63, %v3250_v35 }
  0xb6   : > { %5951 = vmatpush3.bf16.msra.mxu1 %v6267_v9  ;;  %v2720_v9 = vcombine.high %v5301_v0, %v5301_v0  ;;  %v6294_v0 = vld [vmem:[%s7631_s2 + $0x1c8] sm:$0xff]  }
  0xb7   : > { %5921 = vmatpush3.bf16.msra.mxu0 %v6266_v8  ;;  %5952 = vmatprep.subr.bf16.mxu1 %v6421_v1  ;;  %v2704_v8 = vcombine.high %v5299_v57, %v5299_v57  ;;  %v3151_v57 = vrot.slane %v3136_v47, 7 }
  0xb8   : > { %5922 = vmatprep.subr.bf16.mxu0 %v6421_v1  ;;  %v2773_v38 = vshll.u32 %v2720_v9, 16 }
  0xb9   : > { %v2745_v31 = vshll.u32 %v2704_v8, 16 }
  0xba   : > { %5953 = vmatpush3.bf16.msra.mxu1 %v6269_v60  ;;  %v2728_v60 = vor.u32 %v2727_v20, %v2724_v19  ;;  %v2775_v28 = vrot.slane %v2773_v38, 7 }
  0xbb   : > { %5923 = vmatpush3.bf16.msra.mxu0 %v6268_v25  ;;  %5954 = vmatprep.subr.bf16.mxu1 %v6421_v1  ;;  %v2769_v25 = vrot.slane %v2767_v59, 7 }
  0xbc   : > { %5924 = vmatprep.subr.bf16.mxu0 %v6421_v1  ;;  %v2729_v62 = vrot.slane %v2728_v60, 2 }
  0xbd   : > { %v2770_v37 = vor.u32 %v2769_v25, %v2766_v23 }
  0xbe   : > { %5955 = vmatpush3.bf16.msra.mxu1 %v6271_v39  ;;  %v5343_v39 = vld.sshfl [vmem:[#allocation2 + $0x8] sm:$0x12 pattern:$0x76325410] }
  0xbf   : > { %5925 = vmatpush3.bf16.msra.mxu0 %v6270_v36  ;;  %5956 = vmatprep.subr.bf16.mxu1 %v6421_v1  ;;  %v2742_v36 = vor.u32 %v2741_v22, %v2738_v27  ;;  %v3112_v34 = vcombine.high %v5343_v39, %v5343_v39  ;;  %v5347_v51 = vrot.slane %v5343_v39, 9 }
  0xc0   : > { %5962 = vmatprep.subr.bf16.mxu0 %v6421_v1 }
  0xc1   : > { %v3139_v52 = vrot.slane %v3112_v34, 7 }
  0xc2   : > { %5927 = vmatmul.mubr.bf16.vlgmr.msra.gmra.mxu0 %v2342_v5  ;;  %5957 = vmatpush3.bf16.msra.mxu1 %v6273_v40  ;;  %v6278_v5 = vld [vmem:[%s7632_s3 + $0xe8] sm:$0xff]  }
  0xc3   : > { %5963 = vmatpush3.bf16.msra.mxu0 %v6272_v33  ;;  %5970 = vmatprep.mubr.msk.bf16.mxu0 %vm6422_vm0, %v6421_v1  ;;  %v6289_v33 = vld [vmem:[%s7631_s2 + $0x228] sm:$0xff]   ;;  %v3140_v10 = vsel %vm6695_vm8, %v5347_v51, %v3139_v52 }
  0xc4   : > { %5964 = vmatprep.subr.bf16.mxu0 %v6421_v1  ;;  %5994 = vmatprep.subr.bf16.mxu1 %v6421_v1  ;;  %v5344_v40 = vld.sshfl [vmem:[#allocation2 + $0xc] sm:$0x12 pattern:$0x76325410] }
  0xc5   : > { %5959 = vmatmul.mubr.bf16.vlgmr.msra.gmra.mxu1 %v2584_v15  ;;  %v2743_v15 = vrot.slane %v2742_v36, 2 }
  0xc6   : > { %5995 = vmatpush3.bf16.msra.mxu1 %v6277_v43  ;;  %6002 = vmatprep.mubr.msk.bf16.mxu1 %vm6422_vm0, %v6421_v1  ;;  %v2747_v43 = vrot.slane %v2745_v31, 7 }
  0xc7   : > { %5965 = vmatpush3.bf16.msra.mxu0 %v6276_v41  ;;  %5996 = vmatprep.subr.bf16.mxu1 %v6421_v1  ;;  %v2733_v41 = vrot.slane %v2731_v30, 7 }
  0xc8   : > { %5966 = vmatprep.subr.bf16.mxu0 %v6421_v1  ;;  %v2748_v49 = vsel %vm6665_vm2, %v2743_v15, %v2747_v43 }
  0xc9   : > { %v2734_v48 = vsel %vm6665_vm2, %v2729_v62, %v2733_v41 }
  0xca   : > { %5997 = vmatpush3.bf16.msra.mxu1 %v6279_v45  ;;  %v6291_v45 = vld [vmem:[%s7631_s2 + $0x220] sm:$0xff]   ;;  %v2984_v63 = vcombine.low %v2734_v48, %v2748_v49 }
  0xcb   : > { %5967 = vmatpush3.bf16.msra.mxu0 %v6278_v5  ;;  %5998 = vmatprep.subr.bf16.mxu1 %v6421_v1  ;;  %v2771_v5 = vrot.slane %v2770_v37, 2 }
  0xcc   : > { %5968 = vmatprep.subr.bf16.mxu0 %v6421_v1 }
  0xcd   : > { %v2776_v50 = vsel %vm6665_vm2, %v2771_v5, %v2775_v28 }
  0xce   : > { %5999 = vmatpush3.bf16.msra.mxu1 %v6281_v53  ;;  %v6293_v53 = vld [vmem:[%s7631_s2 + $0x218] sm:$0xff]   ;;  %v2985_v35 = vcombine.low %v6980_v58, %v2776_v50 }
  0xcf   : > { %5969 = vmatpush3.bf16.msra.mxu0 %v6280_v46  ;;  %6000 = vmatprep.subr.bf16.mxu1 %v6421_v1  ;;  %v3120_v46 = vcombine.high %v5344_v40, %v5344_v40 }
  0xd0   : > { %5974 = vmatprep.subr.bf16.mxu0 %v6421_v1  ;;  %v2999_v13 = vrot.slane %v2985_v35, %v6620_v2 }
  0xd1   : > { %v3143_v55 = vrot.slane %v3120_v46, 7 }
  0xd2   : > { %5971 = vmatmul.mubr.msk.bf16.vlgmr.msra.gmra.mxu0 %vm523_vm6, %v2915_v54  ;;  %6001 = vmatpush3.bf16.msra.mxu1 %v6283_v6  ;;  %v5348_v54 = vrot.slane %v5344_v40, 9  ;;  %v6295_v6 = vld [vmem:[%s7631_s2 + $0x210] sm:$0xff]  }
  0xd3   : > { %5975 = vmatpush3.bf16.msra.mxu0 %v6282_v56  ;;  %5990 = vmatprep.mubr.msk.bf16.mxu0 %vm6422_vm0, %v6421_v1  ;;  %v5350_v56 = vrot.slane %v5346_v44, 9 }
  0xd4   : > { %5976 = vmatprep.subr.bf16.mxu0 %v6421_v1  ;;  %6006 = vmatprep.subr.bf16.mxu1 %v6421_v1  ;;  %v3144_v11 = vsel %vm6695_vm8, %v5348_v54, %v3143_v55 }
  0xd5   : > { %6003 = vmatmul.mubr.msk.bf16.vlgmr.msra.gmra.mxu1 %vm523_vm6, %v3251_v61  ;;  %v3152_v58 = vsel %vm6695_vm8, %v5350_v56, %v3151_v57  ;;  %v3320_v17 = vcombine.low %v3140_v10, %v3144_v11  ;;  %v6297_v61 = vld [vmem:[%s7631_s2 + $0x208] sm:$0xff]  }
  0xd6   : > { %6007 = vmatpush3.bf16.msra.mxu1 %v6285_v3  ;;  %6022 = vmatprep.mubr.msk.bf16.mxu1 %vm6422_vm0, %v6421_v1  ;;  %v3321_v59 = vcombine.low %v6996_v14, %v3152_v58  ;;  %v6298_v14 = vld [vmem:[%s7631_s2 + $0x200] sm:$0xff]  }
  0xd7   : > { %5977 = vmatpush3.bf16.msra.mxu0 %v6284_v12  ;;  %6008 = vmatprep.subr.bf16.mxu1 %v6421_v1  ;;  %v2992_v12 = vrot.slane %v2984_v63, %v6620_v2  ;;  %v3328_v9 = vrot.slane %v3320_v17, %v6620_v2 }
  0xd8   : > { %5978 = vmatprep.subr.bf16.mxu0 %v6421_v1  ;;  %v3335_v19 = vrot.slane %v3321_v59, %v6620_v2  ;;  %v6299_v59 = vld [vmem:[%s7633_s4 + $0x18] sm:$0xff]  }
  0xd9   : > { %v3000_v3 = vcombine.low %v2992_v12, %v2999_v13 }
  0xda   : > { %6009 = vmatpush3.bf16.msra.mxu1 %v6287_v26  ;;  %v3336_v27 = vcombine.low %v3328_v9, %v3335_v19 }
  0xdb   : > { %5979 = vmatpush3.bf16.msra.mxu0 %v6286_v21  ;;  %6010 = vmatprep.subr.bf16.mxu1 %v6421_v1 }
  0xdc   : > { %5980 = vmatprep.subr.bf16.mxu0 %v6421_v1 }
  0xde   : > { %6011 = vmatpush3.bf16.msra.mxu1 %v6289_v33 }
  0xdf   : > { %5981 = vmatpush3.bf16.msra.mxu0 %v6288_v32  ;;  %6012 = vmatprep.subr.bf16.mxu1 %v6421_v1 }
  0xe0   : > { %5982 = vmatprep.subr.bf16.mxu0 %v6421_v1 }
  0xe2   : > { %6013 = vmatpush3.bf16.msra.mxu1 %v6291_v45 }
  0xe3   : > { %5983 = vmatpush3.bf16.msra.mxu0 %v6290_v24  ;;  %6014 = vmatprep.subr.bf16.mxu1 %v6421_v1 }
  0xe4   : > { %5984 = vmatprep.subr.bf16.mxu0 %v6421_v1 }
  0xe6   : > { %6015 = vmatpush3.bf16.msra.mxu1 %v6293_v53 }
  0xe7   : > { %5985 = vmatpush3.bf16.msra.mxu0 %v6292_v18  ;;  %6016 = vmatprep.subr.bf16.mxu1 %v6421_v1 }
  0xe8   : > { %5986 = vmatprep.subr.bf16.mxu0 %v6421_v1 }
  0xea   : > { %6017 = vmatpush3.bf16.msra.mxu1 %v6295_v6 }
  0xeb   : > { %5987 = vmatpush3.bf16.msra.mxu0 %v6294_v0  ;;  %6018 = vmatprep.subr.bf16.mxu1 %v6421_v1 }
  0xec   : > { %5988 = vmatprep.subr.bf16.mxu0 %v6421_v1 }
  0xee   : > { %v561_v4 = vpop.f32.mrf.mxu0  ;;  %6019 = vmatpush3.bf16.msra.mxu1 %v6297_v61 }
  0xef   : > { %5989 = vmatpush3.bf16.msra.mxu0 %v6296_v16  ;;  %6020 = vmatprep.subr.bf16.mxu1 %v6421_v1 }
  0xf0   : > { %v5748_v8 = vpop.f32.mrf.mxu0  ;;  %6026 = vmatprep.subr.bf16.mxu0 %v6421_v1 }
  0xf2   : > { %5991 = vmatmul.mubr.bf16.vlgmr.msra.gmra.mxu0 %v3000_v3  ;;  %v564_v20 = vpop.f32.mrf.mxu0  ;;  %6021 = vmatpush3.bf16.msra.mxu1 %v6298_v14  ;;  %v6300_v14 = vld [vmem:[%s7633_s4 + $0x10] sm:$0xff]  }
  0xf3   : > { %6034 = vmatprep.mubr.msk.bf16.mxu0 %vm6422_vm0, %v6421_v1  ;;  %6050 = vmatprep.subr.bf16.mxu1 %v6421_v1 }
  0xf4   : > { %v5749_v22 = vpop.f32.mrf.mxu0  ;;  %6027 = vmatpush3.bf16.msra.mxu0 %v6299_v59 }
  0xf5   : > { %v672_v21 = vpop.f32.mrf.mxu1  ;;  %6023 = vmatmul.mubr.bf16.vlgmr.msra.gmra.mxu1 %v3336_v27  ;;  %6028 = vmatprep.subr.bf16.mxu0 %v6421_v1  ;;  %v6302_v27 = vld [vmem:[%s7633_s4 + $0x8] sm:$0xff]  }
  0xf6   : > { %v673_v23 = vadd.f32 %v672_v21, %v561_v4  ;;  %6058 = vmatprep.mubr.msk.bf16.mxu1 %vm6422_vm0, %v6421_v1  ;;  %v6301_v21 = vld [vmem:[%s7633_s4 + $0x58] sm:$0xff]  }
  0xf7   : > { %v5768_v25 = vpop.f32.mrf.mxu1  ;;  %6051 = vmatpush3.bf16.msra.mxu1 %v6301_v21 }
  0xf8   : > { %679 = vst.msk [vmem:[#allocation5] sm:$0xff] %vm523_vm6, %v673_v23  ;;  %6029 = vmatpush3.bf16.msra.mxu0 %v6300_v14  ;;  %6052 = vmatprep.subr.bf16.mxu1 %v6421_v1 }
  0xf9   : > { %v675_v26 = vpop.f32.mrf.mxu1  ;;  %6030 = vmatprep.subr.bf16.mxu0 %v6421_v1 }
  0xfa   : > { %v676_v30 = vadd.f32 %v675_v26, %v564_v20  ;;  %v6303_v26 = vld [vmem:[%s7633_s4 + $0x50] sm:$0xff]  }
  0xfb   : > { %v5769_v31 = vpop.f32.mrf.mxu1  ;;  %6053 = vmatpush3.bf16.msra.mxu1 %v6303_v26 }
  0xfc   : > { %680 = vst.msk [vmem:[#allocation5 + $0x8] sm:$0xff] %vm523_vm6, %v676_v30  ;;  %6031 = vmatpush3.bf16.msra.mxu0 %v6302_v27  ;;  %v6304_v31 = vld [vmem:[%s7633_s4] sm:$0xff]   ;;  %6054 = vmatprep.subr.bf16.mxu1 %v6421_v1 }
  0xfd   : > { %6032 = vmatprep.subr.bf16.mxu0 %v6421_v1 }
  0xff   : > { %v1098_v44 = vld [vmem:[#allocation5] sm:$0xff] }
 0x100   : > { %6033 = vmatpush3.bf16.msra.mxu0 %v6304_v31 }
 0x101   : > { %6038 = vmatprep.subr.bf16.mxu0 %v6421_v1 }
 0x102   : > { %v984_v32 = vpop.f32.mrf.mxu0 }
 0x103   : > { %v1099_v45 = vld [vmem:[#allocation5 + $0x8] sm:$0xff] }
 0x104   : > { %v5780_v60 = vpop.f32.mrf.mxu0 }
 0x105   : > { %v1327_v36 = vpop.f32.mrf.mxu1 }
 0x106   : > { %v987_v37 = vpop.f32.mrf.mxu0 }
 0x107   : > { %v5812_v38 = vpop.f32.mrf.mxu1 }
 0x108   : > { %v5781_v39 = vpop.f32.mrf.mxu0 }
 0x109   : > { %v1330_v33 = vpop.f32.mrf.mxu1 }
 0x10b   : > { %v5813_v40 = vpop.f32.mrf.mxu1 }
 0x122   : > { %v1091_v41 = vpop.f32.mrf.mxu0 }
 0x123   : > { %v1092_v43 = vadd.f32 %v1091_v41, %v984_v32 }
 0x124   : > { %v5800_v24 = vpop.f32.mrf.mxu0 }
 0x125   : > { %v1434_v62 = vpop.f32.mrf.mxu1  ;;  %v1100_v15 = vadd.f32 %v1098_v44, %v1092_v43  ;;  %v6309_v43 = vld [vmem:[%s7633_s4 + $0x40] sm:$0xff]  }
 0x126   : > { %v1094_v5 = vpop.f32.mrf.mxu0  ;;  %v1435_v49 = vadd.f32 %v1434_v62, %v1327_v36 }
 0x127   : > { %v5832_v28 = vpop.f32.mrf.mxu1  ;;  %1102 = vst.msk [vmem:[#allocation5] sm:$0xff] %vm523_vm6, %v1100_v15  ;;  %v1095_v34 = vadd.f32 %v1094_v5, %v987_v37  ;;  %v6305_v37 = vld [vmem:[%s7633_s4 + $0x48] sm:$0xff]  }
 0x128   : > { %v5801_v46 = vpop.f32.mrf.mxu0  ;;  %6055 = vmatpush3.bf16.msra.mxu1 %v6305_v37 }
 0x129   : > { %v1437_v47 = vpop.f32.mrf.mxu1  ;;  %v1101_v18 = vadd.f32 %v1099_v45, %v1095_v34  ;;  %6056 = vmatprep.subr.bf16.mxu1 %v6421_v1 }
 0x12a   : > { %v1438_v52 = vadd.f32 %v1437_v47, %v1330_v33 }
 0x12b   : > { %v5833_v48 = vpop.f32.mrf.mxu1  ;;  %1103 = vst.msk [vmem:[#allocation5 + $0x8] sm:$0xff] %vm523_vm6, %v1101_v18 }
 0x12c   : > { %6057 = vmatpush3.bf16.msra.mxu1 %v6309_v43 }
 0x12d   : > { %6074 = vmatprep.subr.bf16.mxu1 %v6421_v1 }
 0x12e   : > { %v1441_v50 = vld [vmem:[#allocation5] sm:$0xff] }
 0x12f   : > { %v1443_v51 = vadd.f32 %v1441_v50, %v1435_v49 }
 0x131   : > { %1445 = vst.msk [vmem:[#allocation5] sm:$0xff] %vm523_vm6, %v1443_v51 }
 0x132   : > { %v1442_v53 = vld [vmem:[#allocation5 + $0x8] sm:$0xff]  ;;  %v1563_v54 = vpop.f32.mrf.mxu0 }
 0x133   : > { %v1444_v55 = vadd.f32 %v1442_v53, %v1438_v52 }
 0x134   : > { %v5844_v56 = vpop.f32.mrf.mxu0 }
 0x135   : > { %1446 = vst.msk [vmem:[#allocation5 + $0x8] sm:$0xff] %vm523_vm6, %v1444_v55  ;;  %v1983_v63 = vpop.f32.mrf.mxu1 }
 0x136   : > { %v1566_v57 = vpop.f32.mrf.mxu0 }
 0x137   : > { %v5876_v0 = vpop.f32.mrf.mxu1 }
 0x138   : > { %v5845_v35 = vpop.f32.mrf.mxu0  ;;  %v1681_v12 = vld [vmem:[#allocation5] sm:$0xff] }
 0x139   : > { %v1986_v6 = vpop.f32.mrf.mxu1 }
 0x13b   : > { %v5877_v10 = vpop.f32.mrf.mxu1 }
 0x13c   : > { %v1682_v3 = vld [vmem:[#allocation5 + $0x8] sm:$0xff] }
 0x152   : > { %v1674_v11 = vpop.f32.mrf.mxu0 }
 0x153   : > { %v1675_v58 = vadd.f32 %v1674_v11, %v1563_v54 }
 0x154   : > { %v5864_v13 = vpop.f32.mrf.mxu0 }
 0x155   : > { %v1683_v16 = vadd.f32 %v1681_v12, %v1675_v58  ;;  %v2090_v4 = vpop.f32.mrf.mxu1 }
 0x156   : > { %v1677_v17 = vpop.f32.mrf.mxu0  ;;  %v2091_v22 = vadd.f32 %v2090_v4, %v1983_v63 }
 0x157   : > { %1685 = vst.msk [vmem:[#allocation5] sm:$0xff] %vm523_vm6, %v1683_v16  ;;  %v1678_v61 = vadd.f32 %v1677_v17, %v1566_v57  ;;  %v5896_v19 = vpop.f32.mrf.mxu1 }
 0x158   : > { %v5865_v8 = vpop.f32.mrf.mxu0 }
 0x159   : > { %v1684_v9 = vadd.f32 %v1682_v3, %v1678_v61  ;;  %v2093_v20 = vpop.f32.mrf.mxu1 }
 0x15a   : > { %v2094_v32 = vadd.f32 %v2093_v20, %v1986_v6 }
 0x15b   : > { %1686 = vst.msk [vmem:[#allocation5 + $0x8] sm:$0xff] %vm523_vm6, %v1684_v9  ;;  %v5897_v25 = vpop.f32.mrf.mxu1 }
 0x15e   : > { %v2097_v23 = vld [vmem:[#allocation5] sm:$0xff] }
 0x15f   : > { %v2099_v30 = vadd.f32 %v2097_v23, %v2091_v22 }
 0x161   : > { %2101 = vst.msk [vmem:[#allocation5] sm:$0xff] %vm523_vm6, %v2099_v30 }
 0x162   : > { %v2098_v60 = vld [vmem:[#allocation5 + $0x8] sm:$0xff]  ;;  %v2319_v36 = vpop.f32.mrf.mxu0 }
 0x163   : > { %v2100_v38 = vadd.f32 %v2098_v60, %v2094_v32 }
 0x164   : > { %v5908_v39 = vpop.f32.mrf.mxu0 }
 0x165   : > { %2102 = vst.msk [vmem:[#allocation5 + $0x8] sm:$0xff] %vm523_vm6, %v2100_v38  ;;  %v2557_v40 = vpop.f32.mrf.mxu1 }
 0x166   : > { %v2322_v33 = vpop.f32.mrf.mxu0 }
 0x167   : > { %v5940_v44 = vpop.f32.mrf.mxu1 }
 0x168   : > { %v5909_v41 = vpop.f32.mrf.mxu0  ;;  %v2433_v28 = vld [vmem:[#allocation5] sm:$0xff]  ;;  %v5406_v44 = vld.sshfl [vmem:[#allocation4] sm:$0x13 pattern:$0x76325410] }
 0x169   : > { %v2560_v24 = vpop.f32.mrf.mxu1 }
 0x16b   : > { %v5941_v62 = vpop.f32.mrf.mxu1 }
 0x16c   : > { %v2434_v18 = vld [vmem:[#allocation5 + $0x8] sm:$0xff] }
 0x182   : > { %v2426_v15 = vpop.f32.mrf.mxu0 }
 0x183   : > { %v2427_v5 = vadd.f32 %v2426_v15, %v2319_v36  ;;  %v5396_v36 = vld [vmem:[%s7634_s5] ss:$0 sm:$0xff] }
 0x184   : > { %v5928_v34 = vpop.f32.mrf.mxu0 }
 0x185   : > { %v2435_v45 = vadd.f32 %v2433_v28, %v2427_v5  ;;  %v2668_v48 = vpop.f32.mrf.mxu1  ;;  %v3663_v5 = vshrl.u32 %v5406_v44, 16  ;;  %v3666_v28 = vshll.u32 %v5406_v44, 16 }
 0x186   : > { %v2429_v46 = vpop.f32.mrf.mxu0  ;;  %v2669_v53 = vadd.f32 %v2668_v48, %v2557_v40  ;;  %v3507_v48 = vld [vmem:[#allocation4 + $0x4] sm:$0x7] }
 0x187   : > { %2437 = vst.msk [vmem:[#allocation5] sm:$0xff] %vm523_vm6, %v2435_v45  ;;  %v2430_v47 = vadd.f32 %v2429_v46, %v2322_v33  ;;  %v5960_v51 = vpop.f32.mrf.mxu1 }
 0x188   : > { %v5929_v49 = vpop.f32.mrf.mxu0 }
 0x189   : > { %v2436_v50 = vadd.f32 %v2434_v18, %v2430_v47  ;;  %v2671_v52 = vpop.f32.mrf.mxu1 }
 0x18a   : > { %v2672_v57 = vadd.f32 %v2671_v52, %v2560_v24 }
 0x18b   : > { %2438 = vst.msk [vmem:[#allocation5 + $0x8] sm:$0xff] %vm523_vm6, %v2436_v50  ;;  %v5961_v55 = vpop.f32.mrf.mxu1 }
 0x18c   : > { %v3637_v55 = vcombine.high %v5406_v44, %v5406_v44 }
 0x18e   : > { %v2675_v54 = vld [vmem:[#allocation5] sm:$0xff] }
 0x18f   : > { %v2677_v56 = vadd.f32 %v2675_v54, %v2669_v53  ;;  %v3510_v54 = vld [vmem:[#allocation4 + $0x8] sm:$0x7] }
 0x191   : > { %2679 = vst.msk [vmem:[#allocation5] sm:$0xff] %vm523_vm6, %v2677_v56  ;;  %v3665_v56 = vrot.slane %v3663_v5, 6 }
 0x192   : > { %v2676_v63 = vld [vmem:[#allocation5 + $0x8] sm:$0xff]  ;;  %v2977_v35 = vpop.f32.mrf.mxu0 }
 0x193   : > { %v2678_v0 = vadd.f32 %v2676_v63, %v2672_v57 }
 0x194   : > { %v5972_v6 = vpop.f32.mrf.mxu0 }
 0x195   : > { %2680 = vst.msk [vmem:[#allocation5 + $0x8] sm:$0xff] %vm523_vm6, %v2678_v0  ;;  %v3313_v11 = vpop.f32.mrf.mxu1  ;;  %v5423_v0 = vld.sshfl [vmem:[#allocation4] sm:$0x12 pattern:$0x76325410]  ;;  %v3668_v6 = vrot.slane %v3666_v28, 7 }
 0x196   : > { %v2980_v10 = vpop.f32.mrf.mxu0 }
 0x197   : > { %v6004_v12 = vpop.f32.mrf.mxu1 }
 0x198   : > { %v5973_v58 = vpop.f32.mrf.mxu0  ;;  %v3091_v61 = vld [vmem:[#allocation5] sm:$0xff] }
 0x199   : > { %v3316_v13 = vpop.f32.mrf.mxu1 }
 0x19b   : > { %v6005_v16 = vpop.f32.mrf.mxu1 }
 0x19c   : > { %v3092_v19 = vld [vmem:[#allocation5 + $0x8] sm:$0xff]  ;;  %v3513_v16 = vld [vmem:[#allocation4 + $0xc] sm:$0x7] }
 0x1b2   : > { %v3084_v17 = vpop.f32.mrf.mxu0 }
 0x1b3   : > { %v3085_v59 = vadd.f32 %v3084_v17, %v2977_v35 }
 0x1b4   : > { %v5992_v3 = vpop.f32.mrf.mxu0 }
 0x1b5   : > { %v3093_v4 = vadd.f32 %v3091_v61, %v3085_v59  ;;  %v3420_v14 = vpop.f32.mrf.mxu1  ;;  %v3516_v59 = vld [vmem:[#allocation4 + $0x10] sm:$0x7]  ;;  %v3833_v61 = vcombine.high %v5423_v0, %v5423_v0 }
 0x1b6   : > { %v3087_v8 = vpop.f32.mrf.mxu0  ;;  %v3421_v23 = vadd.f32 %v3420_v14, %v3313_v11  ;;  %v5427_v14 = vrot.slane %v5423_v0, 9 }
 0x1b7   : > { %3095 = vst.msk [vmem:[#allocation5] sm:$0xff] %vm523_vm6, %v3093_v4  ;;  %v3088_v9 = vadd.f32 %v3087_v8, %v2980_v10  ;;  %v6024_v27 = vpop.f32.mrf.mxu1  ;;  %v3669_v4 = vor.u32 %v3668_v6, %v3665_v56  ;;  %v7359_v8 = vshll.u32 %v3637_v55, 16  ;;  %v6310_v6 = vld [vmem:[%s7633_s4 + $0x30] sm:$0xff]  }
 0x1b8   : > { %v5993_v20 = vpop.f32.mrf.mxu0 }
 0x1b9   : > { %v3094_v21 = vadd.f32 %v3092_v19, %v3088_v9  ;;  %v3423_v22 = vpop.f32.mrf.mxu1  ;;  %v3860_v20 = vrot.slane %v3833_v61, 7  ;;  %v3674_v27 = vrot.slane %v7359_v8, 7 }
 0x1ba   : > { %v3424_v31 = vadd.f32 %v3423_v22, %v3316_v13 }
 0x1bb   : > { %3096 = vst.msk [vmem:[#allocation5 + $0x8] sm:$0xff] %vm523_vm6, %v3094_v21  ;;  %v6025_v26 = vpop.f32.mrf.mxu1  ;;  %v3670_v21 = vrot.slane %v3669_v4, 2 }
 0x1be   : > { %v3427_v25 = vld [vmem:[#allocation5] sm:$0xff] }
 0x1bf   : > { %v3429_v30 = vadd.f32 %v3427_v25, %v3421_v23 }
 0x1c1   : > { %3431 = vst.msk [vmem:[#allocation5] sm:$0xff] %vm523_vm6, %v3429_v30 }
 0x1c2   : > { %v3428_v32 = vld [vmem:[#allocation5 + $0x8] sm:$0xff] }
 0x1c3   : > { %v3430_v60 = vadd.f32 %v3428_v32, %v3424_v31 }
 0x1c5   : > { %3432 = vst.msk [vmem:[#allocation5 + $0x8] sm:$0xff] %vm523_vm6, %v3430_v60 }
 0x1c8   : > { %v3433_v37 = vld [vmem:[#allocation5] sm:$0xff] }
 0x1c9   : > { %v3442_v38 = vadd.f32 %v5396_v36, %v3433_v37 }
 0x1cb   : > { %v3444_v39 = vmax.f32 %v3442_v38, 0.0 }
 0x1cc   : > { %v3434_v33 = vld [vmem:[#allocation5 + $0x8] sm:$0xff] }
 0x1cd   : > { %v3454_v40 = vcombine.high %v3444_v39, %v3444_v39  ;;  %v5562_v41 = vpack.c.bf16 %v3444_v39, %v3444_v39  ;;  %v3443_v43 = vadd.f32 %v5396_v36, %v3434_v33 }
 0x1cf   : > { %v5563_v24 = vpack.c.bf16 %v3454_v40, %v3454_v40  ;;  %v3475_v62 = vshrl.u32 %v5562_v41, 16  ;;  %v3445_v15 = vmax.f32 %v3443_v43, 0.0  ;;  %v3478_v45 = vshll.u32 %v5562_v41, 16 }
 0x1d0   : > { %v3861_v43 = vsel %vm6695_vm8, %v5427_v14, %v3860_v20 }
 0x1d1   : > { %v3477_v34 = vrot.slane %v3475_v62, 7  ;;  %v3482_v46 = vshrl.u32 %v5563_v24, 16  ;;  %v3455_v47 = vcombine.high %v3445_v15, %v3445_v15  ;;  %v5564_v18 = vpack.c.bf16 %v3445_v15, %v3445_v15  ;;  %v6308_v62 = vld [vmem:[%s7633_s4 + $0x38] sm:$0xff]  }
 0x1d2   : > { %v3485_v51 = vshll.u32 %v5563_v24, 16 }
 0x1d3   : > { %v3480_v49 = vor.u32 %v3478_v45, %v3477_v34  ;;  %v3484_v50 = vrot.slane %v3482_v46, 7  ;;  %v5565_v52 = vpack.c.bf16 %v3455_v47, %v3455_v47  ;;  %v3489_v53 = vshrl.u32 %v5564_v18, 16 }
 0x1d4   : > { %v3492_v11 = vshll.u32 %v5564_v18, 16 }
 0x1d5   : > { %v3487_v57 = vor.u32 %v3485_v51, %v3484_v50  ;;  %v3496_v63 = vshrl.u32 %v5565_v52, 16  ;;  %v3508_v35 = vsel %vm6592_vm3, %v3480_v49, %v3507_v48  ;;  %v3491_v10 = vrot.slane %v3489_v53, 7 }
 0x1d6   : > { %3509 = vst [vmem:[#allocation4 + $0x4] sm:$0x7] %v3508_v35  ;;  %v3499_v12 = vshll.u32 %v5565_v52, 16 }
 0x1d7   : > { %v3498_v58 = vrot.slane %v3496_v63, 7  ;;  %v3511_v13 = vsel %vm6592_vm3, %v3487_v57, %v3510_v54  ;;  %v3494_v17 = vor.u32 %v3492_v11, %v3491_v10 }
 0x1d8   : > { %3512 = vst [vmem:[#allocation4 + $0x8] sm:$0x7] %v3511_v13 }
 0x1d9   : > { %v3501_v3 = vor.u32 %v3499_v12, %v3498_v58  ;;  %v3514_v9 = vsel %vm6592_vm3, %v3494_v17, %v3513_v16 }
 0x1da   : > { %3515 = vst [vmem:[#allocation4 + $0xc] sm:$0x7] %v3514_v9  ;;  %v6311_v9 = vld [vmem:[%s7633_s4 + $0x98] sm:$0xff]  }
 0x1db   : > { %v3517_v19 = vsel %vm6592_vm3, %v3501_v3, %v3516_v59 }
 0x1dc   : > { %3518 = vst [vmem:[#allocation4 + $0x10] sm:$0x7] %v3517_v19  ;;  %v3675_v19 = vsel %vm6665_vm2, %v3670_v21, %v3674_v27 }
 0x1dd   : > { %v6353_v22 = vld.sshfl [vmem:[#allocation4] sm:$0xf pattern:$0x76325410] }
 0x1de   : > { %v5424_v23 = vld.sshfl [vmem:[#allocation4 + $0x4] sm:$0x12 pattern:$0x76325410] }
 0x1df   : > { %v5425_v25 = vld.sshfl [vmem:[#allocation4 + $0x8] sm:$0x12 pattern:$0x76325410]  ;;  %v3841_v26 = vcombine.high %v5424_v23, %v5424_v23  ;;  %v5428_v31 = vrot.slane %v5424_v23, 9 }
 0x1e0   : > { %v3849_v30 = vcombine.high %v5425_v25, %v5425_v25  ;;  %v5429_v32 = vrot.slane %v5425_v25, 9  ;;  %v5407_v60 = vld.sshfl [vmem:[#allocation4 + $0x4] sm:$0x13 pattern:$0x76325410]  ;;  %v6312_v25 = vld [vmem:[%s7633_s4 + $0x28] sm:$0xff]  }
 0x1e1   : > { %v3864_v36 = vrot.slane %v3841_v26, 7  ;;  %v5408_v37 = vld.sshfl [vmem:[#allocation4 + $0x8] sm:$0x13 pattern:$0x76325410]  ;;  %v3645_v38 = vcombine.high %v5407_v60, %v5407_v60  ;;  %v3677_v29 = vshrl.u32 %v5407_v60, 16 }
 0x1e2   : > { %v6354_v39 = vld.sshfl [vmem:[#allocation4 + $0x8] sm:$0xf pattern:$0x76325410]  ;;  %v3868_v33 = vrot.slane %v3849_v30, 7  ;;  %v3680_v40 = vshll.u32 %v5407_v60, 16  ;;  %v3653_v34 = vcombine.high %v5408_v37, %v5408_v37 }
 0x1e3   : > { %v5426_v41 = vld.sshfl [vmem:[#allocation4 + $0xc] sm:$0x12 pattern:$0x76325410]  ;;  %v3679_v44 = vrot.slane %v3677_v29, 6  ;;  %v3686_v24 = vshll.u32 %v3645_v38, 16  ;;  %v7373_v5 = vsel %vm6695_vm8, %v5428_v31, %v3864_v36  ;;  %v3551_v49 = vcombine.low %v6353_v22, %v6354_v39 }
 0x1e4   : > { %v3857_v15 = vcombine.high %v5426_v41, %v5426_v41  ;;  %v5409_v28 = vld.sshfl [vmem:[#allocation4 + $0xc] sm:$0x13 pattern:$0x76325410]  ;;  %v7377_v45 = vsel %vm6695_vm8, %v5429_v32, %v3868_v33  ;;  %v5430_v46 = vrot.slane %v5426_v41, 9  ;;  %v3682_v18 = vrot.slane %v3680_v40, 7 }
 0x1e5   : > { %v3661_v47 = vcombine.high %v5409_v28, %v5409_v28  ;;  %v5460_v48 = vld.sshfl [vmem:[#allocation4 + $0x10] sm:$0x13 pattern:$0x76325410]  ;;  %v3691_v51 = vshrl.u32 %v5408_v37, 16  ;;  %v3694_v52 = vshll.u32 %v5408_v37, 16  ;;  %v3883_v53 = vcombine.low %v3861_v43, %v7373_v5  ;;  %6035 = vmatmul.mubr.msk.bf16.vlgmr.msra.gmra.mxu0 %vm523_vm6, %v3551_v49 }
 0x1e6   : > { %v3872_v50 = vrot.slane %v3857_v15, 7  ;;  %v3683_v54 = vor.u32 %v3682_v18, %v3679_v44  ;;  %v3688_v55 = vrot.slane %v3686_v24, 7  ;;  %v3705_v56 = vshrl.u32 %v5409_v28, 16  ;;  %6039 = vmatpush3.bf16.msra.mxu0 %v6308_v62  ;;  %6046 = vmatprep.mubr.msk.bf16.mxu0 %vm6422_vm0, %v6421_v1  ;;  %v6313_v36 = vld [vmem:[%s7633_s4 + $0x90] sm:$0xff]   ;;  %v6314_v39 = vld [vmem:[%s7633_s4 + $0x20] sm:$0xff]   ;;  %v6315_v24 = vld [vmem:[%s7633_s4 + $0x88] sm:$0xff]  }
 0x1e7   : > { %v3693_v63 = vrot.slane %v3691_v51, 6  ;;  %v3696_v35 = vrot.slane %v3694_v52, 7  ;;  %v3708_v0 = vshll.u32 %v5409_v28, 16  ;;  %v3700_v58 = vshll.u32 %v3653_v34, 16  ;;  %6040 = vmatprep.subr.bf16.mxu0 %v6421_v1  ;;  %v6316_v15 = vld [vmem:[%s7633_s4 + $0x78] sm:$0xff]   ;;  %v6318_v18 = vld [vmem:[%s7633_s4 + $0x70] sm:$0xff]  }
 0x1e8   : > { %v7383_v57 = vsel %vm6695_vm8, %v5430_v46, %v3872_v50  ;;  %v3684_v11 = vrot.slane %v3683_v54, 2  ;;  %v3707_v12 = vrot.slane %v3705_v56, 6  ;;  %v3714_v17 = vshll.u32 %v3661_v47, 16  ;;  %v6317_v47 = vld [vmem:[%s7633_s4 + $0x80] sm:$0xff]   ;;  %v6319_v50 = vld [vmem:[%s7633_s4 + $0xd8] sm:$0xff]   ;;  %v6320_v52 = vld [vmem:[%s7633_s4 + $0x68] sm:$0xff]  }
 0x1e9   : > { %v3884_v10 = vcombine.low %v7377_v45, %v7383_v57  ;;  %v3697_v13 = vor.u32 %v3696_v35, %v3693_v63  ;;  %v3710_v16 = vrot.slane %v3708_v0, 7  ;;  %v4121_v59 = vcombine.high %v5460_v48, %v5460_v48  ;;  %v6321_v54 = vld [vmem:[%s7633_s4 + $0xd0] sm:$0xff]   ;;  %v5477_v56 = vld.sshfl [vmem:[#allocation4 + $0x10] sm:$0x12 pattern:$0x76325410] }
 0x1ea   : > { %v3891_v61 = vrot.slane %v3883_v53, %v6620_v2  ;;  %v4165_v4 = vshrl.u32 %v5460_v48, 16  ;;  %v4168_v8 = vshll.u32 %v5460_v48, 16  ;;  %v3689_v14 = vsel %vm6665_vm2, %v3684_v11, %v3688_v55  ;;  %6041 = vmatpush3.bf16.msra.mxu0 %v6310_v6  ;;  %v6355_v53 = vld.sshfl [vmem:[#allocation4 + $0xc] sm:$0xf pattern:$0x76325410] }
 0x1eb   : > { %v7395_v3 = vrot.slane %v3884_v10, %v6620_v2  ;;  %v3698_v20 = vrot.slane %v3697_v13, 2  ;;  %v3711_v22 = vor.u32 %v3710_v16, %v3707_v12  ;;  %v4174_v31 = vshll.u32 %v4121_v59, 16  ;;  %6042 = vmatprep.subr.bf16.mxu0 %v6421_v1  ;;  %v6356_v55 = vld.sshfl [vmem:[#allocation4 + $0x4] sm:$0xf pattern:$0x76325410] }
 0x1ec   : > { %v4167_v26 = vrot.slane %v4165_v4, 6  ;;  %v4170_v30 = vrot.slane %v4168_v8, 7  ;;  %v3702_v32 = vrot.slane %v3700_v58, 7  ;;  %v3716_v21 = vrot.slane %v3714_v17, 7  ;;  %v6322_v63 = vld [vmem:[%s7633_s4 + $0x60] sm:$0xff]   ;;  %v6323_v0 = vld [vmem:[%s7633_s4 + $0xc8] sm:$0xff]  }
 0x1ed   : > { %v3899_v23 = vcombine.low %v3891_v61, %v7395_v3  ;;  %v3712_v60 = vrot.slane %v3711_v22, 2  ;;  %v3727_v29 = vcombine.low %v3675_v19, %v3689_v14  ;;  %v4176_v41 = vrot.slane %v4174_v31, 7  ;;  %v6326_v6 = vld [vmem:[%s7633_s4 + $0xb8] sm:$0xff]   ;;  %v6327_v16 = vld [vmem:[%s7633_s4 + $0xc0] sm:$0xff]   ;;  %v6328_v59 = vld [vmem:[%s7633_s4 + $0xb0] sm:$0xff]  }
 0x1ee   : > { %v4171_v27 = vor.u32 %v4170_v30, %v4167_v26  ;;  %v3703_v37 = vsel %vm6665_vm2, %v3698_v20, %v3702_v32  ;;  %6043 = vmatpush3.bf16.msra.mxu0 %v6312_v25  ;;  %v4317_v35 = vcombine.high %v5477_v56, %v5477_v56  ;;  %v6357_v10 = vld.sshfl [vmem:[#allocation4 + $0x10] sm:$0xf pattern:$0x76325410]  ;;  %v4007_v11 = vcombine.low %v6356_v55, %v6355_v53  ;;  %v6332_v22 = vld [vmem:[%s7633_s4 + $0xa8] sm:$0xff]  }
 0x1ef   : > { %6059 = vmatmul.mubr.msk.bf16.vlgmr.msra.gmra.mxu1 %vm523_vm6, %v3899_v23  ;;  %v3717_v38 = vsel %vm6665_vm2, %v3712_v60, %v3716_v21  ;;  %6044 = vmatprep.subr.bf16.mxu0 %v6421_v1  ;;  %v3735_v62 = vrot.slane %v3727_v29, %v6620_v2  ;;  %v4187_v46 = vcombine.low %v3689_v14, %v3703_v37  ;;  %v5528_v58 = vld.sshfl [vmem:[#allocation4 + $0x14] sm:$0x12 pattern:$0x76325410]  ;;  %v5481_v61 = vrot.slane %v5477_v56, 9  ;;  %v6331_v14 = vld [vmem:[%s7633_s4 + $0x118] sm:$0xff]  }
 0x1f0   : > { %6075 = vmatpush3.bf16.msra.mxu1 %v6311_v9  ;;  %6082 = vmatprep.mubr.msk.bf16.mxu1 %vm6422_vm0, %v6421_v1  ;;  %v3728_v33 = vcombine.low %v3703_v37, %v3717_v38  ;;  %v4172_v40 = vrot.slane %v4171_v27, 2  ;;  %v6358_v12 = vld.sshfl [vmem:[#allocation4 + $0x8] sm:$0xf pattern:$0x76325410]  ;;  %v4332_v13 = vrot.slane %v4317_v35, 7  ;;  %v4778_v4 = vcombine.high %v5528_v58, %v5528_v58 }
 0x1f1   : > { %6076 = vmatprep.subr.bf16.mxu1 %v6421_v1  ;;  %v4195_v49 = vrot.slane %v4187_v46, %v6620_v2  ;;  %v5511_v17 = vld.sshfl [vmem:[#allocation4 + $0x14] sm:$0x13 pattern:$0x76325410]  ;;  %v4468_v20 = vcombine.low %v6358_v12, %v6357_v10  ;;  %v5532_v25 = vrot.slane %v5528_v58, 9  ;;  %v6333_v60 = vld [vmem:[%s7633_s4 + $0x110] sm:$0xff]   ;;  %v4343_v21 = vcombine.low %v7373_v5, %v7377_v45 }
 0x1f2   : > { %v7425_v43 = vrot.slane %v3728_v33, %v6620_v2  ;;  %v7429_v44 = vsel %vm6665_vm2, %v4172_v40, %v4176_v41  ;;  %6045 = vmatpush3.bf16.msra.mxu0 %v6314_v39  ;;  %v4333_v8 = vsel %vm6695_vm8, %v5481_v61, %v4332_v13  ;;  %v4626_v9 = vshrl.u32 %v5511_v17, 16  ;;  %v6335_v5 = vld [vmem:[%s7633_s4 + $0x108] sm:$0xff]   ;;  %v6336_v29 = vld [vmem:[%s7633_s4 + $0xf8] sm:$0xff]   ;;  %v6337_v41 = vld [vmem:[%s7633_s4 + $0x100] sm:$0xff]  }
 0x1f3   : > { %v4188_v28 = vcombine.low %v3717_v38, %v7429_v44  ;;  %6062 = vmatprep.subr.bf16.mxu0 %v6421_v1  ;;  %v4629_v19 = vshll.u32 %v5511_v17, 16  ;;  %v4344_v23 = vcombine.low %v7383_v57, %v4333_v8  ;;  %v4793_v26 = vrot.slane %v4778_v4, 7  ;;  %v6334_v57 = vld [vmem:[%s7633_s4 + $0xa0] sm:$0xff]  }
 0x1f4   : > { %6077 = vmatpush3.bf16.msra.mxu1 %v6313_v36  ;;  %v3743_v34 = vcombine.low %v3735_v62, %v7425_v43  ;;  %v4582_v30 = vcombine.high %v5511_v17, %v5511_v17  ;;  %v4628_v31 = vrot.slane %v4626_v9, 6  ;;  %v4351_v45 = vrot.slane %v4343_v21, %v6620_v2 }
 0x1f5   : > { %6078 = vmatprep.subr.bf16.mxu1 %v6421_v1  ;;  %v4202_v48 = vrot.slane %v4188_v28, %v6620_v2  ;;  %v4631_v32 = vrot.slane %v4629_v19, 7  ;;  %v4358_v27 = vrot.slane %v4344_v23, %v6620_v2  ;;  %v4794_v36 = vsel %vm6695_vm8, %v5532_v25, %v4793_v26 }
 0x1f6   : > { %6047 = vmatmul.mubr.msk.bf16.vlgmr.msra.gmra.mxu0 %vm523_vm6, %v3743_v34  ;;  %v4635_v38 = vshll.u32 %v4582_v30, 16  ;;  %v4805_v39 = vcombine.low %v4333_v8, %v4794_v36  ;;  %v6339_v34 = vld [vmem:[%s7633_s4 + $0xe8] sm:$0xff]  }
 0x1f7   : > { %6063 = vmatpush3.bf16.msra.mxu0 %v6316_v15  ;;  %6070 = vmatprep.mubr.msk.bf16.mxu0 %vm6422_vm0, %v6421_v1  ;;  %v4203_v51 = vcombine.low %v4195_v49, %v4202_v48  ;;  %v4632_v37 = vor.u32 %v4631_v32, %v4628_v31  ;;  %v4359_v33 = vcombine.low %v4351_v45, %v4358_v27 }
 0x1f8   : > { %6079 = vmatpush3.bf16.msra.mxu1 %v6315_v24  ;;  %6064 = vmatprep.subr.bf16.mxu0 %v6421_v1  ;;  %v4637_v40 = vrot.slane %v4635_v38, 7  ;;  %v6338_v24 = vld [vmem:[%s7633_s4 + $0xf0] sm:$0xff]   ;;  %v4819_v62 = vrot.slane %v4805_v39, %v6620_v2 }
 0x1f9   : > { %6080 = vmatprep.subr.bf16.mxu1 %v6421_v1  ;;  %v4633_v7 = vrot.slane %v4632_v37, 2 }
 0x1fa   : > { %v4820_v28 = vcombine.low %v7395_v3, %v4819_v62 }
 0x1fb   : > { %6065 = vmatpush3.bf16.msra.mxu0 %v6318_v18  ;;  %v4638_v15 = vsel %vm6665_vm2, %v4633_v7, %v4637_v40 }
 0x1fc   : > { %6081 = vmatpush3.bf16.msra.mxu1 %v6317_v47  ;;  %6066 = vmatprep.subr.bf16.mxu0 %v6421_v1  ;;  %v4649_v46 = vcombine.low %v7429_v44, %v4638_v15 }
 0x1fd   : > { %6098 = vmatprep.subr.bf16.mxu1 %v6421_v1 }
 0x1fe   : > { %v4663_v47 = vrot.slane %v4649_v46, %v6620_v2 }
 0x1ff   : > { %6083 = vmatmul.mubr.msk.bf16.vlgmr.msra.gmra.mxu1 %vm523_vm6, %v4203_v51  ;;  %6067 = vmatpush3.bf16.msra.mxu0 %v6320_v52 }
 0x200   : > { %6099 = vmatpush3.bf16.msra.mxu1 %v6319_v50  ;;  %6106 = vmatprep.mubr.msk.bf16.mxu1 %vm6422_vm0, %v6421_v1  ;;  %v4664_v3 = vcombine.low %v7425_v43, %v4663_v47 }
 0x201   : > { %6100 = vmatprep.subr.bf16.mxu1 %v6421_v1  ;;  %6068 = vmatprep.subr.bf16.mxu0 %v6421_v1 }
 0x203   : > { %6069 = vmatpush3.bf16.msra.mxu0 %v6322_v63 }
 0x204   : > { %6101 = vmatpush3.bf16.msra.mxu1 %v6321_v54  ;;  %6086 = vmatprep.subr.bf16.mxu0 %v6421_v1 }
 0x205   : > { %6102 = vmatprep.subr.bf16.mxu1 %v6421_v1 }
 0x206   : > { %6071 = vmatmul.mubr.msk.bf16.vlgmr.msra.gmra.mxu0 %vm523_vm6, %v4007_v11 }
 0x207   : > { %6087 = vmatpush3.bf16.msra.mxu0 %v6326_v6  ;;  %6094 = vmatprep.mubr.msk.bf16.mxu0 %vm6422_vm0, %v6421_v1 }
 0x208   : > { %6103 = vmatpush3.bf16.msra.mxu1 %v6323_v0  ;;  %6088 = vmatprep.subr.bf16.mxu0 %v6421_v1 }
 0x209   : > { %6104 = vmatprep.subr.bf16.mxu1 %v6421_v1 }
 0x20b   : > { %6089 = vmatpush3.bf16.msra.mxu0 %v6328_v59 }
 0x20c   : > { %6105 = vmatpush3.bf16.msra.mxu1 %v6327_v16  ;;  %6090 = vmatprep.subr.bf16.mxu0 %v6421_v1 }
 0x20d   : > { %6122 = vmatprep.subr.bf16.mxu1 %v6421_v1 }
 0x20f   : > { %6107 = vmatmul.mubr.msk.bf16.vlgmr.msra.gmra.mxu1 %vm523_vm6, %v4468_v20  ;;  %6091 = vmatpush3.bf16.msra.mxu0 %v6332_v22 }
 0x210   : > { %6123 = vmatpush3.bf16.msra.mxu1 %v6331_v14  ;;  %6130 = vmatprep.mubr.msk.bf16.mxu1 %vm6422_vm0, %v6421_v1 }
 0x211   : > { %6124 = vmatprep.subr.bf16.mxu1 %v6421_v1  ;;  %6092 = vmatprep.subr.bf16.mxu0 %v6421_v1 }
 0x213   : > { %6093 = vmatpush3.bf16.msra.mxu0 %v6334_v57 }
 0x214   : > { %6125 = vmatpush3.bf16.msra.mxu1 %v6333_v60  ;;  %6110 = vmatprep.subr.bf16.mxu0 %v6421_v1 }
 0x215   : > { %6126 = vmatprep.subr.bf16.mxu1 %v6421_v1 }
 0x216   : > { %6095 = vmatmul.mubr.msk.bf16.vlgmr.msra.gmra.mxu0 %vm523_vm6, %v4359_v33 }
 0x217   : > { %6111 = vmatpush3.bf16.msra.mxu0 %v6336_v29  ;;  %6118 = vmatprep.mubr.msk.bf16.mxu0 %vm6422_vm0, %v6421_v1 }
 0x218   : > { %6127 = vmatpush3.bf16.msra.mxu1 %v6335_v5  ;;  %6112 = vmatprep.subr.bf16.mxu0 %v6421_v1 }
 0x219   : > { %6128 = vmatprep.subr.bf16.mxu1 %v6421_v1 }
 0x21b   : > { %6113 = vmatpush3.bf16.msra.mxu0 %v6338_v24 }
 0x21c   : > { %6129 = vmatpush3.bf16.msra.mxu1 %v6337_v41  ;;  %6114 = vmatprep.subr.bf16.mxu0 %v6421_v1 }
 0x21f   : > { %6131 = vmatmul.mubr.msk.bf16.vlgmr.msra.gmra.mxu1 %vm523_vm6, %v4820_v28  ;;  %6115 = vmatpush3.bf16.msra.mxu0 %v6339_v34 }
 0x220   : > { %6116 = vmatprep.subr.bf16.mxu0 %v6421_v1 }
 0x223   : > { %6117 = vmatpush3.bf16.msra.mxu0 %v6340_v42 }
 0x226   : > { %6119 = vmatmul.mubr.msk.bf16.vlgmr.msra.gmra.mxu0 %vm523_vm6, %v4664_v3 }
 0x2a5   : > { %v3613_v18 = vpop.f32.mrf.mxu0 }
 0x2a6   : > { %3620 = vst.msk [vmem:[#allocation5] sm:$0xff] %vm523_vm6, %v3613_v18 }
 0x2a7   : > { %v6036_v44 = vpop.f32.mrf.mxu0 }
 0x2a9   : > { %v3616_v48 = vpop.f32.mrf.mxu0 }
 0x2aa   : > { %3621 = vst.msk [vmem:[#allocation5 + $0x8] sm:$0xff] %vm523_vm6, %v3616_v48 }
 0x2ab   : > { %v6037_v49 = vpop.f32.mrf.mxu0 }
 0x2ad   : > { %v3812_v54 = vld [vmem:[#allocation5] sm:$0xff] }
 0x2af   : > { %v3961_v50 = vpop.f32.mrf.mxu1 }
 0x2b1   : > { %v6060_v51 = vpop.f32.mrf.mxu1  ;;  %v3813_v56 = vld [vmem:[#allocation5 + $0x8] sm:$0xff] }
 0x2b3   : > { %v3964_v52 = vpop.f32.mrf.mxu1 }
 0x2b5   : > { %v6061_v53 = vpop.f32.mrf.mxu1 }
 0x2b6   : > { %v3805_v1 = vpop.f32.mrf.mxu0 }
 0x2b7   : > { %v3814_v2 = vadd.f32 %v3812_v54, %v3805_v1 }
 0x2b8   : > { %v6048_v55 = vpop.f32.mrf.mxu0 }
 0x2b9   : > { %3816 = vst.msk [vmem:[#allocation5] sm:$0xff] %vm523_vm6, %v3814_v2 }
 0x2ba   : > { %v3808_v43 = vpop.f32.mrf.mxu0 }
 0x2bb   : > { %v3815_v63 = vadd.f32 %v3813_v56, %v3808_v43 }
 0x2bc   : > { %v6049_v35 = vpop.f32.mrf.mxu0 }
 0x2bd   : > { %3817 = vst.msk [vmem:[#allocation5 + $0x8] sm:$0xff] %vm523_vm6, %v3815_v63 }
 0x2bf   : > { %v4265_v0 = vpop.f32.mrf.mxu1 }
 0x2c0   : > { %v3968_v10 = vld [vmem:[#allocation5] sm:$0xff] }
 0x2c1   : > { %v6084_v6 = vpop.f32.mrf.mxu1  ;;  %v3970_v58 = vadd.f32 %v3968_v10, %v3961_v50  ;;  %v5546_v50 = vld [vmem:[%s7635_s6] ss:$0 sm:$0xff] }
 0x2c3   : > { %v4268_v11 = vpop.f32.mrf.mxu1  ;;  %3972 = vst.msk [vmem:[#allocation5] sm:$0xff] %vm523_vm6, %v3970_v58 }
 0x2c4   : > { %v3969_v13 = vld [vmem:[#allocation5 + $0x8] sm:$0xff] }
 0x2c5   : > { %v6085_v12 = vpop.f32.mrf.mxu1  ;;  %v3971_v16 = vadd.f32 %v3969_v13, %v3964_v52 }
 0x2c6   : > { %v4069_v17 = vpop.f32.mrf.mxu0 }
 0x2c7   : > { %3973 = vst.msk [vmem:[#allocation5 + $0x8] sm:$0xff] %vm523_vm6, %v3971_v16 }
 0x2c8   : > { %v6072_v59 = vpop.f32.mrf.mxu0 }
 0x2ca   : > { %v4076_v61 = vld [vmem:[#allocation5] sm:$0xff]  ;;  %v4072_v4 = vpop.f32.mrf.mxu0 }
 0x2cb   : > { %v4078_v8 = vadd.f32 %v4076_v61, %v4069_v17 }
 0x2cc   : > { %v6073_v9 = vpop.f32.mrf.mxu0 }
 0x2cd   : > { %4080 = vst.msk [vmem:[#allocation5] sm:$0xff] %vm523_vm6, %v4078_v8 }
 0x2ce   : > { %v4077_v14 = vld [vmem:[#allocation5 + $0x8] sm:$0xff] }
 0x2cf   : > { %v4530_v19 = vpop.f32.mrf.mxu1  ;;  %v4079_v20 = vadd.f32 %v4077_v14, %v4072_v4 }
 0x2d1   : > { %v6108_v22 = vpop.f32.mrf.mxu1  ;;  %4081 = vst.msk [vmem:[#allocation5 + $0x8] sm:$0xff] %vm523_vm6, %v4079_v20 }
 0x2d3   : > { %v4533_v23 = vpop.f32.mrf.mxu1 }
 0x2d4   : > { %v4272_v26 = vld [vmem:[#allocation5] sm:$0xff] }
 0x2d5   : > { %v6109_v25 = vpop.f32.mrf.mxu1  ;;  %v4274_v30 = vadd.f32 %v4272_v26, %v4265_v0 }
 0x2d6   : > { %v4421_v31 = vpop.f32.mrf.mxu0 }
 0x2d7   : > { %4276 = vst.msk [vmem:[#allocation5] sm:$0xff] %vm523_vm6, %v4274_v30 }
 0x2d8   : > { %v6096_v32 = vpop.f32.mrf.mxu0  ;;  %v4273_v60 = vld [vmem:[#allocation5 + $0x8] sm:$0xff] }
 0x2d9   : > { %v4275_v21 = vadd.f32 %v4273_v60, %v4268_v11 }
 0x2da   : > { %v4424_v57 = vpop.f32.mrf.mxu0 }
 0x2db   : > { %4277 = vst.msk [vmem:[#allocation5 + $0x8] sm:$0xff] %vm523_vm6, %v4275_v21 }
 0x2dc   : > { %v6097_v27 = vpop.f32.mrf.mxu0 }
 0x2de   : > { %v4428_v37 = vld [vmem:[#allocation5] sm:$0xff] }
 0x2df   : > { %v4882_v36 = vpop.f32.mrf.mxu1  ;;  %v4430_v38 = vadd.f32 %v4428_v37, %v4421_v31 }
 0x2e1   : > { %v6132_v5 = vpop.f32.mrf.mxu1  ;;  %4432 = vst.msk [vmem:[#allocation5] sm:$0xff] %vm523_vm6, %v4430_v38 }
 0x2e2   : > { %v4429_v29 = vld [vmem:[#allocation5 + $0x8] sm:$0xff] }
 0x2e3   : > { %v4885_v45 = vpop.f32.mrf.mxu1  ;;  %v4431_v39 = vadd.f32 %v4429_v29, %v4424_v57 }
 0x2e5   : > { %v6133_v33 = vpop.f32.mrf.mxu1  ;;  %4433 = vst.msk [vmem:[#allocation5 + $0x8] sm:$0xff] %vm523_vm6, %v4431_v39 }
 0x2e6   : > { %v4726_v7 = vpop.f32.mrf.mxu0 }
 0x2e8   : > { %v4537_v40 = vld [vmem:[#allocation5] sm:$0xff]  ;;  %v6120_v41 = vpop.f32.mrf.mxu0 }
 0x2e9   : > { %v4539_v24 = vadd.f32 %v4537_v40, %v4530_v19 }
 0x2ea   : > { %v4729_v62 = vpop.f32.mrf.mxu0 }
 0x2eb   : > { %4541 = vst.msk [vmem:[#allocation5] sm:$0xff] %vm523_vm6, %v4539_v24 }
 0x2ec   : > { %v4538_v15 = vld [vmem:[#allocation5 + $0x8] sm:$0xff]  ;;  %v6121_v28 = vpop.f32.mrf.mxu0 }
 0x2ed   : > { %v4540_v34 = vadd.f32 %v4538_v15, %v4533_v23 }
 0x2ef   : > { %4542 = vst.msk [vmem:[#allocation5 + $0x8] sm:$0xff] %vm523_vm6, %v4540_v34 }
 0x2f2   : > { %v4733_v46 = vld [vmem:[#allocation5] sm:$0xff] }
 0x2f3   : > { %v4735_v42 = vadd.f32 %v4733_v46, %v4726_v7 }
 0x2f5   : > { %4737 = vst.msk [vmem:[#allocation5] sm:$0xff] %vm523_vm6, %v4735_v42 }
 0x2f6   : > { %v4734_v47 = vld [vmem:[#allocation5 + $0x8] sm:$0xff] }
 0x2f7   : > { %v4736_v3 = vadd.f32 %v4734_v47, %v4729_v62 }
 0x2f9   : > { %4738 = vst.msk [vmem:[#allocation5 + $0x8] sm:$0xff] %vm523_vm6, %v4736_v3 }
 0x2fc   : > { %v4889_v18 = vld [vmem:[#allocation5] sm:$0xff] }
 0x2fd   : > { %v4891_v44 = vadd.f32 %v4889_v18, %v4882_v36 }
 0x2ff   : > { %4893 = vst.msk [vmem:[#allocation5] sm:$0xff] %vm523_vm6, %v4891_v44 }
 0x300   : > { %v4890_v48 = vld [vmem:[#allocation5 + $0x8] sm:$0xff] }
 0x301   : > { %v4892_v49 = vadd.f32 %v4890_v48, %v4885_v45 }
 0x303   : > { %4894 = vst.msk [vmem:[#allocation5 + $0x8] sm:$0xff] %vm523_vm6, %v4892_v49 }
 0x306   : > { %v4895_v51 = vld [vmem:[#allocation5] sm:$0xff] }
 0x307   : > { %v4904_v52 = vadd.f32 %v5546_v50, %v4895_v51 }
 0x309   : > { %v4906_v53 = vmax.f32 %v4904_v52, 0.0 }
 0x30a   : > { %v4896_v1 = vld [vmem:[#allocation5 + $0x8] sm:$0xff] }
 0x30b   : > { %v4905_v54 = vadd.f32 %v5546_v50, %v4896_v1  ;;  %4908 = vst.msk [vmem:[%s286_s17] sm:$0xff] %vm523_vm6, %v4906_v53 }
 0x30d   : > { %v4907_v2 = vmax.f32 %v4905_v54, 0.0 }
 0x30f   : > { %4909 = vst.msk [vmem:[%s286_s17 + $0x8] sm:$0xff] %vm523_vm6, %v4907_v2 }
 0x310   : > { %6372 = shalt.err (!%p6369_p3)
}
 0x311   : > { %s6373_s29 = scalar_lea.hbm %s7584_s21, 256  ;;  %s6377_s15 = scalar_lea.hbm %s7636_s7, 512 }
 0x312   : > { %p6374_p4 = scmp.ne.s32.totalorder %s7584_s21, %s6373_s29  ;;  %p6378_p9 = scmp.lt.s32.totalorder %s7584_s21, %s7636_s7 }
 0x313   : > { %p6379_p10 = scmp.lt.s32.totalorder %s6377_s15, %s6373_s29 }
 0x314   : > { %p6375_p7 = pnand %p6374_p4, %p6506_p5 }
 0x315   : > { %p6380_p11 = por %p6379_p10, %p6378_p9 }
 0x316   : > { %p6376_p8 = pneg %p6375_p7 }
 0x318   : > { %p6381_p12 = pnand %p6380_p11, %p6376_p8 }
 0x31a   : > { %6384 = shalt.err (!%p6381_p12)
}
 0x31b   : > { %s6426_s20 = smov 128   ;;  %s6427_s9 = smov 8  }
 0x31c   : > { %6134 = dma.vmem_to_hbm [thread:$0]  (%p6506_p5), %s7586_s18, 256, %s7584_s21, %s7589_s28, %s6426_s20, %s6426_s20, %s6427_s9  }
 0x31d PF: > { %p6140_p13 = scmp.ge.s32.totalorder %s6419_s27, 2  ;;  %s4939_s22 = sand.u32 1, %s6407_s24  }
 0x31e   : > { %s4940_s23 = scalar_lea.sflag [#allocation7], %s4939_s22 }
 0x31f   : > { %p6137_p0 = pnand %p6140_p13, %p6510_p6 }
 0x321   : > { %p6138_p1 = pneg %p6137_p0 }
 0x323   : > { %6402 = dma.done.wait (%p6138_p1), %s4940_s23, 256  }
 0x324   : > { %6404 = vsyncadd (%p6138_p1), %s4940_s23, 4294967040  ;;  %p17_p2 = scmp.ge.s32.totalorder %s6493_s30, 4   ;;  %s7653_s24 = smov %s6411_s25 }
 0x325   : > { %s7654_s25 = smov %s6415_s26  ;;  %s7655_s26 = smov %s6504_s10 }
 0x326   : > { %s7656_s27 = smov %s6493_s30  ;;  %19 = sbr.rel (!%p17_p2) target bundleno = 3 (0x3), region = 116 }
 0x32b   :  { %4945 = vsyncpa [#allocation7], 1 }
 0x32c   :  { %4947 = vsyncpa [#allocation7 + $0x1], 1 }

</bundles_post_ra>
